<compile_context>
chip_gen: v7x
topology: tpu7x:2x2x1
jax: 0.10.0
libtpu: 0.0.40
codegen_flags: <defaults>
</compile_context>

<pallas_src>
import math
from functools import partial

import jax
import jax.numpy as jnp
import numpy as np
from jax import lax
from jax.experimental import pallas as pl
from jax.experimental.pallas import tpu as pltpu


def hierarchical_attention_kernel(
    # per-batch data (blocked over batch)
    enc_ref, dec_ref, mask_ref,
    # fused enc-LHS weights + char attention (EnhancedBahdanauAttention) params
    w_eqkv_ref, w_dec_ref, w_att_ref, w_l1_ref, b_l1_ref,
    w_gate_c_ref, w_gate_d_ref, b_gate_ref,
    # word attention (MultiHeadAttention) params
    wo_ref, bo_ref, ln_g_ref, ln_b_ref,
    # fusion params
    wf1_c_ref, wf1_w_ref, bf1_ref, wf2_ref, bf2_ref,
    # outputs
    fused_ref, charw_ref, wordw_ref, charctx_ref, wordctx_ref,
    # scratch
    qkv_sc, attn_sc,
    *, num_heads, attn_size,
):
    f32 = jnp.float32
    bf16 = jnp.bfloat16
    Bt, S, F = enc_ref.shape
    A = attn_size
    dk = F // num_heads

    enc_bf2 = enc_ref[...].reshape(Bt * S, F)        # bf16 packed rows (streamed bf16)
    enc_f3 = enc_ref[...].astype(f32)                # single f32 cast (char ctx + residual)
    dec_bf = dec_ref[...]                            # [Bt, F] bf16
    mask2 = mask_ref[...]                            # [Bt, S] f32

    # ---- one wide MXU push for every enc-LHS projection: [pe | q | k | v] ----
    big = jnp.dot(enc_bf2, w_eqkv_ref[...], preferred_element_type=f32)   # [Bt*S, A+3F]
    # stage q/k/v once as bf16: halves footprint, bounds live ranges across the head loop
    qkv_sc[...] = big[:, A:].astype(bf16)

    # ---------------- char-level Enhanced Bahdanau attention ----------------
    pe3 = big[:, :A].reshape(Bt, S, A)                                    # [Bt, S, A]
    pd = jnp.dot(dec_bf, w_dec_ref[...], preferred_element_type=f32)      # [Bt, A]
    af = jnp.tanh(pe3 + pd[:, None, :])                                   # [Bt, S, A]
    # one residual attention layer (num_layers=2 default)
    af2 = af.reshape(Bt * S, A)
    af2 = jnp.tanh(jnp.dot(af2.astype(bf16), w_l1_ref[...],
                           preferred_element_type=f32) + b_l1_ref[...] + af2)
    af3 = af2.reshape(Bt, S, A)
    # attention_weight: Linear(A, 1, bias=False)
    scores = jnp.sum(af3 * w_att_ref[...], axis=-1)                       # [Bt, S]
    scores = jnp.where(mask2 == 0.0, f32(-1e9), scores)
    m = jnp.max(scores, axis=-1, keepdims=True)
    e = jnp.exp(scores - m)
    char_w = e / jnp.sum(e, axis=-1, keepdims=True)   # exact normalization (exposed output)
    # char context: VPU multiply + sublane reduce (keeps the MXU free for projections)
    char_ctx = jnp.sum(char_w[:, :, None] * enc_f3, axis=1)               # [Bt, F]
    # gating: sigmoid(Linear(2F -> A)(cat([context, decoder])))  (requires A == F)
    gate = jax.nn.sigmoid(
        jnp.dot(char_ctx.astype(bf16), w_gate_c_ref[...], preferred_element_type=f32)
        + jnp.dot(dec_bf, w_gate_d_ref[...], preferred_element_type=f32)
        + b_gate_ref[...])                                                # [Bt, A]
    char_ctx = gate * char_ctx
    # coverage == attention_weights on this path (coverage=None) -> aliased in wrapper

    # ---------------- word-level multi-head self-attention ----------------
    scale = f32(1.0 / math.sqrt(dk))
    inv_heads = f32(1.0 / num_heads)
    wordw_ref[...] = jnp.zeros_like(wordw_ref)   # accumulate mean head weights in-place
    # TODO(synk): for dk < 128 the per-head lane slices are narrower than a vreg; a
    # lane-aligned head-grouped layout (process ceil(128/dk) heads jointly) would avoid
    # per-head relayout traffic on v6e/v7x.
    for h in range(num_heads):
        lo = h * dk
        qh = qkv_sc[:, lo:lo + dk].reshape(Bt, S, dk)                     # bf16
        kh = qkv_sc[:, F + lo:F + lo + dk].reshape(Bt, S, dk)
        vh = qkv_sc[:, 2 * F + lo:2 * F + lo + dk].reshape(Bt, S, dk)
        sc = jnp.einsum('bqd,bkd->bqk', qh, kh,
                        preferred_element_type=f32) * scale               # [Bt, S, S]
        # TODO(synk): PyTorch broadcasts a 2-D [B,S] mask against [B,H,Sq,Sk] (ill-defined
        # in general); we interpret it as a key mask (a no-op for all-ones masks).
        sc = jnp.where(mask2[:, None, :] == 0.0, f32(-1e9), sc)
        mh = jnp.max(sc, axis=-1, keepdims=True)
        eh = jnp.exp(sc - mh)
        wh = eh / jnp.sum(eh, axis=-1, keepdims=True)  # exact normalization
        wordw_ref[...] += wh * inv_heads
        oh = jnp.einsum('bqk,bkd->bqd', wh.astype(bf16), vh,
                        preferred_element_type=f32)                       # [Bt, S, dk]
        attn_sc[:, lo:lo + dk] = oh.reshape(Bt * S, dk).astype(bf16)
    # single full-contraction-depth (K = F) output projection after the loop
    proj = jnp.dot(attn_sc[...], wo_ref[...], preferred_element_type=f32) + bo_ref[...]
    x = proj + enc_f3.reshape(Bt * S, F)                                  # residual
    mu = jnp.mean(x, axis=-1, keepdims=True)
    var = jnp.mean((x - mu) * (x - mu), axis=-1, keepdims=True)
    word_feats = (x - mu) * lax.rsqrt(var + 1e-5) * ln_g_ref[...] + ln_b_ref[...]
    word_ctx = jnp.mean(word_feats.reshape(Bt, S, F), axis=1)             # [Bt, F]

    # ---------------- fusion MLP ----------------
    # Linear(2F, F) applied to cat([char_ctx, word_ctx]) == split matmuls.
    h1 = jnp.maximum(
        jnp.dot(char_ctx.astype(bf16), wf1_c_ref[...], preferred_element_type=f32)
        + jnp.dot(word_ctx.astype(bf16), wf1_w_ref[...], preferred_element_type=f32)
        + bf1_ref[...], 0.0)
    fused = jnp.dot(h1.astype(bf16), wf2_ref[...], preferred_element_type=f32) + bf2_ref[...]

    fused_ref[...] = fused
    charw_ref[...] = char_w
    charctx_ref[...] = char_ctx
    wordctx_ref[...] = word_ctx


def _pick_block_batch(B, S, target_rows, prefer_multi_step):
    # Aim Bt*S ~= target_rows (128 on v5e, 256 on v6e/v7x). Bt sits on the sublane axis of
    # the 2-D input/output blocks, so keep Bt a multiple of 8 or the full batch.
    target = max(1, target_rows // max(S, 1))
    if prefer_multi_step and B >= 16:
        target = min(target, B // 2)   # v7x: give megacore >= 2 grid steps to shard
    candidates = [d for d in range(1, B + 1) if B % d == 0 and (d == B or d % 8 == 0)]
    fitting = [d for d in candidates if d <= target]
    return max(fitting) if fitting else min(candidates)


def hierarchical_attention(params, enc, dec, mask, *, num_heads, block_batch=None):
    B, S, F = enc.shape
    A = params["w_enc"].shape[1]
    assert F % num_heads == 0
    assert A == F, "gating / residual attention layer require attention_size == feature_size"
    bf16 = jnp.bfloat16

    # generation-aware tuning
    kind = ""
    try:
        kind = jax.devices()[0].device_kind.lower()
    except Exception:
        pass
    is_v5e = ("v5 lite" in kind) or ("v5e" in kind) or ("v5litepod" in kind)
    is_v7 = "v7" in kind
    try:
        vmem_cap = int(pltpu.get_tpu_info().vmem_capacity_bytes)
    except Exception:
        vmem_cap = (64 if is_v7 else 128) * 1024 * 1024
    vmem_limit = int(min(vmem_cap * 3 // 4, 100 * 1024 * 1024))

    if block_batch is None:
        block_batch = _pick_block_batch(B, S, 128 if is_v5e else 256, is_v7)
    Bt = block_batch
    assert B % Bt == 0
    grid = (B // Bt,)

    # stream activations as bf16 (halves DMA bytes and the double-buffered enc block)
    enc_bf = enc.astype(bf16)
    dec_bf = dec.reshape(B, F).astype(bf16)
    mask2 = mask.reshape(B, S).astype(jnp.float32)

    # fuse all enc-LHS projection weights into one wide MXU operand, pre-cast to bf16
    w_eqkv = jnp.concatenate(
        [params["w_enc"], params["wq"], params["wk"], params["wv"]], axis=1).astype(bf16)

    weights = [
        w_eqkv,
        params["w_dec"].astype(bf16),
        params["w_att"],                      # f32 (used elementwise, not on MXU)
        params["w_l1"].astype(bf16),
        params["b_l1"],
        params["w_gate_c"].astype(bf16),
        params["w_gate_d"].astype(bf16),
        params["b_gate"],
        params["wo"].astype(bf16),
        params["bo"], params["ln_g"], params["ln_b"],
        params["wf1_c"].astype(bf16), params["wf1_w"].astype(bf16), params["bf1"],
        params["wf2"].astype(bf16), params["bf2"],
    ]

    def build_specs(single_buffer_weights):
        def w_spec(arr):
            idx = lambda b: (0,) * arr.ndim
            if single_buffer_weights:
                # grid-invariant weights: double-buffering them only wastes VMEM (v7x 64 MiB)
                return pl.BlockSpec(arr.shape, idx, pipeline_mode=pl.Buffered(1))
            return pl.BlockSpec(arr.shape, idx)
        in_specs = ([pl.BlockSpec((Bt, S, F), lambda b: (b, 0, 0)),
                     pl.BlockSpec((Bt, F), lambda b: (b, 0)),
                     pl.BlockSpec((Bt, S), lambda b: (b, 0))]
                    + [w_spec(w) for w in weights])
        out_specs = [
            pl.BlockSpec((Bt, F), lambda b: (b, 0)),        # fused_context
            pl.BlockSpec((Bt, S), lambda b: (b, 0)),        # char_weights
            pl.BlockSpec((Bt, S, S), lambda b: (b, 0, 0)),  # word_weights (mean over heads)
            pl.BlockSpec((Bt, F), lambda b: (b, 0)),        # char_context
            pl.BlockSpec((Bt, F), lambda b: (b, 0)),        # word_context
        ]
        return in_specs, out_specs

    out_shape = [
        jax.ShapeDtypeStruct((B, F), jnp.float32),
        jax.ShapeDtypeStruct((B, S), jnp.float32),
        # TODO(synk): bf16 writeback for word_weights would halve the largest HBM write
        # (worth it on v5e); kept f32 to match the module's output dtype.
        jax.ShapeDtypeStruct((B, S, S), jnp.float32),
        jax.ShapeDtypeStruct((B, F), jnp.float32),
        jax.ShapeDtypeStruct((B, F), jnp.float32),
    ]
    scratch_shapes = [
        pltpu.VMEM((Bt * S, 3 * F), bf16),   # staged q/k/v (single cast pass)
        pltpu.VMEM((Bt * S, F), bf16),       # concatenated per-head attention outputs
    ]

    kernel = partial(hierarchical_attention_kernel, num_heads=num_heads, attn_size=A)

    def run(single_buffer_weights):
        in_specs, out_specs = build_specs(single_buffer_weights)
        return pl.pallas_call(
            kernel,
            grid=grid,
            in_specs=in_specs,
            out_specs=out_specs,
            out_shape=out_shape,
            scratch_shapes=scratch_shapes,
            compiler_params=pltpu.CompilerParams(
                dimension_semantics=("parallel",),        # batch axis is independent
                vmem_limit_bytes=vmem_limit,
            ),
        )(enc_bf, dec_bf, mask2, *weights)

    try:
        fused, charw, wordw, charctx, wordctx = run(True)
    except Exception:
        # pipeline_mode=pl.Buffered(1) not supported by this Pallas build: fall back.
        fused, charw, wordw, charctx, wordctx = run(False)

    attention_info = {
        "char_weights": charw,
        "word_weights": wordw,
        "coverage": charw,   # coverage == attention_weights (coverage=None input path)
        "char_context": charctx,
        "word_context": wordctx,
    }
    return fused, attention_info


def make_params(key, F, A, H):
    # Deterministic xavier-uniform-like init. Weights stored pre-transposed ([in, out]).
    def xavier(k, shape):
        fan_in, fan_out = shape[0], shape[-1]
        a = math.sqrt(6.0 / (fan_in + fan_out))
        return jax.random.uniform(k, shape, jnp.float32, -a, a)

    keys = jax.random.split(key, 16)
    p = {
        "w_enc": xavier(keys[0], (F, A)),
        "w_dec": xavier(keys[1], (F, A)),
        "w_att": xavier(keys[2], (1, A)),
        "w_l1": xavier(keys[3], (A, A)),
        "b_l1": jax.random.uniform(keys[4], (1, A), jnp.float32, -0.05, 0.05),
        "w_gate_c": xavier(keys[5], (F, A)),
        "w_gate_d": xavier(keys[6], (F, A)),
        "b_gate": jax.random.uniform(keys[7], (1, A), jnp.float32, -0.05, 0.05),
        "wq": xavier(keys[8], (F, F)),
        "wk": xavier(keys[9], (F, F)),
        "wv": xavier(keys[10], (F, F)),
        "wo": xavier(keys[11], (F, F)),
        "bo": jnp.zeros((1, F), jnp.float32),
        "ln_g": jnp.ones((1, F), jnp.float32),
        "ln_b": jnp.zeros((1, F), jnp.float32),
        "wf1_c": xavier(keys[12], (F, F)),
        "wf1_w": xavier(keys[13], (F, F)),
        "bf1": jax.random.uniform(keys[14], (1, F), jnp.float32, -0.05, 0.05),
        "wf2": xavier(keys[15], (F, F)),
        "bf2": jnp.zeros((1, F), jnp.float32),
    }
    # TODO(synk): coverage_projection and attention_combiner exist in the PyTorch module
    # but are unused on this forward path (coverage=None), so they are not materialized.
    return p


def ref_forward(params, enc, dec, mask, num_heads):
    # Pure-JAX reference mirroring the PyTorch forward (dropout = identity).
    B, S, F = enc.shape
    maskf = mask.astype(jnp.float32)
    pe = jnp.einsum("bsf,fa->bsa", enc, params["w_enc"])
    pd = jnp.einsum("bf,fa->ba", dec, params["w_dec"])
    af = jnp.tanh(pe + pd[:, None, :])
    af = jnp.tanh(jnp.einsum("bsa,ac->bsc", af, params["w_l1"]) + params["b_l1"] + af)
    scores = jnp.einsum("bsa,a->bs", af, params["w_att"][0])
    scores = jnp.where(maskf == 0, -1e9, scores)
    char_w = jax.nn.softmax(scores, axis=-1)
    char_ctx = jnp.einsum("bs,bsf->bf", char_w, enc)
    gate = jax.nn.sigmoid(char_ctx @ params["w_gate_c"] + dec @ params["w_gate_d"]
                          + params["b_gate"])
    char_ctx = gate * char_ctx
    coverage = char_w

    dk = F // num_heads
    q = (enc @ params["wq"]).reshape(B, S, num_heads, dk).transpose(0, 2, 1, 3)
    k = (enc @ params["wk"]).reshape(B, S, num_heads, dk).transpose(0, 2, 1, 3)
    v = (enc @ params["wv"]).reshape(B, S, num_heads, dk).transpose(0, 2, 1, 3)
    sc = jnp.einsum("bhqd,bhkd->bhqk", q, k) / math.sqrt(dk)
    sc = jnp.where(maskf[:, None, None, :] == 0, -1e9, sc)
    w = jax.nn.softmax(sc, axis=-1)
    out = jnp.einsum("bhqk,bhkd->bhqd", w, v).transpose(0, 2, 1, 3).reshape(B, S, F)
    proj = out @ params["wo"] + params["bo"]
    x = proj + enc
    mu = x.mean(-1, keepdims=True)
    var = ((x - mu) ** 2).mean(-1, keepdims=True)
    word_feats = (x - mu) / jnp.sqrt(var + 1e-5) * params["ln_g"] + params["ln_b"]
    word_ctx = word_feats.mean(axis=1)
    word_w = w.mean(axis=1)

    h1 = jnp.maximum(char_ctx @ params["wf1_c"] + word_ctx @ params["wf1_w"]
                     + params["bf1"], 0.0)
    fused = h1 @ params["wf2"] + params["bf2"]
    info = {"char_weights": char_w, "word_weights": word_w, "coverage": coverage,
            "char_context": char_ctx, "word_context": word_ctx}
    return fused, info


if __name__ == "__main__":
    B, S, F, H = 2, 8, 32, 4
    A = F  # char_attention_size must equal feature_size for the gating product to broadcast

    key = jax.random.PRNGKey(0)
    kp, ke, kd = jax.random.split(key, 3)
    params = make_params(kp, F, A, H)
    enc = jax.random.normal(ke, (B, S, F), jnp.float32)
    dec = jax.random.normal(kd, (B, F), jnp.float32)
    mask = jnp.ones((B, S), jnp.float32)  # all-valid mask (== mask=None semantics)

    fused, info = hierarchical_attention(params, enc, dec, mask, num_heads=H)
    jax.block_until_ready(fused)

    with jax.default_matmul_precision("float32"):
        fused_ref, info_ref = ref_forward(params, enc, dec, mask, H)

    np.testing.assert_allclose(np.asarray(fused), np.asarray(fused_ref), rtol=2e-2, atol=2e-2)
    for name in ["char_weights", "word_weights", "coverage", "char_context", "word_context"]:
        np.testing.assert_allclose(np.asarray(info[name]), np.asarray(info_ref[name]),
                                   rtol=2e-2, atol=2e-2)
    print("KERNEL_OK")
</pallas_src>

<mosaic_0001>
module attributes {stable_mosaic.version = 11 : i64} {
  func.func @hierarchical_attention_kernel(%arg0: i32, %arg1: memref<2x8x32xbf16, #tpu.memory_space<vmem>>, %arg2: memref<2x32xbf16, #tpu.memory_space<vmem>>, %arg3: memref<2x8xf32, #tpu.memory_space<vmem>>, %arg4: memref<32x128xbf16, #tpu.memory_space<vmem>>, %arg5: memref<32x32xbf16, #tpu.memory_space<vmem>>, %arg6: memref<1x32xf32, #tpu.memory_space<vmem>>, %arg7: memref<32x32xbf16, #tpu.memory_space<vmem>>, %arg8: memref<1x32xf32, #tpu.memory_space<vmem>>, %arg9: memref<32x32xbf16, #tpu.memory_space<vmem>>, %arg10: memref<32x32xbf16, #tpu.memory_space<vmem>>, %arg11: memref<1x32xf32, #tpu.memory_space<vmem>>, %arg12: memref<32x32xbf16, #tpu.memory_space<vmem>>, %arg13: memref<1x32xf32, #tpu.memory_space<vmem>>, %arg14: memref<1x32xf32, #tpu.memory_space<vmem>>, %arg15: memref<1x32xf32, #tpu.memory_space<vmem>>, %arg16: memref<32x32xbf16, #tpu.memory_space<vmem>>, %arg17: memref<32x32xbf16, #tpu.memory_space<vmem>>, %arg18: memref<1x32xf32, #tpu.memory_space<vmem>>, %arg19: memref<32x32xbf16, #tpu.memory_space<vmem>>, %arg20: memref<1x32xf32, #tpu.memory_space<vmem>>, %arg21: memref<2x32xf32, #tpu.memory_space<vmem>>, %arg22: memref<2x8xf32, #tpu.memory_space<vmem>>, %arg23: memref<2x8x8xf32, #tpu.memory_space<vmem>>, %arg24: memref<2x32xf32, #tpu.memory_space<vmem>>, %arg25: memref<2x32xf32, #tpu.memory_space<vmem>>, %arg26: memref<16x96xbf16, #tpu.memory_space<vmem>>, %arg27: memref<16x32xbf16, #tpu.memory_space<vmem>>) attributes {dimension_semantics = [#tpu.dimension_semantics<parallel>], iteration_bounds = array<i64: 1>, scalar_prefetch = 0 : i64, scratch_operands = 2 : i64, tpu.core_type = #tpu.core_type<tc>, window_params = [{transform_indices = @transform_0, window_bounds = array<i64: 2, 8, 32>}, {transform_indices = @transform_1, window_bounds = array<i64: 2, 32>}, {transform_indices = @transform_2, window_bounds = array<i64: 2, 8>}, {pipeline_mode = #tpu.pipeline_mode<synchronous>, transform_indices = @transform_3, window_bounds = array<i64: 32, 128>}, {pipeline_mode = #tpu.pipeline_mode<synchronous>, transform_indices = @transform_4, window_bounds = array<i64: 32, 32>}, {pipeline_mode = #tpu.pipeline_mode<synchronous>, transform_indices = @transform_5, window_bounds = array<i64: 1, 32>}, {pipeline_mode = #tpu.pipeline_mode<synchronous>, transform_indices = @transform_6, window_bounds = array<i64: 32, 32>}, {pipeline_mode = #tpu.pipeline_mode<synchronous>, transform_indices = @transform_7, window_bounds = array<i64: 1, 32>}, {pipeline_mode = #tpu.pipeline_mode<synchronous>, transform_indices = @transform_8, window_bounds = array<i64: 32, 32>}, {pipeline_mode = #tpu.pipeline_mode<synchronous>, transform_indices = @transform_9, window_bounds = array<i64: 32, 32>}, {pipeline_mode = #tpu.pipeline_mode<synchronous>, transform_indices = @transform_10, window_bounds = array<i64: 1, 32>}, {pipeline_mode = #tpu.pipeline_mode<synchronous>, transform_indices = @transform_11, window_bounds = array<i64: 32, 32>}, {pipeline_mode = #tpu.pipeline_mode<synchronous>, transform_indices = @transform_12, window_bounds = array<i64: 1, 32>}, {pipeline_mode = #tpu.pipeline_mode<synchronous>, transform_indices = @transform_13, window_bounds = array<i64: 1, 32>}, {pipeline_mode = #tpu.pipeline_mode<synchronous>, transform_indices = @transform_14, window_bounds = array<i64: 1, 32>}, {pipeline_mode = #tpu.pipeline_mode<synchronous>, transform_indices = @transform_15, window_bounds = array<i64: 32, 32>}, {pipeline_mode = #tpu.pipeline_mode<synchronous>, transform_indices = @transform_16, window_bounds = array<i64: 32, 32>}, {pipeline_mode = #tpu.pipeline_mode<synchronous>, transform_indices = @transform_17, window_bounds = array<i64: 1, 32>}, {pipeline_mode = #tpu.pipeline_mode<synchronous>, transform_indices = @transform_18, window_bounds = array<i64: 32, 32>}, {pipeline_mode = #tpu.pipeline_mode<synchronous>, transform_indices = @transform_19, window_bounds = array<i64: 1, 32>}, {transform_indices = @transform_20, window_bounds = array<i64: 2, 32>}, {transform_indices = @transform_21, window_bounds = array<i64: 2, 8>}, {transform_indices = @transform_22, window_bounds = array<i64: 2, 8, 8>}, {transform_indices = @transform_23, window_bounds = array<i64: 2, 32>}, {transform_indices = @transform_24, window_bounds = array<i64: 2, 32>}]} {
    %c0 = arith.constant 0 : index
    %c0_0 = arith.constant 0 : index
    %c0_1 = arith.constant 0 : index
    %0 = vector.load %arg1[%c0, %c0_0, %c0_1] : memref<2x8x32xbf16, #tpu.memory_space<vmem>>, vector<2x8x32xbf16>
    %1 = vector.shape_cast %0 : vector<2x8x32xbf16> to vector<16x32xbf16>
    %c0_2 = arith.constant 0 : index
    %c0_3 = arith.constant 0 : index
    %c0_4 = arith.constant 0 : index
    %2 = vector.load %arg1[%c0_2, %c0_3, %c0_4] : memref<2x8x32xbf16, #tpu.memory_space<vmem>>, vector<2x8x32xbf16>
    %3 = arith.extf %2 : vector<2x8x32xbf16> to vector<2x8x32xf32>
    %c0_5 = arith.constant 0 : index
    %c0_6 = arith.constant 0 : index
    %4 = vector.load %arg2[%c0_5, %c0_6] : memref<2x32xbf16, #tpu.memory_space<vmem>>, vector<2x32xbf16>
    %c0_7 = arith.constant 0 : index
    %c0_8 = arith.constant 0 : index
    %5 = vector.load %arg3[%c0_7, %c0_8] : memref<2x8xf32, #tpu.memory_space<vmem>>, vector<2x8xf32>
    %c0_9 = arith.constant 0 : index
    %c0_10 = arith.constant 0 : index
    %6 = vector.load %arg4[%c0_9, %c0_10] : memref<32x128xbf16, #tpu.memory_space<vmem>>, vector<32x128xbf16>
    %cst = arith.constant dense<0.000000e+00> : vector<16x128xf32>
    %7 = tpu.matmul %1, %6, %cst {dimension_numbers = #tpu.dot_dimension_numbers<[1], [0], [0], [1], [0, 0, 1, 1], [], []>} : vector<16x32xbf16>, vector<32x128xbf16>, vector<16x128xf32> -> vector<16x128xf32>
    %8 = vector.extract_strided_slice %7 {offsets = [0, 32], sizes = [16, 96], strides = [1, 1]} : vector<16x128xf32> to vector<16x96xf32>
    %9 = arith.truncf %8 : vector<16x96xf32> to vector<16x96xbf16>
    %c0_11 = arith.constant 0 : index
    %c0_12 = arith.constant 0 : index
    %10 = vector.load %arg26[%c0_11, %c0_12] : memref<16x96xbf16, #tpu.memory_space<vmem>>, vector<16x96xbf16>
    tpu.vector_store %arg26[%c0_11, %c0_12], %9 {strides = array<i32>} : memref<16x96xbf16, #tpu.memory_space<vmem>>, vector<16x96xbf16>,
    %11 = vector.extract_strided_slice %7 {offsets = [0, 0], sizes = [16, 32], strides = [1, 1]} : vector<16x128xf32> to vector<16x32xf32>
    %12 = vector.shape_cast %11 : vector<16x32xf32> to vector<2x8x32xf32>
    %c0_13 = arith.constant 0 : index
    %c0_14 = arith.constant 0 : index
    %13 = vector.load %arg5[%c0_13, %c0_14] : memref<32x32xbf16, #tpu.memory_space<vmem>>, vector<32x32xbf16>
    %cst_15 = arith.constant dense<0.000000e+00> : vector<2x32xf32>
    %14 = tpu.matmul %4, %13, %cst_15 {dimension_numbers = #tpu.dot_dimension_numbers<[1], [0], [0], [1], [0, 0, 1, 1], [], []>} : vector<2x32xbf16>, vector<32x32xbf16>, vector<2x32xf32> -> vector<2x32xf32>
    %15 = vector.shape_cast %14 : vector<2x32xf32> to vector<2x1x32xf32>
    %16 = vector.broadcast %15 : vector<2x1x32xf32> to vector<2x8x32xf32>
    %17 = arith.addf %12, %16 : vector<2x8x32xf32>
    %18 = math.tanh %17 : vector<2x8x32xf32>
    %19 = vector.shape_cast %18 : vector<2x8x32xf32> to vector<16x32xf32>
    %20 = arith.truncf %19 : vector<16x32xf32> to vector<16x32xbf16>
    %c0_16 = arith.constant 0 : index
    %c0_17 = arith.constant 0 : index
    %21 = vector.load %arg7[%c0_16, %c0_17] : memref<32x32xbf16, #tpu.memory_space<vmem>>, vector<32x32xbf16>
    %cst_18 = arith.constant dense<0.000000e+00> : vector<16x32xf32>
    %22 = tpu.matmul %20, %21, %cst_18 {dimension_numbers = #tpu.dot_dimension_numbers<[1], [0], [0], [1], [0, 0, 1, 1], [], []>} : vector<16x32xbf16>, vector<32x32xbf16>, vector<16x32xf32> -> vector<16x32xf32>
    %c0_19 = arith.constant 0 : index
    %c0_20 = arith.constant 0 : index
    %23 = vector.load %arg8[%c0_19, %c0_20] : memref<1x32xf32, #tpu.memory_space<vmem>>, vector<1x32xf32>
    %24 = vector.broadcast %23 : vector<1x32xf32> to vector<16x32xf32>
    %25 = arith.addf %22, %24 : vector<16x32xf32>
    %26 = arith.addf %25, %19 : vector<16x32xf32>
    %27 = math.tanh %26 : vector<16x32xf32>
    %28 = vector.shape_cast %27 : vector<16x32xf32> to vector<2x8x32xf32>
    %c0_21 = arith.constant 0 : index
    %c0_22 = arith.constant 0 : index
    %29 = vector.load %arg6[%c0_21, %c0_22] : memref<1x32xf32, #tpu.memory_space<vmem>>, vector<1x32xf32>
    %30 = vector.shape_cast %29 : vector<1x32xf32> to vector<1x1x32xf32>
    %31 = vector.broadcast %30 : vector<1x1x32xf32> to vector<2x8x32xf32>
    %32 = arith.mulf %28, %31 : vector<2x8x32xf32>
    %cst_23 = arith.constant dense<0.000000e+00> : vector<2x8xf32>
    %33 = vector.multi_reduction <add>, %32, %cst_23 [2] : vector<2x8x32xf32> to vector<2x8xf32>
    %cst_24 = arith.constant 0.000000e+00 : f32
    %34 = vector.broadcast %cst_24 : f32 to vector<2x8xf32>
    %35 = arith.cmpf oeq, %5, %34 : vector<2x8xf32>
    %cst_25 = arith.constant -1.000000e+09 : f32
    %36 = vector.broadcast %cst_25 : f32 to vector<2x8xf32>
    %37 = arith.select %35, %36, %33 : vector<2x8xi1>, vector<2x8xf32>
    %cst_26 = arith.constant dense<0xFF800000> : vector<2xf32>
    %38 = vector.multi_reduction <maximumf>, %37, %cst_26 [1] : vector<2x8xf32> to vector<2xf32>
    %39 = vector.shape_cast %38 : vector<2xf32> to vector<2x1xf32>
    %40 = vector.broadcast %39 : vector<2x1xf32> to vector<2x8xf32>
    %41 = arith.subf %37, %40 : vector<2x8xf32>
    %42 = math.exp %41 : vector<2x8xf32>
    %cst_27 = arith.constant dense<0.000000e+00> : vector<2xf32>
    %43 = vector.multi_reduction <add>, %42, %cst_27 [1] : vector<2x8xf32> to vector<2xf32>
    %44 = vector.shape_cast %43 : vector<2xf32> to vector<2x1xf32>
    %45 = vector.broadcast %44 : vector<2x1xf32> to vector<2x8xf32>
    %46 = arith.divf %42, %45 : vector<2x8xf32>
    %47 = vector.shape_cast %46 : vector<2x8xf32> to vector<2x8x1xf32>
    %48 = vector.broadcast %47 : vector<2x8x1xf32> to vector<2x8x32xf32>
    %49 = arith.mulf %48, %3 : vector<2x8x32xf32>
    %cst_28 = arith.constant dense<0.000000e+00> : vector<2x32xf32>
    %50 = vector.multi_reduction <add>, %49, %cst_28 [1] : vector<2x8x32xf32> to vector<2x32xf32>
    %51 = arith.truncf %50 : vector<2x32xf32> to vector<2x32xbf16>
    %c0_29 = arith.constant 0 : index
    %c0_30 = arith.constant 0 : index
    %52 = vector.load %arg9[%c0_29, %c0_30] : memref<32x32xbf16, #tpu.memory_space<vmem>>, vector<32x32xbf16>
    %cst_31 = arith.constant dense<0.000000e+00> : vector<2x32xf32>
    %53 = tpu.matmul %51, %52, %cst_31 {dimension_numbers = #tpu.dot_dimension_numbers<[1], [0], [0], [1], [0, 0, 1, 1], [], []>} : vector<2x32xbf16>, vector<32x32xbf16>, vector<2x32xf32> -> vector<2x32xf32>
    %c0_32 = arith.constant 0 : index
    %c0_33 = arith.constant 0 : index
    %54 = vector.load %arg10[%c0_32, %c0_33] : memref<32x32xbf16, #tpu.memory_space<vmem>>, vector<32x32xbf16>
    %cst_34 = arith.constant dense<0.000000e+00> : vector<2x32xf32>
    %55 = tpu.matmul %4, %54, %cst_34 {dimension_numbers = #tpu.dot_dimension_numbers<[1], [0], [0], [1], [0, 0, 1, 1], [], []>} : vector<2x32xbf16>, vector<32x32xbf16>, vector<2x32xf32> -> vector<2x32xf32>
    %56 = arith.addf %53, %55 : vector<2x32xf32>
    %c0_35 = arith.constant 0 : index
    %c0_36 = arith.constant 0 : index
    %57 = vector.load %arg11[%c0_35, %c0_36] : memref<1x32xf32, #tpu.memory_space<vmem>>, vector<1x32xf32>
    %58 = vector.broadcast %57 : vector<1x32xf32> to vector<2x32xf32>
    %59 = arith.addf %56, %58 : vector<2x32xf32>
    %60 = arith.negf %59 : vector<2x32xf32>
    %61 = math.exp %60 : vector<2x32xf32>
    %cst_37 = arith.constant 1.000000e+00 : f32
    %62 = vector.broadcast %cst_37 : f32 to vector<2x32xf32>
    %63 = arith.addf %62, %61 : vector<2x32xf32>
    %64 = arith.divf %62, %63 : vector<2x32xf32>
    %65 = arith.mulf %64, %50 : vector<2x32xf32>
    %cst_38 = arith.constant 0.000000e+00 : f32
    %66 = vector.broadcast %cst_38 : f32 to vector<2x8x8xf32>
    %c0_39 = arith.constant 0 : index
    %c0_40 = arith.constant 0 : index
    %c0_41 = arith.constant 0 : index
    %67 = vector.load %arg23[%c0_39, %c0_40, %c0_41] : memref<2x8x8xf32, #tpu.memory_space<vmem>>, vector<2x8x8xf32>
    tpu.vector_store %arg23[%c0_39, %c0_40, %c0_41], %66 {strides = array<i32>} : memref<2x8x8xf32, #tpu.memory_space<vmem>>, vector<2x8x8xf32>,
    %c0_42 = arith.constant 0 : index
    %c0_43 = arith.constant 0 : index
    %68 = vector.load %arg26[%c0_42, %c0_43] : memref<16x96xbf16, #tpu.memory_space<vmem>>, vector<16x8xbf16>
    %69 = vector.shape_cast %68 : vector<16x8xbf16> to vector<2x8x8xbf16>
    %c0_44 = arith.constant 0 : index
    %c32 = arith.constant 32 : index
    %70 = vector.load %arg26[%c0_44, %c32] : memref<16x96xbf16, #tpu.memory_space<vmem>>, vector<16x8xbf16>
    %71 = vector.shape_cast %70 : vector<16x8xbf16> to vector<2x8x8xbf16>
    %c0_45 = arith.constant 0 : index
    %c64 = arith.constant 64 : index
    %72 = vector.load %arg26[%c0_45, %c64] : memref<16x96xbf16, #tpu.memory_space<vmem>>, vector<16x8xbf16>
    %73 = vector.shape_cast %72 : vector<16x8xbf16> to vector<2x8x8xbf16>
    "tpu.trace_start"() <{level = 10 : i32, message = "bqd,bkd->bqk"}> : () -> ()
    %cst_46 = arith.constant dense<0.000000e+00> : vector<2x8x8xf32>
    %74 = tpu.matmul %69, %71, %cst_46 {dimension_numbers = #tpu.dot_dimension_numbers<[2], [2], [1], [1], [0, 0, 0, 1, 1, 1], [0], [0]>} : vector<2x8x8xbf16>, vector<2x8x8xbf16>, vector<2x8x8xf32> -> vector<2x8x8xf32>
    "tpu.trace_stop"() : () -> ()
    %cst_47 = arith.constant 0.353553385 : f32
    %75 = vector.broadcast %cst_47 : f32 to vector<2x8x8xf32>
    %76 = arith.mulf %74, %75 : vector<2x8x8xf32>
    %77 = vector.shape_cast %5 : vector<2x8xf32> to vector<2x1x8xf32>
    %cst_48 = arith.constant 0.000000e+00 : f32
    %78 = vector.broadcast %cst_48 : f32 to vector<2x1x8xf32>
    %79 = arith.cmpf oeq, %77, %78 : vector<2x1x8xf32>
    %cst_49 = arith.constant -1.000000e+09 : f32
    %80 = vector.shape_cast %79 : vector<2x1x8xi1> to vector<2x1x8xi1>
    %81 = vector.broadcast %80 : vector<2x1x8xi1> to vector<2x8x8xi1>
    %82 = vector.broadcast %cst_49 : f32 to vector<2x8x8xf32>
    %83 = arith.select %81, %82, %76 : vector<2x8x8xi1>, vector<2x8x8xf32>
    %cst_50 = arith.constant dense<0xFF800000> : vector<2x8xf32>
    %84 = vector.multi_reduction <maximumf>, %83, %cst_50 [2] : vector<2x8x8xf32> to vector<2x8xf32>
    %85 = vector.shape_cast %84 : vector<2x8xf32> to vector<2x8x1xf32>
    %86 = vector.broadcast %85 : vector<2x8x1xf32> to vector<2x8x8xf32>
    %87 = arith.subf %83, %86 : vector<2x8x8xf32>
    %88 = math.exp %87 : vector<2x8x8xf32>
    %cst_51 = arith.constant dense<0.000000e+00> : vector<2x8xf32>
    %89 = vector.multi_reduction <add>, %88, %cst_51 [2] : vector<2x8x8xf32> to vector<2x8xf32>
    %90 = vector.shape_cast %89 : vector<2x8xf32> to vector<2x8x1xf32>
    %91 = vector.broadcast %90 : vector<2x8x1xf32> to vector<2x8x8xf32>
    %92 = arith.divf %88, %91 : vector<2x8x8xf32>
    %c0_52 = arith.constant 0 : index
    %c0_53 = arith.constant 0 : index
    %c0_54 = arith.constant 0 : index
    %93 = vector.load %arg23[%c0_52, %c0_53, %c0_54] : memref<2x8x8xf32, #tpu.memory_space<vmem>>, vector<2x8x8xf32>
    %cst_55 = arith.constant 2.500000e-01 : f32
    %94 = vector.broadcast %cst_55 : f32 to vector<2x8x8xf32>
    %95 = arith.mulf %92, %94 : vector<2x8x8xf32>
    %96 = arith.addf %93, %95 : vector<2x8x8xf32>
    %c0_56 = arith.constant 0 : index
    %c0_57 = arith.constant 0 : index
    %c0_58 = arith.constant 0 : index
    %97 = vector.load %arg23[%c0_56, %c0_57, %c0_58] : memref<2x8x8xf32, #tpu.memory_space<vmem>>, vector<2x8x8xf32>
    tpu.vector_store %arg23[%c0_56, %c0_57, %c0_58], %96 {strides = array<i32>} : memref<2x8x8xf32, #tpu.memory_space<vmem>>, vector<2x8x8xf32>,
    %98 = arith.truncf %92 : vector<2x8x8xf32> to vector<2x8x8xbf16>
    "tpu.trace_start"() <{level = 10 : i32, message = "bqk,bkd->bqd"}> : () -> ()
    %cst_59 = arith.constant dense<0.000000e+00> : vector<2x8x8xf32>
    %99 = tpu.matmul %98, %73, %cst_59 {dimension_numbers = #tpu.dot_dimension_numbers<[2], [1], [1], [2], [0, 0, 0, 1, 1, 2], [0], [0]>} : vector<2x8x8xbf16>, vector<2x8x8xbf16>, vector<2x8x8xf32> -> vector<2x8x8xf32>
    "tpu.trace_stop"() : () -> ()
    %100 = vector.shape_cast %99 : vector<2x8x8xf32> to vector<16x8xf32>
    %101 = arith.truncf %100 : vector<16x8xf32> to vector<16x8xbf16>
    %c0_60 = arith.constant 0 : index
    %c0_61 = arith.constant 0 : index
    %102 = vector.load %arg27[%c0_60, %c0_61] : memref<16x32xbf16, #tpu.memory_space<vmem>>, vector<16x8xbf16>
    tpu.vector_store %arg27[%c0_60, %c0_61], %101 {strides = array<i32>} : memref<16x32xbf16, #tpu.memory_space<vmem>>, vector<16x8xbf16>,
    %c0_62 = arith.constant 0 : index
    %c8 = arith.constant 8 : index
    %103 = vector.load %arg26[%c0_62, %c8] : memref<16x96xbf16, #tpu.memory_space<vmem>>, vector<16x8xbf16>
    %104 = vector.shape_cast %103 : vector<16x8xbf16> to vector<2x8x8xbf16>
    %c0_63 = arith.constant 0 : index
    %c40 = arith.constant 40 : index
    %105 = vector.load %arg26[%c0_63, %c40] : memref<16x96xbf16, #tpu.memory_space<vmem>>, vector<16x8xbf16>
    %106 = vector.shape_cast %105 : vector<16x8xbf16> to vector<2x8x8xbf16>
    %c0_64 = arith.constant 0 : index
    %c72 = arith.constant 72 : index
    %107 = vector.load %arg26[%c0_64, %c72] : memref<16x96xbf16, #tpu.memory_space<vmem>>, vector<16x8xbf16>
    %108 = vector.shape_cast %107 : vector<16x8xbf16> to vector<2x8x8xbf16>
    "tpu.trace_start"() <{level = 10 : i32, message = "bqd,bkd->bqk"}> : () -> ()
    %cst_65 = arith.constant dense<0.000000e+00> : vector<2x8x8xf32>
    %109 = tpu.matmul %104, %106, %cst_65 {dimension_numbers = #tpu.dot_dimension_numbers<[2], [2], [1], [1], [0, 0, 0, 1, 1, 1], [0], [0]>} : vector<2x8x8xbf16>, vector<2x8x8xbf16>, vector<2x8x8xf32> -> vector<2x8x8xf32>
    "tpu.trace_stop"() : () -> ()
    %cst_66 = arith.constant 0.353553385 : f32
    %110 = vector.broadcast %cst_66 : f32 to vector<2x8x8xf32>
    %111 = arith.mulf %109, %110 : vector<2x8x8xf32>
    %112 = vector.shape_cast %5 : vector<2x8xf32> to vector<2x1x8xf32>
    %cst_67 = arith.constant 0.000000e+00 : f32
    %113 = vector.broadcast %cst_67 : f32 to vector<2x1x8xf32>
    %114 = arith.cmpf oeq, %112, %113 : vector<2x1x8xf32>
    %cst_68 = arith.constant -1.000000e+09 : f32
    %115 = vector.shape_cast %114 : vector<2x1x8xi1> to vector<2x1x8xi1>
    %116 = vector.broadcast %115 : vector<2x1x8xi1> to vector<2x8x8xi1>
    %117 = vector.broadcast %cst_68 : f32 to vector<2x8x8xf32>
    %118 = arith.select %116, %117, %111 : vector<2x8x8xi1>, vector<2x8x8xf32>
    %cst_69 = arith.constant dense<0xFF800000> : vector<2x8xf32>
    %119 = vector.multi_reduction <maximumf>, %118, %cst_69 [2] : vector<2x8x8xf32> to vector<2x8xf32>
    %120 = vector.shape_cast %119 : vector<2x8xf32> to vector<2x8x1xf32>
    %121 = vector.broadcast %120 : vector<2x8x1xf32> to vector<2x8x8xf32>
    %122 = arith.subf %118, %121 : vector<2x8x8xf32>
    %123 = math.exp %122 : vector<2x8x8xf32>
    %cst_70 = arith.constant dense<0.000000e+00> : vector<2x8xf32>
    %124 = vector.multi_reduction <add>, %123, %cst_70 [2] : vector<2x8x8xf32> to vector<2x8xf32>
    %125 = vector.shape_cast %124 : vector<2x8xf32> to vector<2x8x1xf32>
    %126 = vector.broadcast %125 : vector<2x8x1xf32> to vector<2x8x8xf32>
    %127 = arith.divf %123, %126 : vector<2x8x8xf32>
    %c0_71 = arith.constant 0 : index
    %c0_72 = arith.constant 0 : index
    %c0_73 = arith.constant 0 : index
    %128 = vector.load %arg23[%c0_71, %c0_72, %c0_73] : memref<2x8x8xf32, #tpu.memory_space<vmem>>, vector<2x8x8xf32>
    %cst_74 = arith.constant 2.500000e-01 : f32
    %129 = vector.broadcast %cst_74 : f32 to vector<2x8x8xf32>
    %130 = arith.mulf %127, %129 : vector<2x8x8xf32>
    %131 = arith.addf %128, %130 : vector<2x8x8xf32>
    %c0_75 = arith.constant 0 : index
    %c0_76 = arith.constant 0 : index
    %c0_77 = arith.constant 0 : index
    %132 = vector.load %arg23[%c0_75, %c0_76, %c0_77] : memref<2x8x8xf32, #tpu.memory_space<vmem>>, vector<2x8x8xf32>
    tpu.vector_store %arg23[%c0_75, %c0_76, %c0_77], %131 {strides = array<i32>} : memref<2x8x8xf32, #tpu.memory_space<vmem>>, vector<2x8x8xf32>,
    %133 = arith.truncf %127 : vector<2x8x8xf32> to vector<2x8x8xbf16>
    "tpu.trace_start"() <{level = 10 : i32, message = "bqk,bkd->bqd"}> : () -> ()
    %cst_78 = arith.constant dense<0.000000e+00> : vector<2x8x8xf32>
    %134 = tpu.matmul %133, %108, %cst_78 {dimension_numbers = #tpu.dot_dimension_numbers<[2], [1], [1], [2], [0, 0, 0, 1, 1, 2], [0], [0]>} : vector<2x8x8xbf16>, vector<2x8x8xbf16>, vector<2x8x8xf32> -> vector<2x8x8xf32>
    "tpu.trace_stop"() : () -> ()
    %135 = vector.shape_cast %134 : vector<2x8x8xf32> to vector<16x8xf32>
    %136 = arith.truncf %135 : vector<16x8xf32> to vector<16x8xbf16>
    %c0_79 = arith.constant 0 : index
    %c8_80 = arith.constant 8 : index
    %137 = vector.load %arg27[%c0_79, %c8_80] : memref<16x32xbf16, #tpu.memory_space<vmem>>, vector<16x8xbf16>
    tpu.vector_store %arg27[%c0_79, %c8_80], %136 {strides = array<i32>} : memref<16x32xbf16, #tpu.memory_space<vmem>>, vector<16x8xbf16>,
    %c0_81 = arith.constant 0 : index
    %c16 = arith.constant 16 : index
    %138 = vector.load %arg26[%c0_81, %c16] : memref<16x96xbf16, #tpu.memory_space<vmem>>, vector<16x8xbf16>
    %139 = vector.shape_cast %138 : vector<16x8xbf16> to vector<2x8x8xbf16>
    %c0_82 = arith.constant 0 : index
    %c48 = arith.constant 48 : index
    %140 = vector.load %arg26[%c0_82, %c48] : memref<16x96xbf16, #tpu.memory_space<vmem>>, vector<16x8xbf16>
    %141 = vector.shape_cast %140 : vector<16x8xbf16> to vector<2x8x8xbf16>
    %c0_83 = arith.constant 0 : index
    %c80 = arith.constant 80 : index
    %142 = vector.load %arg26[%c0_83, %c80] : memref<16x96xbf16, #tpu.memory_space<vmem>>, vector<16x8xbf16>
    %143 = vector.shape_cast %142 : vector<16x8xbf16> to vector<2x8x8xbf16>
    "tpu.trace_start"() <{level = 10 : i32, message = "bqd,bkd->bqk"}> : () -> ()
    %cst_84 = arith.constant dense<0.000000e+00> : vector<2x8x8xf32>
    %144 = tpu.matmul %139, %141, %cst_84 {dimension_numbers = #tpu.dot_dimension_numbers<[2], [2], [1], [1], [0, 0, 0, 1, 1, 1], [0], [0]>} : vector<2x8x8xbf16>, vector<2x8x8xbf16>, vector<2x8x8xf32> -> vector<2x8x8xf32>
    "tpu.trace_stop"() : () -> ()
    %cst_85 = arith.constant 0.353553385 : f32
    %145 = vector.broadcast %cst_85 : f32 to vector<2x8x8xf32>
    %146 = arith.mulf %144, %145 : vector<2x8x8xf32>
    %147 = vector.shape_cast %5 : vector<2x8xf32> to vector<2x1x8xf32>
    %cst_86 = arith.constant 0.000000e+00 : f32
    %148 = vector.broadcast %cst_86 : f32 to vector<2x1x8xf32>
    %149 = arith.cmpf oeq, %147, %148 : vector<2x1x8xf32>
    %cst_87 = arith.constant -1.000000e+09 : f32
    %150 = vector.shape_cast %149 : vector<2x1x8xi1> to vector<2x1x8xi1>
    %151 = vector.broadcast %150 : vector<2x1x8xi1> to vector<2x8x8xi1>
    %152 = vector.broadcast %cst_87 : f32 to vector<2x8x8xf32>
    %153 = arith.select %151, %152, %146 : vector<2x8x8xi1>, vector<2x8x8xf32>
    %cst_88 = arith.constant dense<0xFF800000> : vector<2x8xf32>
    %154 = vector.multi_reduction <maximumf>, %153, %cst_88 [2] : vector<2x8x8xf32> to vector<2x8xf32>
    %155 = vector.shape_cast %154 : vector<2x8xf32> to vector<2x8x1xf32>
    %156 = vector.broadcast %155 : vector<2x8x1xf32> to vector<2x8x8xf32>
    %157 = arith.subf %153, %156 : vector<2x8x8xf32>
    %158 = math.exp %157 : vector<2x8x8xf32>
    %cst_89 = arith.constant dense<0.000000e+00> : vector<2x8xf32>
    %159 = vector.multi_reduction <add>, %158, %cst_89 [2] : vector<2x8x8xf32> to vector<2x8xf32>
    %160 = vector.shape_cast %159 : vector<2x8xf32> to vector<2x8x1xf32>
    %161 = vector.broadcast %160 : vector<2x8x1xf32> to vector<2x8x8xf32>
    %162 = arith.divf %158, %161 : vector<2x8x8xf32>
    %c0_90 = arith.constant 0 : index
    %c0_91 = arith.constant 0 : index
    %c0_92 = arith.constant 0 : index
    %163 = vector.load %arg23[%c0_90, %c0_91, %c0_92] : memref<2x8x8xf32, #tpu.memory_space<vmem>>, vector<2x8x8xf32>
    %cst_93 = arith.constant 2.500000e-01 : f32
    %164 = vector.broadcast %cst_93 : f32 to vector<2x8x8xf32>
    %165 = arith.mulf %162, %164 : vector<2x8x8xf32>
    %166 = arith.addf %163, %165 : vector<2x8x8xf32>
    %c0_94 = arith.constant 0 : index
    %c0_95 = arith.constant 0 : index
    %c0_96 = arith.constant 0 : index
    %167 = vector.load %arg23[%c0_94, %c0_95, %c0_96] : memref<2x8x8xf32, #tpu.memory_space<vmem>>, vector<2x8x8xf32>
    tpu.vector_store %arg23[%c0_94, %c0_95, %c0_96], %166 {strides = array<i32>} : memref<2x8x8xf32, #tpu.memory_space<vmem>>, vector<2x8x8xf32>,
    %168 = arith.truncf %162 : vector<2x8x8xf32> to vector<2x8x8xbf16>
    "tpu.trace_start"() <{level = 10 : i32, message = "bqk,bkd->bqd"}> : () -> ()
    %cst_97 = arith.constant dense<0.000000e+00> : vector<2x8x8xf32>
    %169 = tpu.matmul %168, %143, %cst_97 {dimension_numbers = #tpu.dot_dimension_numbers<[2], [1], [1], [2], [0, 0, 0, 1, 1, 2], [0], [0]>} : vector<2x8x8xbf16>, vector<2x8x8xbf16>, vector<2x8x8xf32> -> vector<2x8x8xf32>
    "tpu.trace_stop"() : () -> ()
    %170 = vector.shape_cast %169 : vector<2x8x8xf32> to vector<16x8xf32>
    %171 = arith.truncf %170 : vector<16x8xf32> to vector<16x8xbf16>
    %c0_98 = arith.constant 0 : index
    %c16_99 = arith.constant 16 : index
    %172 = vector.load %arg27[%c0_98, %c16_99] : memref<16x32xbf16, #tpu.memory_space<vmem>>, vector<16x8xbf16>
    tpu.vector_store %arg27[%c0_98, %c16_99], %171 {strides = array<i32>} : memref<16x32xbf16, #tpu.memory_space<vmem>>, vector<16x8xbf16>,
    %c0_100 = arith.constant 0 : index
    %c24 = arith.constant 24 : index
    %173 = vector.load %arg26[%c0_100, %c24] : memref<16x96xbf16, #tpu.memory_space<vmem>>, vector<16x8xbf16>
    %174 = vector.shape_cast %173 : vector<16x8xbf16> to vector<2x8x8xbf16>
    %c0_101 = arith.constant 0 : index
    %c56 = arith.constant 56 : index
    %175 = vector.load %arg26[%c0_101, %c56] : memref<16x96xbf16, #tpu.memory_space<vmem>>, vector<16x8xbf16>
    %176 = vector.shape_cast %175 : vector<16x8xbf16> to vector<2x8x8xbf16>
    %c0_102 = arith.constant 0 : index
    %c88 = arith.constant 88 : index
    %177 = vector.load %arg26[%c0_102, %c88] : memref<16x96xbf16, #tpu.memory_space<vmem>>, vector<16x8xbf16>
    %178 = vector.shape_cast %177 : vector<16x8xbf16> to vector<2x8x8xbf16>
    "tpu.trace_start"() <{level = 10 : i32, message = "bqd,bkd->bqk"}> : () -> ()
    %cst_103 = arith.constant dense<0.000000e+00> : vector<2x8x8xf32>
    %179 = tpu.matmul %174, %176, %cst_103 {dimension_numbers = #tpu.dot_dimension_numbers<[2], [2], [1], [1], [0, 0, 0, 1, 1, 1], [0], [0]>} : vector<2x8x8xbf16>, vector<2x8x8xbf16>, vector<2x8x8xf32> -> vector<2x8x8xf32>
    "tpu.trace_stop"() : () -> ()
    %cst_104 = arith.constant 0.353553385 : f32
    %180 = vector.broadcast %cst_104 : f32 to vector<2x8x8xf32>
    %181 = arith.mulf %179, %180 : vector<2x8x8xf32>
    %182 = vector.shape_cast %5 : vector<2x8xf32> to vector<2x1x8xf32>
    %cst_105 = arith.constant 0.000000e+00 : f32
    %183 = vector.broadcast %cst_105 : f32 to vector<2x1x8xf32>
    %184 = arith.cmpf oeq, %182, %183 : vector<2x1x8xf32>
    %cst_106 = arith.constant -1.000000e+09 : f32
    %185 = vector.shape_cast %184 : vector<2x1x8xi1> to vector<2x1x8xi1>
    %186 = vector.broadcast %185 : vector<2x1x8xi1> to vector<2x8x8xi1>
    %187 = vector.broadcast %cst_106 : f32 to vector<2x8x8xf32>
    %188 = arith.select %186, %187, %181 : vector<2x8x8xi1>, vector<2x8x8xf32>
    %cst_107 = arith.constant dense<0xFF800000> : vector<2x8xf32>
    %189 = vector.multi_reduction <maximumf>, %188, %cst_107 [2] : vector<2x8x8xf32> to vector<2x8xf32>
    %190 = vector.shape_cast %189 : vector<2x8xf32> to vector<2x8x1xf32>
    %191 = vector.broadcast %190 : vector<2x8x1xf32> to vector<2x8x8xf32>
    %192 = arith.subf %188, %191 : vector<2x8x8xf32>
    %193 = math.exp %192 : vector<2x8x8xf32>
    %cst_108 = arith.constant dense<0.000000e+00> : vector<2x8xf32>
    %194 = vector.multi_reduction <add>, %193, %cst_108 [2] : vector<2x8x8xf32> to vector<2x8xf32>
    %195 = vector.shape_cast %194 : vector<2x8xf32> to vector<2x8x1xf32>
    %196 = vector.broadcast %195 : vector<2x8x1xf32> to vector<2x8x8xf32>
    %197 = arith.divf %193, %196 : vector<2x8x8xf32>
    %c0_109 = arith.constant 0 : index
    %c0_110 = arith.constant 0 : index
    %c0_111 = arith.constant 0 : index
    %198 = vector.load %arg23[%c0_109, %c0_110, %c0_111] : memref<2x8x8xf32, #tpu.memory_space<vmem>>, vector<2x8x8xf32>
    %cst_112 = arith.constant 2.500000e-01 : f32
    %199 = vector.broadcast %cst_112 : f32 to vector<2x8x8xf32>
    %200 = arith.mulf %197, %199 : vector<2x8x8xf32>
    %201 = arith.addf %198, %200 : vector<2x8x8xf32>
    %c0_113 = arith.constant 0 : index
    %c0_114 = arith.constant 0 : index
    %c0_115 = arith.constant 0 : index
    %202 = vector.load %arg23[%c0_113, %c0_114, %c0_115] : memref<2x8x8xf32, #tpu.memory_space<vmem>>, vector<2x8x8xf32>
    tpu.vector_store %arg23[%c0_113, %c0_114, %c0_115], %201 {strides = array<i32>} : memref<2x8x8xf32, #tpu.memory_space<vmem>>, vector<2x8x8xf32>,
    %203 = arith.truncf %197 : vector<2x8x8xf32> to vector<2x8x8xbf16>
    "tpu.trace_start"() <{level = 10 : i32, message = "bqk,bkd->bqd"}> : () -> ()
    %cst_116 = arith.constant dense<0.000000e+00> : vector<2x8x8xf32>
    %204 = tpu.matmul %203, %178, %cst_116 {dimension_numbers = #tpu.dot_dimension_numbers<[2], [1], [1], [2], [0, 0, 0, 1, 1, 2], [0], [0]>} : vector<2x8x8xbf16>, vector<2x8x8xbf16>, vector<2x8x8xf32> -> vector<2x8x8xf32>
    "tpu.trace_stop"() : () -> ()
    %205 = vector.shape_cast %204 : vector<2x8x8xf32> to vector<16x8xf32>
    %206 = arith.truncf %205 : vector<16x8xf32> to vector<16x8xbf16>
    %c0_117 = arith.constant 0 : index
    %c24_118 = arith.constant 24 : index
    %207 = vector.load %arg27[%c0_117, %c24_118] : memref<16x32xbf16, #tpu.memory_space<vmem>>, vector<16x8xbf16>
    tpu.vector_store %arg27[%c0_117, %c24_118], %206 {strides = array<i32>} : memref<16x32xbf16, #tpu.memory_space<vmem>>, vector<16x8xbf16>,
    %c0_119 = arith.constant 0 : index
    %c0_120 = arith.constant 0 : index
    %208 = vector.load %arg27[%c0_119, %c0_120] : memref<16x32xbf16, #tpu.memory_space<vmem>>, vector<16x32xbf16>
    %c0_121 = arith.constant 0 : index
    %c0_122 = arith.constant 0 : index
    %209 = vector.load %arg12[%c0_121, %c0_122] : memref<32x32xbf16, #tpu.memory_space<vmem>>, vector<32x32xbf16>
    %cst_123 = arith.constant dense<0.000000e+00> : vector<16x32xf32>
    %210 = tpu.matmul %208, %209, %cst_123 {dimension_numbers = #tpu.dot_dimension_numbers<[1], [0], [0], [1], [0, 0, 1, 1], [], []>} : vector<16x32xbf16>, vector<32x32xbf16>, vector<16x32xf32> -> vector<16x32xf32>
    %c0_124 = arith.constant 0 : index
    %c0_125 = arith.constant 0 : index
    %211 = vector.load %arg13[%c0_124, %c0_125] : memref<1x32xf32, #tpu.memory_space<vmem>>, vector<1x32xf32>
    %212 = vector.broadcast %211 : vector<1x32xf32> to vector<16x32xf32>
    %213 = arith.addf %210, %212 : vector<16x32xf32>
    %214 = vector.shape_cast %3 : vector<2x8x32xf32> to vector<16x32xf32>
    %215 = arith.addf %213, %214 : vector<16x32xf32>
    %cst_126 = arith.constant dense<0.000000e+00> : vector<16xf32>
    %216 = vector.multi_reduction <add>, %215, %cst_126 [1] : vector<16x32xf32> to vector<16xf32>
    %217 = vector.shape_cast %216 : vector<16xf32> to vector<16x1xf32>
    %cst_127 = arith.constant 3.200000e+01 : f32
    %218 = vector.broadcast %cst_127 : f32 to vector<16x1xf32>
    %219 = arith.divf %217, %218 : vector<16x1xf32>
    %220 = vector.broadcast %219 : vector<16x1xf32> to vector<16x32xf32>
    %221 = arith.subf %215, %220 : vector<16x32xf32>
    %222 = vector.broadcast %219 : vector<16x1xf32> to vector<16x32xf32>
    %223 = arith.subf %215, %222 : vector<16x32xf32>
    %224 = arith.mulf %221, %223 : vector<16x32xf32>
    %cst_128 = arith.constant dense<0.000000e+00> : vector<16xf32>
    %225 = vector.multi_reduction <add>, %224, %cst_128 [1] : vector<16x32xf32> to vector<16xf32>
    %226 = vector.shape_cast %225 : vector<16xf32> to vector<16x1xf32>
    %cst_129 = arith.constant 3.200000e+01 : f32
    %227 = vector.broadcast %cst_129 : f32 to vector<16x1xf32>
    %228 = arith.divf %226, %227 : vector<16x1xf32>
    %229 = vector.broadcast %219 : vector<16x1xf32> to vector<16x32xf32>
    %230 = arith.subf %215, %229 : vector<16x32xf32>
    %cst_130 = arith.constant 9.99999974E-6 : f32
    %231 = vector.broadcast %cst_130 : f32 to vector<16x1xf32>
    %232 = arith.addf %228, %231 : vector<16x1xf32>
    %233 = math.rsqrt %232 : vector<16x1xf32>
    %234 = vector.broadcast %233 : vector<16x1xf32> to vector<16x32xf32>
    %235 = arith.mulf %230, %234 : vector<16x32xf32>
    %c0_131 = arith.constant 0 : index
    %c0_132 = arith.constant 0 : index
    %236 = vector.load %arg14[%c0_131, %c0_132] : memref<1x32xf32, #tpu.memory_space<vmem>>, vector<1x32xf32>
    %237 = vector.broadcast %236 : vector<1x32xf32> to vector<16x32xf32>
    %238 = arith.mulf %235, %237 : vector<16x32xf32>
    %c0_133 = arith.constant 0 : index
    %c0_134 = arith.constant 0 : index
    %239 = vector.load %arg15[%c0_133, %c0_134] : memref<1x32xf32, #tpu.memory_space<vmem>>, vector<1x32xf32>
    %240 = vector.broadcast %239 : vector<1x32xf32> to vector<16x32xf32>
    %241 = arith.addf %238, %240 : vector<16x32xf32>
    %242 = vector.shape_cast %241 : vector<16x32xf32> to vector<2x8x32xf32>
    %cst_135 = arith.constant dense<0.000000e+00> : vector<2x32xf32>
    %243 = vector.multi_reduction <add>, %242, %cst_135 [1] : vector<2x8x32xf32> to vector<2x32xf32>
    %cst_136 = arith.constant 8.000000e+00 : f32
    %244 = vector.broadcast %cst_136 : f32 to vector<2x32xf32>
    %245 = arith.divf %243, %244 : vector<2x32xf32>
    %246 = arith.truncf %65 : vector<2x32xf32> to vector<2x32xbf16>
    %c0_137 = arith.constant 0 : index
    %c0_138 = arith.constant 0 : index
    %247 = vector.load %arg16[%c0_137, %c0_138] : memref<32x32xbf16, #tpu.memory_space<vmem>>, vector<32x32xbf16>
    %cst_139 = arith.constant dense<0.000000e+00> : vector<2x32xf32>
    %248 = tpu.matmul %246, %247, %cst_139 {dimension_numbers = #tpu.dot_dimension_numbers<[1], [0], [0], [1], [0, 0, 1, 1], [], []>} : vector<2x32xbf16>, vector<32x32xbf16>, vector<2x32xf32> -> vector<2x32xf32>
    %249 = arith.truncf %245 : vector<2x32xf32> to vector<2x32xbf16>
    %c0_140 = arith.constant 0 : index
    %c0_141 = arith.constant 0 : index
    %250 = vector.load %arg17[%c0_140, %c0_141] : memref<32x32xbf16, #tpu.memory_space<vmem>>, vector<32x32xbf16>
    %cst_142 = arith.constant dense<0.000000e+00> : vector<2x32xf32>
    %251 = tpu.matmul %249, %250, %cst_142 {dimension_numbers = #tpu.dot_dimension_numbers<[1], [0], [0], [1], [0, 0, 1, 1], [], []>} : vector<2x32xbf16>, vector<32x32xbf16>, vector<2x32xf32> -> vector<2x32xf32>
    %252 = arith.addf %248, %251 : vector<2x32xf32>
    %c0_143 = arith.constant 0 : index
    %c0_144 = arith.constant 0 : index
    %253 = vector.load %arg18[%c0_143, %c0_144] : memref<1x32xf32, #tpu.memory_space<vmem>>, vector<1x32xf32>
    %254 = vector.broadcast %253 : vector<1x32xf32> to vector<2x32xf32>
    %255 = arith.addf %252, %254 : vector<2x32xf32>
    %cst_145 = arith.constant 0.000000e+00 : f32
    %256 = vector.broadcast %cst_145 : f32 to vector<2x32xf32>
    %257 = arith.maximumf %255, %256 : vector<2x32xf32>
    %258 = arith.truncf %257 : vector<2x32xf32> to vector<2x32xbf16>
    %c0_146 = arith.constant 0 : index
    %c0_147 = arith.constant 0 : index
    %259 = vector.load %arg19[%c0_146, %c0_147] : memref<32x32xbf16, #tpu.memory_space<vmem>>, vector<32x32xbf16>
    %cst_148 = arith.constant dense<0.000000e+00> : vector<2x32xf32>
    %260 = tpu.matmul %258, %259, %cst_148 {dimension_numbers = #tpu.dot_dimension_numbers<[1], [0], [0], [1], [0, 0, 1, 1], [], []>} : vector<2x32xbf16>, vector<32x32xbf16>, vector<2x32xf32> -> vector<2x32xf32>
    %c0_149 = arith.constant 0 : index
    %c0_150 = arith.constant 0 : index
    %261 = vector.load %arg20[%c0_149, %c0_150] : memref<1x32xf32, #tpu.memory_space<vmem>>, vector<1x32xf32>
    %262 = vector.broadcast %261 : vector<1x32xf32> to vector<2x32xf32>
    %263 = arith.addf %260, %262 : vector<2x32xf32>
    %c0_151 = arith.constant 0 : index
    %c0_152 = arith.constant 0 : index
    %264 = vector.load %arg21[%c0_151, %c0_152] : memref<2x32xf32, #tpu.memory_space<vmem>>, vector<2x32xf32>
    tpu.vector_store %arg21[%c0_151, %c0_152], %263 {strides = array<i32>} : memref<2x32xf32, #tpu.memory_space<vmem>>, vector<2x32xf32>,
    %c0_153 = arith.constant 0 : index
    %c0_154 = arith.constant 0 : index
    %265 = vector.load %arg22[%c0_153, %c0_154] : memref<2x8xf32, #tpu.memory_space<vmem>>, vector<2x8xf32>
    tpu.vector_store %arg22[%c0_153, %c0_154], %46 {strides = array<i32>} : memref<2x8xf32, #tpu.memory_space<vmem>>, vector<2x8xf32>,
    %c0_155 = arith.constant 0 : index
    %c0_156 = arith.constant 0 : index
    %266 = vector.load %arg24[%c0_155, %c0_156] : memref<2x32xf32, #tpu.memory_space<vmem>>, vector<2x32xf32>
    tpu.vector_store %arg24[%c0_155, %c0_156], %65 {strides = array<i32>} : memref<2x32xf32, #tpu.memory_space<vmem>>, vector<2x32xf32>,
    %c0_157 = arith.constant 0 : index
    %c0_158 = arith.constant 0 : index
    %267 = vector.load %arg25[%c0_157, %c0_158] : memref<2x32xf32, #tpu.memory_space<vmem>>, vector<2x32xf32>
    tpu.vector_store %arg25[%c0_157, %c0_158], %245 {strides = array<i32>} : memref<2x32xf32, #tpu.memory_space<vmem>>, vector<2x32xf32>,
    return
  }
  func.func @transform_0(%arg0: i32) -> (i32, i32, i32) {
    %c0_i32 = arith.constant 0 : i32
    %c0_i32_0 = arith.constant 0 : i32
    %c0_i32_1 = arith.constant 0 : i32
    return %arg0, %c0_i32, %c0_i32_0 : i32, i32, i32
  }
  func.func @transform_1(%arg0: i32) -> (i32, i32) {
    %c0_i32 = arith.constant 0 : i32
    %c0_i32_0 = arith.constant 0 : i32
    return %arg0, %c0_i32 : i32, i32
  }
  func.func @transform_2(%arg0: i32) -> (i32, i32) {
    %c0_i32 = arith.constant 0 : i32
    %c0_i32_0 = arith.constant 0 : i32
    return %arg0, %c0_i32 : i32, i32
  }
  func.func @transform_3(%arg0: i32) -> (i32, i32) {
    %c0_i32 = arith.constant 0 : i32
    %c0_i32_0 = arith.constant 0 : i32
    %c0_i32_1 = arith.constant 0 : i32
    return %c0_i32, %c0_i32_0 : i32, i32
  }
  func.func @transform_4(%arg0: i32) -> (i32, i32) {
    %c0_i32 = arith.constant 0 : i32
    %c0_i32_0 = arith.constant 0 : i32
    %c0_i32_1 = arith.constant 0 : i32
    return %c0_i32, %c0_i32_0 : i32, i32
  }
  func.func @transform_5(%arg0: i32) -> (i32, i32) {
    %c0_i32 = arith.constant 0 : i32
    %c0_i32_0 = arith.constant 0 : i32
    %c0_i32_1 = arith.constant 0 : i32
    return %c0_i32, %c0_i32_0 : i32, i32
  }
  func.func @transform_6(%arg0: i32) -> (i32, i32) {
    %c0_i32 = arith.constant 0 : i32
    %c0_i32_0 = arith.constant 0 : i32
    %c0_i32_1 = arith.constant 0 : i32
    return %c0_i32, %c0_i32_0 : i32, i32
  }
  func.func @transform_7(%arg0: i32) -> (i32, i32) {
    %c0_i32 = arith.constant 0 : i32
    %c0_i32_0 = arith.constant 0 : i32
    %c0_i32_1 = arith.constant 0 : i32
    return %c0_i32, %c0_i32_0 : i32, i32
  }
  func.func @transform_8(%arg0: i32) -> (i32, i32) {
    %c0_i32 = arith.constant 0 : i32
    %c0_i32_0 = arith.constant 0 : i32
    %c0_i32_1 = arith.constant 0 : i32
    return %c0_i32, %c0_i32_0 : i32, i32
  }
  func.func @transform_9(%arg0: i32) -> (i32, i32) {
    %c0_i32 = arith.constant 0 : i32
    %c0_i32_0 = arith.constant 0 : i32
    %c0_i32_1 = arith.constant 0 : i32
    return %c0_i32, %c0_i32_0 : i32, i32
  }
  func.func @transform_10(%arg0: i32) -> (i32, i32) {
    %c0_i32 = arith.constant 0 : i32
    %c0_i32_0 = arith.constant 0 : i32
    %c0_i32_1 = arith.constant 0 : i32
    return %c0_i32, %c0_i32_0 : i32, i32
  }
  func.func @transform_11(%arg0: i32) -> (i32, i32) {
    %c0_i32 = arith.constant 0 : i32
    %c0_i32_0 = arith.constant 0 : i32
    %c0_i32_1 = arith.constant 0 : i32
    return %c0_i32, %c0_i32_0 : i32, i32
  }
  func.func @transform_12(%arg0: i32) -> (i32, i32) {
    %c0_i32 = arith.constant 0 : i32
    %c0_i32_0 = arith.constant 0 : i32
    %c0_i32_1 = arith.constant 0 : i32
    return %c0_i32, %c0_i32_0 : i32, i32
  }
  func.func @transform_13(%arg0: i32) -> (i32, i32) {
    %c0_i32 = arith.constant 0 : i32
    %c0_i32_0 = arith.constant 0 : i32
    %c0_i32_1 = arith.constant 0 : i32
    return %c0_i32, %c0_i32_0 : i32, i32
  }
  func.func @transform_14(%arg0: i32) -> (i32, i32) {
    %c0_i32 = arith.constant 0 : i32
    %c0_i32_0 = arith.constant 0 : i32
    %c0_i32_1 = arith.constant 0 : i32
    return %c0_i32, %c0_i32_0 : i32, i32
  }
  func.func @transform_15(%arg0: i32) -> (i32, i32) {
    %c0_i32 = arith.constant 0 : i32
    %c0_i32_0 = arith.constant 0 : i32
    %c0_i32_1 = arith.constant 0 : i32
    return %c0_i32, %c0_i32_0 : i32, i32
  }
  func.func @transform_16(%arg0: i32) -> (i32, i32) {
    %c0_i32 = arith.constant 0 : i32
    %c0_i32_0 = arith.constant 0 : i32
    %c0_i32_1 = arith.constant 0 : i32
    return %c0_i32, %c0_i32_0 : i32, i32
  }
  func.func @transform_17(%arg0: i32) -> (i32, i32) {
    %c0_i32 = arith.constant 0 : i32
    %c0_i32_0 = arith.constant 0 : i32
    %c0_i32_1 = arith.constant 0 : i32
    return %c0_i32, %c0_i32_0 : i32, i32
  }
  func.func @transform_18(%arg0: i32) -> (i32, i32) {
    %c0_i32 = arith.constant 0 : i32
    %c0_i32_0 = arith.constant 0 : i32
    %c0_i32_1 = arith.constant 0 : i32
    return %c0_i32, %c0_i32_0 : i32, i32
  }
  func.func @transform_19(%arg0: i32) -> (i32, i32) {
    %c0_i32 = arith.constant 0 : i32
    %c0_i32_0 = arith.constant 0 : i32
    %c0_i32_1 = arith.constant 0 : i32
    return %c0_i32, %c0_i32_0 : i32, i32
  }
  func.func @transform_20(%arg0: i32) -> (i32, i32) {
    %c0_i32 = arith.constant 0 : i32
    %c0_i32_0 = arith.constant 0 : i32
    return %arg0, %c0_i32 : i32, i32
  }
  func.func @transform_21(%arg0: i32) -> (i32, i32) {
    %c0_i32 = arith.constant 0 : i32
    %c0_i32_0 = arith.constant 0 : i32
    return %arg0, %c0_i32 : i32, i32
  }
  func.func @transform_22(%arg0: i32) -> (i32, i32, i32) {
    %c0_i32 = arith.constant 0 : i32
    %c0_i32_0 = arith.constant 0 : i32
    %c0_i32_1 = arith.constant 0 : i32
    return %arg0, %c0_i32, %c0_i32_0 : i32, i32, i32
  }
  func.func @transform_23(%arg0: i32) -> (i32, i32) {
    %c0_i32 = arith.constant 0 : i32
    %c0_i32_0 = arith.constant 0 : i32
    return %arg0, %c0_i32 : i32, i32
  }
  func.func @transform_24(%arg0: i32) -> (i32, i32) {
    %c0_i32 = arith.constant 0 : i32
    %c0_i32_0 = arith.constant 0 : i32
    return %arg0, %c0_i32 : i32, i32
  }
}

module attributes {stable_mosaic.version = 11 : i64} {
  func.func @hierarchical_attention_kernel(%arg0: i32, %arg1: memref<2x8x32xbf16, #tpu.memory_space<vmem>>, %arg2: memref<2x32xbf16, #tpu.memory_space<vmem>>, %arg3: memref<2x8xf32, #tpu.memory_space<vmem>>, %arg4: memref<32x128xbf16, #tpu.memory_space<vmem>>, %arg5: memref<32x32xbf16, #tpu.memory_space<vmem>>, %arg6: memref<1x32xf32, #tpu.memory_space<vmem>>, %arg7: memref<32x32xbf16, #tpu.memory_space<vmem>>, %arg8: memref<1x32xf32, #tpu.memory_space<vmem>>, %arg9: memref<32x32xbf16, #tpu.memory_space<vmem>>, %arg10: memref<32x32xbf16, #tpu.memory_space<vmem>>, %arg11: memref<1x32xf32, #tpu.memory_space<vmem>>, %arg12: memref<32x32xbf16, #tpu.memory_space<vmem>>, %arg13: memref<1x32xf32, #tpu.memory_space<vmem>>, %arg14: memref<1x32xf32, #tpu.memory_space<vmem>>, %arg15: memref<1x32xf32, #tpu.memory_space<vmem>>, %arg16: memref<32x32xbf16, #tpu.memory_space<vmem>>, %arg17: memref<32x32xbf16, #tpu.memory_space<vmem>>, %arg18: memref<1x32xf32, #tpu.memory_space<vmem>>, %arg19: memref<32x32xbf16, #tpu.memory_space<vmem>>, %arg20: memref<1x32xf32, #tpu.memory_space<vmem>>, %arg21: memref<2x32xf32, #tpu.memory_space<vmem>>, %arg22: memref<2x8xf32, #tpu.memory_space<vmem>>, %arg23: memref<2x8x8xf32, #tpu.memory_space<vmem>>, %arg24: memref<2x32xf32, #tpu.memory_space<vmem>>, %arg25: memref<2x32xf32, #tpu.memory_space<vmem>>, %arg26: memref<16x96xbf16, #tpu.memory_space<vmem>>, %arg27: memref<16x32xbf16, #tpu.memory_space<vmem>>) attributes {dimension_semantics = [#tpu.dimension_semantics<parallel>], iteration_bounds = array<i64: 1>, scalar_prefetch = 0 : i64, scratch_operands = 2 : i64, tpu.core_type = #tpu.core_type<tc>, window_params = [{transform_indices = @transform_0, window_bounds = array<i64: 2, 8, 32>}, {transform_indices = @transform_1, window_bounds = array<i64: 2, 32>}, {transform_indices = @transform_2, window_bounds = array<i64: 2, 8>}, {pipeline_mode = #tpu.pipeline_mode<synchronous>, transform_indices = @transform_3, window_bounds = array<i64: 32, 128>}, {pipeline_mode = #tpu.pipeline_mode<synchronous>, transform_indices = @transform_4, window_bounds = array<i64: 32, 32>}, {pipeline_mode = #tpu.pipeline_mode<synchronous>, transform_indices = @transform_5, window_bounds = array<i64: 1, 32>}, {pipeline_mode = #tpu.pipeline_mode<synchronous>, transform_indices = @transform_6, window_bounds = array<i64: 32, 32>}, {pipeline_mode = #tpu.pipeline_mode<synchronous>, transform_indices = @transform_7, window_bounds = array<i64: 1, 32>}, {pipeline_mode = #tpu.pipeline_mode<synchronous>, transform_indices = @transform_8, window_bounds = array<i64: 32, 32>}, {pipeline_mode = #tpu.pipeline_mode<synchronous>, transform_indices = @transform_9, window_bounds = array<i64: 32, 32>}, {pipeline_mode = #tpu.pipeline_mode<synchronous>, transform_indices = @transform_10, window_bounds = array<i64: 1, 32>}, {pipeline_mode = #tpu.pipeline_mode<synchronous>, transform_indices = @transform_11, window_bounds = array<i64: 32, 32>}, {pipeline_mode = #tpu.pipeline_mode<synchronous>, transform_indices = @transform_12, window_bounds = array<i64: 1, 32>}, {pipeline_mode = #tpu.pipeline_mode<synchronous>, transform_indices = @transform_13, window_bounds = array<i64: 1, 32>}, {pipeline_mode = #tpu.pipeline_mode<synchronous>, transform_indices = @transform_14, window_bounds = array<i64: 1, 32>}, {pipeline_mode = #tpu.pipeline_mode<synchronous>, transform_indices = @transform_15, window_bounds = array<i64: 32, 32>}, {pipeline_mode = #tpu.pipeline_mode<synchronous>, transform_indices = @transform_16, window_bounds = array<i64: 32, 32>}, {pipeline_mode = #tpu.pipeline_mode<synchronous>, transform_indices = @transform_17, window_bounds = array<i64: 1, 32>}, {pipeline_mode = #tpu.pipeline_mode<synchronous>, transform_indices = @transform_18, window_bounds = array<i64: 32, 32>}, {pipeline_mode = #tpu.pipeline_mode<synchronous>, transform_indices = @transform_19, window_bounds = array<i64: 1, 32>}, {transform_indices = @transform_20, window_bounds = array<i64: 2, 32>}, {transform_indices = @transform_21, window_bounds = array<i64: 2, 8>}, {transform_indices = @transform_22, window_bounds = array<i64: 2, 8, 8>}, {transform_indices = @transform_23, window_bounds = array<i64: 2, 32>}, {transform_indices = @transform_24, window_bounds = array<i64: 2, 32>}]} {
    %c0 = arith.constant 0 : index
    %c0_0 = arith.constant 0 : index
    %c0_1 = arith.constant 0 : index
    %0 = vector.load %arg1[%c0, %c0_0, %c0_1] : memref<2x8x32xbf16, #tpu.memory_space<vmem>>, vector<2x8x32xbf16>
    %1 = vector.shape_cast %0 : vector<2x8x32xbf16> to vector<16x32xbf16>
    %c0_2 = arith.constant 0 : index
    %c0_3 = arith.constant 0 : index
    %c0_4 = arith.constant 0 : index
    %2 = vector.load %arg1[%c0_2, %c0_3, %c0_4] : memref<2x8x32xbf16, #tpu.memory_space<vmem>>, vector<2x8x32xbf16>
    %3 = arith.extf %2 : vector<2x8x32xbf16> to vector<2x8x32xf32>
    %c0_5 = arith.constant 0 : index
    %c0_6 = arith.constant 0 : index
    %4 = vector.load %arg2[%c0_5, %c0_6] : memref<2x32xbf16, #tpu.memory_space<vmem>>, vector<2x32xbf16>
    %c0_7 = arith.constant 0 : index
    %c0_8 = arith.constant 0 : index
    %5 = vector.load %arg3[%c0_7, %c0_8] : memref<2x8xf32, #tpu.memory_space<vmem>>, vector<2x8xf32>
    %c0_9 = arith.constant 0 : index
    %c0_10 = arith.constant 0 : index
    %6 = vector.load %arg4[%c0_9, %c0_10] : memref<32x128xbf16, #tpu.memory_space<vmem>>, vector<32x128xbf16>
    %cst = arith.constant dense<0.000000e+00> : vector<16x128xf32>
    %7 = tpu.matmul %1, %6, %cst {dimension_numbers = #tpu.dot_dimension_numbers<[1], [0], [0], [1], [0, 0, 1, 1], [], []>} : vector<16x32xbf16>, vector<32x128xbf16>, vector<16x128xf32> -> vector<16x128xf32>
    %8 = vector.extract_strided_slice %7 {offsets = [0, 32], sizes = [16, 96], strides = [1, 1]} : vector<16x128xf32> to vector<16x96xf32>
    %9 = arith.truncf %8 : vector<16x96xf32> to vector<16x96xbf16>
    %c0_11 = arith.constant 0 : index
    %c0_12 = arith.constant 0 : index
    %10 = vector.load %arg26[%c0_11, %c0_12] : memref<16x96xbf16, #tpu.memory_space<vmem>>, vector<16x96xbf16>
    tpu.vector_store %arg26[%c0_11, %c0_12], %9 {strides = array<i32>} : memref<16x96xbf16, #tpu.memory_space<vmem>>, vector<16x96xbf16>,
    %11 = vector.extract_strided_slice %7 {offsets = [0, 0], sizes = [16, 32], strides = [1, 1]} : vector<16x128xf32> to vector<16x32xf32>
    %12 = vector.shape_cast %11 : vector<16x32xf32> to vector<2x8x32xf32>
    %c0_13 = arith.constant 0 : index
    %c0_14 = arith.constant 0 : index
    %13 = vector.load %arg5[%c0_13, %c0_14] : memref<32x32xbf16, #tpu.memory_space<vmem>>, vector<32x32xbf16>
    %cst_15 = arith.constant dense<0.000000e+00> : vector<2x32xf32>
    %14 = tpu.matmul %4, %13, %cst_15 {dimension_numbers = #tpu.dot_dimension_numbers<[1], [0], [0], [1], [0, 0, 1, 1], [], []>} : vector<2x32xbf16>, vector<32x32xbf16>, vector<2x32xf32> -> vector<2x32xf32>
    %15 = vector.shape_cast %14 : vector<2x32xf32> to vector<2x1x32xf32>
    %16 = vector.broadcast %15 : vector<2x1x32xf32> to vector<2x8x32xf32>
    %17 = arith.addf %12, %16 : vector<2x8x32xf32>
    %18 = math.tanh %17 : vector<2x8x32xf32>
    %19 = vector.shape_cast %18 : vector<2x8x32xf32> to vector<16x32xf32>
    %20 = arith.truncf %19 : vector<16x32xf32> to vector<16x32xbf16>
    %c0_16 = arith.constant 0 : index
    %c0_17 = arith.constant 0 : index
    %21 = vector.load %arg7[%c0_16, %c0_17] : memref<32x32xbf16, #tpu.memory_space<vmem>>, vector<32x32xbf16>
    %cst_18 = arith.constant dense<0.000000e+00> : vector<16x32xf32>
    %22 = tpu.matmul %20, %21, %cst_18 {dimension_numbers = #tpu.dot_dimension_numbers<[1], [0], [0], [1], [0, 0, 1, 1], [], []>} : vector<16x32xbf16>, vector<32x32xbf16>, vector<16x32xf32> -> vector<16x32xf32>
    %c0_19 = arith.constant 0 : index
    %c0_20 = arith.constant 0 : index
    %23 = vector.load %arg8[%c0_19, %c0_20] : memref<1x32xf32, #tpu.memory_space<vmem>>, vector<1x32xf32>
    %24 = vector.broadcast %23 : vector<1x32xf32> to vector<16x32xf32>
    %25 = arith.addf %22, %24 : vector<16x32xf32>
    %26 = arith.addf %25, %19 : vector<16x32xf32>
    %27 = math.tanh %26 : vector<16x32xf32>
    %28 = vector.shape_cast %27 : vector<16x32xf32> to vector<2x8x32xf32>
    %c0_21 = arith.constant 0 : index
    %c0_22 = arith.constant 0 : index
    %29 = vector.load %arg6[%c0_21, %c0_22] : memref<1x32xf32, #tpu.memory_space<vmem>>, vector<1x32xf32>
    %30 = vector.shape_cast %29 : vector<1x32xf32> to vector<1x1x32xf32>
    %31 = vector.broadcast %30 : vector<1x1x32xf32> to vector<2x8x32xf32>
    %32 = arith.mulf %28, %31 : vector<2x8x32xf32>
    %cst_23 = arith.constant dense<0.000000e+00> : vector<2x8xf32>
    %33 = vector.multi_reduction <add>, %32, %cst_23 [2] : vector<2x8x32xf32> to vector<2x8xf32>
    %cst_24 = arith.constant 0.000000e+00 : f32
    %34 = vector.broadcast %cst_24 : f32 to vector<2x8xf32>
    %35 = arith.cmpf oeq, %5, %34 : vector<2x8xf32>
    %cst_25 = arith.constant -1.000000e+09 : f32
    %36 = vector.broadcast %cst_25 : f32 to vector<2x8xf32>
    %37 = arith.select %35, %36, %33 : vector<2x8xi1>, vector<2x8xf32>
    %cst_26 = arith.constant dense<0xFF800000> : vector<2xf32>
    %38 = vector.multi_reduction <maximumf>, %37, %cst_26 [1] : vector<2x8xf32> to vector<2xf32>
    %39 = vector.shape_cast %38 : vector<2xf32> to vector<2x1xf32>
    %40 = vector.broadcast %39 : vector<2x1xf32> to vector<2x8xf32>
    %41 = arith.subf %37, %40 : vector<2x8xf32>
    %42 = math.exp %41 : vector<2x8xf32>
    %cst_27 = arith.constant dense<0.000000e+00> : vector<2xf32>
    %43 = vector.multi_reduction <add>, %42, %cst_27 [1] : vector<2x8xf32> to vector<2xf32>
    %44 = vector.shape_cast %43 : vector<2xf32> to vector<2x1xf32>
    %45 = vector.broadcast %44 : vector<2x1xf32> to vector<2x8xf32>
    %46 = arith.divf %42, %45 : vector<2x8xf32>
    %47 = vector.shape_cast %46 : vector<2x8xf32> to vector<2x8x1xf32>
    %48 = vector.broadcast %47 : vector<2x8x1xf32> to vector<2x8x32xf32>
    %49 = arith.mulf %48, %3 : vector<2x8x32xf32>
    %cst_28 = arith.constant dense<0.000000e+00> : vector<2x32xf32>
    %50 = vector.multi_reduction <add>, %49, %cst_28 [1] : vector<2x8x32xf32> to vector<2x32xf32>
    %51 = arith.truncf %50 : vector<2x32xf32> to vector<2x32xbf16>
    %c0_29 = arith.constant 0 : index
    %c0_30 = arith.constant 0 : index
    %52 = vector.load %arg9[%c0_29, %c0_30] : memref<32x32xbf16, #tpu.memory_space<vmem>>, vector<32x32xbf16>
    %cst_31 = arith.constant dense<0.000000e+00> : vector<2x32xf32>
    %53 = tpu.matmul %51, %52, %cst_31 {dimension_numbers = #tpu.dot_dimension_numbers<[1], [0], [0], [1], [0, 0, 1, 1], [], []>} : vector<2x32xbf16>, vector<32x32xbf16>, vector<2x32xf32> -> vector<2x32xf32>
    %c0_32 = arith.constant 0 : index
    %c0_33 = arith.constant 0 : index
    %54 = vector.load %arg10[%c0_32, %c0_33] : memref<32x32xbf16, #tpu.memory_space<vmem>>, vector<32x32xbf16>
    %cst_34 = arith.constant dense<0.000000e+00> : vector<2x32xf32>
    %55 = tpu.matmul %4, %54, %cst_34 {dimension_numbers = #tpu.dot_dimension_numbers<[1], [0], [0], [1], [0, 0, 1, 1], [], []>} : vector<2x32xbf16>, vector<32x32xbf16>, vector<2x32xf32> -> vector<2x32xf32>
    %56 = arith.addf %53, %55 : vector<2x32xf32>
    %c0_35 = arith.constant 0 : index
    %c0_36 = arith.constant 0 : index
    %57 = vector.load %arg11[%c0_35, %c0_36] : memref<1x32xf32, #tpu.memory_space<vmem>>, vector<1x32xf32>
    %58 = vector.broadcast %57 : vector<1x32xf32> to vector<2x32xf32>
    %59 = arith.addf %56, %58 : vector<2x32xf32>
    %60 = arith.negf %59 : vector<2x32xf32>
    %61 = math.exp %60 : vector<2x32xf32>
    %cst_37 = arith.constant 1.000000e+00 : f32
    %62 = vector.broadcast %cst_37 : f32 to vector<2x32xf32>
    %63 = arith.addf %62, %61 : vector<2x32xf32>
    %64 = arith.divf %62, %63 : vector<2x32xf32>
    %65 = arith.mulf %64, %50 : vector<2x32xf32>
    %cst_38 = arith.constant 0.000000e+00 : f32
    %66 = vector.broadcast %cst_38 : f32 to vector<2x8x8xf32>
    %c0_39 = arith.constant 0 : index
    %c0_40 = arith.constant 0 : index
    %c0_41 = arith.constant 0 : index
    %67 = vector.load %arg23[%c0_39, %c0_40, %c0_41] : memref<2x8x8xf32, #tpu.memory_space<vmem>>, vector<2x8x8xf32>
    tpu.vector_store %arg23[%c0_39, %c0_40, %c0_41], %66 {strides = array<i32>} : memref<2x8x8xf32, #tpu.memory_space<vmem>>, vector<2x8x8xf32>,
    %c0_42 = arith.constant 0 : index
    %c0_43 = arith.constant 0 : index
    %68 = vector.load %arg26[%c0_42, %c0_43] : memref<16x96xbf16, #tpu.memory_space<vmem>>, vector<16x8xbf16>
    %69 = vector.shape_cast %68 : vector<16x8xbf16> to vector<2x8x8xbf16>
    %c0_44 = arith.constant 0 : index
    %c32 = arith.constant 32 : index
    %70 = vector.load %arg26[%c0_44, %c32] : memref<16x96xbf16, #tpu.memory_space<vmem>>, vector<16x8xbf16>
    %71 = vector.shape_cast %70 : vector<16x8xbf16> to vector<2x8x8xbf16>
    %c0_45 = arith.constant 0 : index
    %c64 = arith.constant 64 : index
    %72 = vector.load %arg26[%c0_45, %c64] : memref<16x96xbf16, #tpu.memory_space<vmem>>, vector<16x8xbf16>
    %73 = vector.shape_cast %72 : vector<16x8xbf16> to vector<2x8x8xbf16>
    "tpu.trace_start"() <{level = 10 : i32, message = "bqd,bkd->bqk"}> : () -> ()
    %cst_46 = arith.constant dense<0.000000e+00> : vector<2x8x8xf32>
    %74 = tpu.matmul %69, %71, %cst_46 {dimension_numbers = #tpu.dot_dimension_numbers<[2], [2], [1], [1], [0, 0, 0, 1, 1, 1], [0], [0]>} : vector<2x8x8xbf16>, vector<2x8x8xbf16>, vector<2x8x8xf32> -> vector<2x8x8xf32>
    "tpu.trace_stop"() : () -> ()
    %cst_47 = arith.constant 0.353553385 : f32
    %75 = vector.broadcast %cst_47 : f32 to vector<2x8x8xf32>
    %76 = arith.mulf %74, %75 : vector<2x8x8xf32>
    %77 = vector.shape_cast %5 : vector<2x8xf32> to vector<2x1x8xf32>
    %cst_48 = arith.constant 0.000000e+00 : f32
    %78 = vector.broadcast %cst_48 : f32 to vector<2x1x8xf32>
    %79 = arith.cmpf oeq, %77, %78 : vector<2x1x8xf32>
    %cst_49 = arith.constant -1.000000e+09 : f32
    %80 = vector.shape_cast %79 : vector<2x1x8xi1> to vector<2x1x8xi1>
    %81 = vector.broadcast %80 : vector<2x1x8xi1> to vector<2x8x8xi1>
    %82 = vector.broadcast %cst_49 : f32 to vector<2x8x8xf32>
    %83 = arith.select %81, %82, %76 : vector<2x8x8xi1>, vector<2x8x8xf32>
    %cst_50 = arith.constant dense<0xFF800000> : vector<2x8xf32>
    %84 = vector.multi_reduction <maximumf>, %83, %cst_50 [2] : vector<2x8x8xf32> to vector<2x8xf32>
    %85 = vector.shape_cast %84 : vector<2x8xf32> to vector<2x8x1xf32>
    %86 = vector.broadcast %85 : vector<2x8x1xf32> to vector<2x8x8xf32>
    %87 = arith.subf %83, %86 : vector<2x8x8xf32>
    %88 = math.exp %87 : vector<2x8x8xf32>
    %cst_51 = arith.constant dense<0.000000e+00> : vector<2x8xf32>
    %89 = vector.multi_reduction <add>, %88, %cst_51 [2] : vector<2x8x8xf32> to vector<2x8xf32>
    %90 = vector.shape_cast %89 : vector<2x8xf32> to vector<2x8x1xf32>
    %91 = vector.broadcast %90 : vector<2x8x1xf32> to vector<2x8x8xf32>
    %92 = arith.divf %88, %91 : vector<2x8x8xf32>
    %c0_52 = arith.constant 0 : index
    %c0_53 = arith.constant 0 : index
    %c0_54 = arith.constant 0 : index
    %93 = vector.load %arg23[%c0_52, %c0_53, %c0_54] : memref<2x8x8xf32, #tpu.memory_space<vmem>>, vector<2x8x8xf32>
    %cst_55 = arith.constant 2.500000e-01 : f32
    %94 = vector.broadcast %cst_55 : f32 to vector<2x8x8xf32>
    %95 = arith.mulf %92, %94 : vector<2x8x8xf32>
    %96 = arith.addf %93, %95 : vector<2x8x8xf32>
    %c0_56 = arith.constant 0 : index
    %c0_57 = arith.constant 0 : index
    %c0_58 = arith.constant 0 : index
    %97 = vector.load %arg23[%c0_56, %c0_57, %c0_58] : memref<2x8x8xf32, #tpu.memory_space<vmem>>, vector<2x8x8xf32>
    tpu.vector_store %arg23[%c0_56, %c0_57, %c0_58], %96 {strides = array<i32>} : memref<2x8x8xf32, #tpu.memory_space<vmem>>, vector<2x8x8xf32>,
    %98 = arith.truncf %92 : vector<2x8x8xf32> to vector<2x8x8xbf16>
    "tpu.trace_start"() <{level = 10 : i32, message = "bqk,bkd->bqd"}> : () -> ()
    %cst_59 = arith.constant dense<0.000000e+00> : vector<2x8x8xf32>
    %99 = tpu.matmul %98, %73, %cst_59 {dimension_numbers = #tpu.dot_dimension_numbers<[2], [1], [1], [2], [0, 0, 0, 1, 1, 2], [0], [0]>} : vector<2x8x8xbf16>, vector<2x8x8xbf16>, vector<2x8x8xf32> -> vector<2x8x8xf32>
    "tpu.trace_stop"() : () -> ()
    %100 = vector.shape_cast %99 : vector<2x8x8xf32> to vector<16x8xf32>
    %101 = arith.truncf %100 : vector<16x8xf32> to vector<16x8xbf16>
    %c0_60 = arith.constant 0 : index
    %c0_61 = arith.constant 0 : index
    %102 = vector.load %arg27[%c0_60, %c0_61] : memref<16x32xbf16, #tpu.memory_space<vmem>>, vector<16x8xbf16>
    tpu.vector_store %arg27[%c0_60, %c0_61], %101 {strides = array<i32>} : memref<16x32xbf16, #tpu.memory_space<vmem>>, vector<16x8xbf16>,
    %c0_62 = arith.constant 0 : index
    %c8 = arith.constant 8 : index
    %103 = vector.load %arg26[%c0_62, %c8] : memref<16x96xbf16, #tpu.memory_space<vmem>>, vector<16x8xbf16>
    %104 = vector.shape_cast %103 : vector<16x8xbf16> to vector<2x8x8xbf16>
    %c0_63 = arith.constant 0 : index
    %c40 = arith.constant 40 : index
    %105 = vector.load %arg26[%c0_63, %c40] : memref<16x96xbf16, #tpu.memory_space<vmem>>, vector<16x8xbf16>
    %106 = vector.shape_cast %105 : vector<16x8xbf16> to vector<2x8x8xbf16>
    %c0_64 = arith.constant 0 : index
    %c72 = arith.constant 72 : index
    %107 = vector.load %arg26[%c0_64, %c72] : memref<16x96xbf16, #tpu.memory_space<vmem>>, vector<16x8xbf16>
    %108 = vector.shape_cast %107 : vector<16x8xbf16> to vector<2x8x8xbf16>
    "tpu.trace_start"() <{level = 10 : i32, message = "bqd,bkd->bqk"}> : () -> ()
    %cst_65 = arith.constant dense<0.000000e+00> : vector<2x8x8xf32>
    %109 = tpu.matmul %104, %106, %cst_65 {dimension_numbers = #tpu.dot_dimension_numbers<[2], [2], [1], [1], [0, 0, 0, 1, 1, 1], [0], [0]>} : vector<2x8x8xbf16>, vector<2x8x8xbf16>, vector<2x8x8xf32> -> vector<2x8x8xf32>
    "tpu.trace_stop"() : () -> ()
    %cst_66 = arith.constant 0.353553385 : f32
    %110 = vector.broadcast %cst_66 : f32 to vector<2x8x8xf32>
    %111 = arith.mulf %109, %110 : vector<2x8x8xf32>
    %112 = vector.shape_cast %5 : vector<2x8xf32> to vector<2x1x8xf32>
    %cst_67 = arith.constant 0.000000e+00 : f32
    %113 = vector.broadcast %cst_67 : f32 to vector<2x1x8xf32>
    %114 = arith.cmpf oeq, %112, %113 : vector<2x1x8xf32>
    %cst_68 = arith.constant -1.000000e+09 : f32
    %115 = vector.shape_cast %114 : vector<2x1x8xi1> to vector<2x1x8xi1>
    %116 = vector.broadcast %115 : vector<2x1x8xi1> to vector<2x8x8xi1>
    %117 = vector.broadcast %cst_68 : f32 to vector<2x8x8xf32>
    %118 = arith.select %116, %117, %111 : vector<2x8x8xi1>, vector<2x8x8xf32>
    %cst_69 = arith.constant dense<0xFF800000> : vector<2x8xf32>
    %119 = vector.multi_reduction <maximumf>, %118, %cst_69 [2] : vector<2x8x8xf32> to vector<2x8xf32>
    %120 = vector.shape_cast %119 : vector<2x8xf32> to vector<2x8x1xf32>
    %121 = vector.broadcast %120 : vector<2x8x1xf32> to vector<2x8x8xf32>
    %122 = arith.subf %118, %121 : vector<2x8x8xf32>
    %123 = math.exp %122 : vector<2x8x8xf32>
    %cst_70 = arith.constant dense<0.000000e+00> : vector<2x8xf32>
    %124 = vector.multi_reduction <add>, %123, %cst_70 [2] : vector<2x8x8xf32> to vector<2x8xf32>
    %125 = vector.shape_cast %124 : vector<2x8xf32> to vector<2x8x1xf32>
    %126 = vector.broadcast %125 : vector<2x8x1xf32> to vector<2x8x8xf32>
    %127 = arith.divf %123, %126 : vector<2x8x8xf32>
    %c0_71 = arith.constant 0 : index
    %c0_72 = arith.constant 0 : index
    %c0_73 = arith.constant 0 : index
    %128 = vector.load %arg23[%c0_71, %c0_72, %c0_73] : memref<2x8x8xf32, #tpu.memory_space<vmem>>, vector<2x8x8xf32>
    %cst_74 = arith.constant 2.500000e-01 : f32
    %129 = vector.broadcast %cst_74 : f32 to vector<2x8x8xf32>
    %130 = arith.mulf %127, %129 : vector<2x8x8xf32>
    %131 = arith.addf %128, %130 : vector<2x8x8xf32>
    %c0_75 = arith.constant 0 : index
    %c0_76 = arith.constant 0 : index
    %c0_77 = arith.constant 0 : index
    %132 = vector.load %arg23[%c0_75, %c0_76, %c0_77] : memref<2x8x8xf32, #tpu.memory_space<vmem>>, vector<2x8x8xf32>
    tpu.vector_store %arg23[%c0_75, %c0_76, %c0_77], %131 {strides = array<i32>} : memref<2x8x8xf32, #tpu.memory_space<vmem>>, vector<2x8x8xf32>,
    %133 = arith.truncf %127 : vector<2x8x8xf32> to vector<2x8x8xbf16>
    "tpu.trace_start"() <{level = 10 : i32, message = "bqk,bkd->bqd"}> : () -> ()
    %cst_78 = arith.constant dense<0.000000e+00> : vector<2x8x8xf32>
    %134 = tpu.matmul %133, %108, %cst_78 {dimension_numbers = #tpu.dot_dimension_numbers<[2], [1], [1], [2], [0, 0, 0, 1, 1, 2], [0], [0]>} : vector<2x8x8xbf16>, vector<2x8x8xbf16>, vector<2x8x8xf32> -> vector<2x8x8xf32>
    "tpu.trace_stop"() : () -> ()
    %135 = vector.shape_cast %134 : vector<2x8x8xf32> to vector<16x8xf32>
    %136 = arith.truncf %135 : vector<16x8xf32> to vector<16x8xbf16>
    %c0_79 = arith.constant 0 : index
    %c8_80 = arith.constant 8 : index
    %137 = vector.load %arg27[%c0_79, %c8_80] : memref<16x32xbf16, #tpu.memory_space<vmem>>, vector<16x8xbf16>
    tpu.vector_store %arg27[%c0_79, %c8_80], %136 {strides = array<i32>} : memref<16x32xbf16, #tpu.memory_space<vmem>>, vector<16x8xbf16>,
    %c0_81 = arith.constant 0 : index
    %c16 = arith.constant 16 : index
    %138 = vector.load %arg26[%c0_81, %c16] : memref<16x96xbf16, #tpu.memory_space<vmem>>, vector<16x8xbf16>
    %139 = vector.shape_cast %138 : vector<16x8xbf16> to vector<2x8x8xbf16>
    %c0_82 = arith.constant 0 : index
    %c48 = arith.constant 48 : index
    %140 = vector.load %arg26[%c0_82, %c48] : memref<16x96xbf16, #tpu.memory_space<vmem>>, vector<16x8xbf16>
    %141 = vector.shape_cast %140 : vector<16x8xbf16> to vector<2x8x8xbf16>
    %c0_83 = arith.constant 0 : index
    %c80 = arith.constant 80 : index
    %142 = vector.load %arg26[%c0_83, %c80] : memref<16x96xbf16, #tpu.memory_space<vmem>>, vector<16x8xbf16>
    %143 = vector.shape_cast %142 : vector<16x8xbf16> to vector<2x8x8xbf16>
    "tpu.trace_start"() <{level = 10 : i32, message = "bqd,bkd->bqk"}> : () -> ()
    %cst_84 = arith.constant dense<0.000000e+00> : vector<2x8x8xf32>
    %144 = tpu.matmul %139, %141, %cst_84 {dimension_numbers = #tpu.dot_dimension_numbers<[2], [2], [1], [1], [0, 0, 0, 1, 1, 1], [0], [0]>} : vector<2x8x8xbf16>, vector<2x8x8xbf16>, vector<2x8x8xf32> -> vector<2x8x8xf32>
    "tpu.trace_stop"() : () -> ()
    %cst_85 = arith.constant 0.353553385 : f32
    %145 = vector.broadcast %cst_85 : f32 to vector<2x8x8xf32>
    %146 = arith.mulf %144, %145 : vector<2x8x8xf32>
    %147 = vector.shape_cast %5 : vector<2x8xf32> to vector<2x1x8xf32>
    %cst_86 = arith.constant 0.000000e+00 : f32
    %148 = vector.broadcast %cst_86 : f32 to vector<2x1x8xf32>
    %149 = arith.cmpf oeq, %147, %148 : vector<2x1x8xf32>
    %cst_87 = arith.constant -1.000000e+09 : f32
    %150 = vector.shape_cast %149 : vector<2x1x8xi1> to vector<2x1x8xi1>
    %151 = vector.broadcast %150 : vector<2x1x8xi1> to vector<2x8x8xi1>
    %152 = vector.broadcast %cst_87 : f32 to vector<2x8x8xf32>
    %153 = arith.select %151, %152, %146 : vector<2x8x8xi1>, vector<2x8x8xf32>
    %cst_88 = arith.constant dense<0xFF800000> : vector<2x8xf32>
    %154 = vector.multi_reduction <maximumf>, %153, %cst_88 [2] : vector<2x8x8xf32> to vector<2x8xf32>
    %155 = vector.shape_cast %154 : vector<2x8xf32> to vector<2x8x1xf32>
    %156 = vector.broadcast %155 : vector<2x8x1xf32> to vector<2x8x8xf32>
    %157 = arith.subf %153, %156 : vector<2x8x8xf32>
    %158 = math.exp %157 : vector<2x8x8xf32>
    %cst_89 = arith.constant dense<0.000000e+00> : vector<2x8xf32>
    %159 = vector.multi_reduction <add>, %158, %cst_89 [2] : vector<2x8x8xf32> to vector<2x8xf32>
    %160 = vector.shape_cast %159 : vector<2x8xf32> to vector<2x8x1xf32>
    %161 = vector.broadcast %160 : vector<2x8x1xf32> to vector<2x8x8xf32>
    %162 = arith.divf %158, %161 : vector<2x8x8xf32>
    %c0_90 = arith.constant 0 : index
    %c0_91 = arith.constant 0 : index
    %c0_92 = arith.constant 0 : index
    %163 = vector.load %arg23[%c0_90, %c0_91, %c0_92] : memref<2x8x8xf32, #tpu.memory_space<vmem>>, vector<2x8x8xf32>
    %cst_93 = arith.constant 2.500000e-01 : f32
    %164 = vector.broadcast %cst_93 : f32 to vector<2x8x8xf32>
    %165 = arith.mulf %162, %164 : vector<2x8x8xf32>
    %166 = arith.addf %163, %165 : vector<2x8x8xf32>
    %c0_94 = arith.constant 0 : index
    %c0_95 = arith.constant 0 : index
    %c0_96 = arith.constant 0 : index
    %167 = vector.load %arg23[%c0_94, %c0_95, %c0_96] : memref<2x8x8xf32, #tpu.memory_space<vmem>>, vector<2x8x8xf32>
    tpu.vector_store %arg23[%c0_94, %c0_95, %c0_96], %166 {strides = array<i32>} : memref<2x8x8xf32, #tpu.memory_space<vmem>>, vector<2x8x8xf32>,
    %168 = arith.truncf %162 : vector<2x8x8xf32> to vector<2x8x8xbf16>
    "tpu.trace_start"() <{level = 10 : i32, message = "bqk,bkd->bqd"}> : () -> ()
    %cst_97 = arith.constant dense<0.000000e+00> : vector<2x8x8xf32>
    %169 = tpu.matmul %168, %143, %cst_97 {dimension_numbers = #tpu.dot_dimension_numbers<[2], [1], [1], [2], [0, 0, 0, 1, 1, 2], [0], [0]>} : vector<2x8x8xbf16>, vector<2x8x8xbf16>, vector<2x8x8xf32> -> vector<2x8x8xf32>
    "tpu.trace_stop"() : () -> ()
    %170 = vector.shape_cast %169 : vector<2x8x8xf32> to vector<16x8xf32>
    %171 = arith.truncf %170 : vector<16x8xf32> to vector<16x8xbf16>
    %c0_98 = arith.constant 0 : index
    %c16_99 = arith.constant 16 : index
    %172 = vector.load %arg27[%c0_98, %c16_99] : memref<16x32xbf16, #tpu.memory_space<vmem>>, vector<16x8xbf16>
    tpu.vector_store %arg27[%c0_98, %c16_99], %171 {strides = array<i32>} : memref<16x32xbf16, #tpu.memory_space<vmem>>, vector<16x8xbf16>,
    %c0_100 = arith.constant 0 : index
    %c24 = arith.constant 24 : index
    %173 = vector.load %arg26[%c0_100, %c24] : memref<16x96xbf16, #tpu.memory_space<vmem>>, vector<16x8xbf16>
    %174 = vector.shape_cast %173 : vector<16x8xbf16> to vector<2x8x8xbf16>
    %c0_101 = arith.constant 0 : index
    %c56 = arith.constant 56 : index
    %175 = vector.load %arg26[%c0_101, %c56] : memref<16x96xbf16, #tpu.memory_space<vmem>>, vector<16x8xbf16>
    %176 = vector.shape_cast %175 : vector<16x8xbf16> to vector<2x8x8xbf16>
    %c0_102 = arith.constant 0 : index
    %c88 = arith.constant 88 : index
    %177 = vector.load %arg26[%c0_102, %c88] : memref<16x96xbf16, #tpu.memory_space<vmem>>, vector<16x8xbf16>
    %178 = vector.shape_cast %177 : vector<16x8xbf16> to vector<2x8x8xbf16>
    "tpu.trace_start"() <{level = 10 : i32, message = "bqd,bkd->bqk"}> : () -> ()
    %cst_103 = arith.constant dense<0.000000e+00> : vector<2x8x8xf32>
    %179 = tpu.matmul %174, %176, %cst_103 {dimension_numbers = #tpu.dot_dimension_numbers<[2], [2], [1], [1], [0, 0, 0, 1, 1, 1], [0], [0]>} : vector<2x8x8xbf16>, vector<2x8x8xbf16>, vector<2x8x8xf32> -> vector<2x8x8xf32>
    "tpu.trace_stop"() : () -> ()
    %cst_104 = arith.constant 0.353553385 : f32
    %180 = vector.broadcast %cst_104 : f32 to vector<2x8x8xf32>
    %181 = arith.mulf %179, %180 : vector<2x8x8xf32>
    %182 = vector.shape_cast %5 : vector<2x8xf32> to vector<2x1x8xf32>
    %cst_105 = arith.constant 0.000000e+00 : f32
    %183 = vector.broadcast %cst_105 : f32 to vector<2x1x8xf32>
    %184 = arith.cmpf oeq, %182, %183 : vector<2x1x8xf32>
    %cst_106 = arith.constant -1.000000e+09 : f32
    %185 = vector.shape_cast %184 : vector<2x1x8xi1> to vector<2x1x8xi1>
    %186 = vector.broadcast %185 : vector<2x1x8xi1> to vector<2x8x8xi1>
    %187 = vector.broadcast %cst_106 : f32 to vector<2x8x8xf32>
    %188 = arith.select %186, %187, %181 : vector<2x8x8xi1>, vector<2x8x8xf32>
    %cst_107 = arith.constant dense<0xFF800000> : vector<2x8xf32>
    %189 = vector.multi_reduction <maximumf>, %188, %cst_107 [2] : vector<2x8x8xf32> to vector<2x8xf32>
    %190 = vector.shape_cast %189 : vector<2x8xf32> to vector<2x8x1xf32>
    %191 = vector.broadcast %190 : vector<2x8x1xf32> to vector<2x8x8xf32>
    %192 = arith.subf %188, %191 : vector<2x8x8xf32>
    %193 = math.exp %192 : vector<2x8x8xf32>
    %cst_108 = arith.constant dense<0.000000e+00> : vector<2x8xf32>
    %194 = vector.multi_reduction <add>, %193, %cst_108 [2] : vector<2x8x8xf32> to vector<2x8xf32>
    %195 = vector.shape_cast %194 : vector<2x8xf32> to vector<2x8x1xf32>
    %196 = vector.broadcast %195 : vector<2x8x1xf32> to vector<2x8x8xf32>
    %197 = arith.divf %193, %196 : vector<2x8x8xf32>
    %c0_109 = arith.constant 0 : index
    %c0_110 = arith.constant 0 : index
    %c0_111 = arith.constant 0 : index
    %198 = vector.load %arg23[%c0_109, %c0_110, %c0_111] : memref<2x8x8xf32, #tpu.memory_space<vmem>>, vector<2x8x8xf32>
    %cst_112 = arith.constant 2.500000e-01 : f32
    %199 = vector.broadcast %cst_112 : f32 to vector<2x8x8xf32>
    %200 = arith.mulf %197, %199 : vector<2x8x8xf32>
    %201 = arith.addf %198, %200 : vector<2x8x8xf32>
    %c0_113 = arith.constant 0 : index
    %c0_114 = arith.constant 0 : index
    %c0_115 = arith.constant 0 : index
    %202 = vector.load %arg23[%c0_113, %c0_114, %c0_115] : memref<2x8x8xf32, #tpu.memory_space<vmem>>, vector<2x8x8xf32>
    tpu.vector_store %arg23[%c0_113, %c0_114, %c0_115], %201 {strides = array<i32>} : memref<2x8x8xf32, #tpu.memory_space<vmem>>, vector<2x8x8xf32>,
    %203 = arith.truncf %197 : vector<2x8x8xf32> to vector<2x8x8xbf16>
    "tpu.trace_start"() <{level = 10 : i32, message = "bqk,bkd->bqd"}> : () -> ()
    %cst_116 = arith.constant dense<0.000000e+00> : vector<2x8x8xf32>
    %204 = tpu.matmul %203, %178, %cst_116 {dimension_numbers = #tpu.dot_dimension_numbers<[2], [1], [1], [2], [0, 0, 0, 1, 1, 2], [0], [0]>} : vector<2x8x8xbf16>, vector<2x8x8xbf16>, vector<2x8x8xf32> -> vector<2x8x8xf32>
    "tpu.trace_stop"() : () -> ()
    %205 = vector.shape_cast %204 : vector<2x8x8xf32> to vector<16x8xf32>
    %206 = arith.truncf %205 : vector<16x8xf32> to vector<16x8xbf16>
    %c0_117 = arith.constant 0 : index
    %c24_118 = arith.constant 24 : index
    %207 = vector.load %arg27[%c0_117, %c24_118] : memref<16x32xbf16, #tpu.memory_space<vmem>>, vector<16x8xbf16>
    tpu.vector_store %arg27[%c0_117, %c24_118], %206 {strides = array<i32>} : memref<16x32xbf16, #tpu.memory_space<vmem>>, vector<16x8xbf16>,
    %c0_119 = arith.constant 0 : index
    %c0_120 = arith.constant 0 : index
    %208 = vector.load %arg27[%c0_119, %c0_120] : memref<16x32xbf16, #tpu.memory_space<vmem>>, vector<16x32xbf16>
    %c0_121 = arith.constant 0 : index
    %c0_122 = arith.constant 0 : index
    %209 = vector.load %arg12[%c0_121, %c0_122] : memref<32x32xbf16, #tpu.memory_space<vmem>>, vector<32x32xbf16>
    %cst_123 = arith.constant dense<0.000000e+00> : vector<16x32xf32>
    %210 = tpu.matmul %208, %209, %cst_123 {dimension_numbers = #tpu.dot_dimension_numbers<[1], [0], [0], [1], [0, 0, 1, 1], [], []>} : vector<16x32xbf16>, vector<32x32xbf16>, vector<16x32xf32> -> vector<16x32xf32>
    %c0_124 = arith.constant 0 : index
    %c0_125 = arith.constant 0 : index
    %211 = vector.load %arg13[%c0_124, %c0_125] : memref<1x32xf32, #tpu.memory_space<vmem>>, vector<1x32xf32>
    %212 = vector.broadcast %211 : vector<1x32xf32> to vector<16x32xf32>
    %213 = arith.addf %210, %212 : vector<16x32xf32>
    %214 = vector.shape_cast %3 : vector<2x8x32xf32> to vector<16x32xf32>
    %215 = arith.addf %213, %214 : vector<16x32xf32>
    %cst_126 = arith.constant dense<0.000000e+00> : vector<16xf32>
    %216 = vector.multi_reduction <add>, %215, %cst_126 [1] : vector<16x32xf32> to vector<16xf32>
    %217 = vector.shape_cast %216 : vector<16xf32> to vector<16x1xf32>
    %cst_127 = arith.constant 3.200000e+01 : f32
    %218 = vector.broadcast %cst_127 : f32 to vector<16x1xf32>
    %219 = arith.divf %217, %218 : vector<16x1xf32>
    %220 = vector.broadcast %219 : vector<16x1xf32> to vector<16x32xf32>
    %221 = arith.subf %215, %220 : vector<16x32xf32>
    %222 = vector.broadcast %219 : vector<16x1xf32> to vector<16x32xf32>
    %223 = arith.subf %215, %222 : vector<16x32xf32>
    %224 = arith.mulf %221, %223 : vector<16x32xf32>
    %cst_128 = arith.constant dense<0.000000e+00> : vector<16xf32>
    %225 = vector.multi_reduction <add>, %224, %cst_128 [1] : vector<16x32xf32> to vector<16xf32>
    %226 = vector.shape_cast %225 : vector<16xf32> to vector<16x1xf32>
    %cst_129 = arith.constant 3.200000e+01 : f32
    %227 = vector.broadcast %cst_129 : f32 to vector<16x1xf32>
    %228 = arith.divf %226, %227 : vector<16x1xf32>
    %229 = vector.broadcast %219 : vector<16x1xf32> to vector<16x32xf32>
    %230 = arith.subf %215, %229 : vector<16x32xf32>
    %cst_130 = arith.constant 9.99999974E-6 : f32
    %231 = vector.broadcast %cst_130 : f32 to vector<16x1xf32>
    %232 = arith.addf %228, %231 : vector<16x1xf32>
    %233 = math.rsqrt %232 : vector<16x1xf32>
    %234 = vector.broadcast %233 : vector<16x1xf32> to vector<16x32xf32>
    %235 = arith.mulf %230, %234 : vector<16x32xf32>
    %c0_131 = arith.constant 0 : index
    %c0_132 = arith.constant 0 : index
    %236 = vector.load %arg14[%c0_131, %c0_132] : memref<1x32xf32, #tpu.memory_space<vmem>>, vector<1x32xf32>
    %237 = vector.broadcast %236 : vector<1x32xf32> to vector<16x32xf32>
    %238 = arith.mulf %235, %237 : vector<16x32xf32>
    %c0_133 = arith.constant 0 : index
    %c0_134 = arith.constant 0 : index
    %239 = vector.load %arg15[%c0_133, %c0_134] : memref<1x32xf32, #tpu.memory_space<vmem>>, vector<1x32xf32>
    %240 = vector.broadcast %239 : vector<1x32xf32> to vector<16x32xf32>
    %241 = arith.addf %238, %240 : vector<16x32xf32>
    %242 = vector.shape_cast %241 : vector<16x32xf32> to vector<2x8x32xf32>
    %cst_135 = arith.constant dense<0.000000e+00> : vector<2x32xf32>
    %243 = vector.multi_reduction <add>, %242, %cst_135 [1] : vector<2x8x32xf32> to vector<2x32xf32>
    %cst_136 = arith.constant 8.000000e+00 : f32
    %244 = vector.broadcast %cst_136 : f32 to vector<2x32xf32>
    %245 = arith.divf %243, %244 : vector<2x32xf32>
    %246 = arith.truncf %65 : vector<2x32xf32> to vector<2x32xbf16>
    %c0_137 = arith.constant 0 : index
    %c0_138 = arith.constant 0 : index
    %247 = vector.load %arg16[%c0_137, %c0_138] : memref<32x32xbf16, #tpu.memory_space<vmem>>, vector<32x32xbf16>
    %cst_139 = arith.constant dense<0.000000e+00> : vector<2x32xf32>
    %248 = tpu.matmul %246, %247, %cst_139 {dimension_numbers = #tpu.dot_dimension_numbers<[1], [0], [0], [1], [0, 0, 1, 1], [], []>} : vector<2x32xbf16>, vector<32x32xbf16>, vector<2x32xf32> -> vector<2x32xf32>
    %249 = arith.truncf %245 : vector<2x32xf32> to vector<2x32xbf16>
    %c0_140 = arith.constant 0 : index
    %c0_141 = arith.constant 0 : index
    %250 = vector.load %arg17[%c0_140, %c0_141] : memref<32x32xbf16, #tpu.memory_space<vmem>>, vector<32x32xbf16>
    %cst_142 = arith.constant dense<0.000000e+00> : vector<2x32xf32>
    %251 = tpu.matmul %249, %250, %cst_142 {dimension_numbers = #tpu.dot_dimension_numbers<[1], [0], [0], [1], [0, 0, 1, 1], [], []>} : vector<2x32xbf16>, vector<32x32xbf16>, vector<2x32xf32> -> vector<2x32xf32>
    %252 = arith.addf %248, %251 : vector<2x32xf32>
    %c0_143 = arith.constant 0 : index
    %c0_144 = arith.constant 0 : index
    %253 = vector.load %arg18[%c0_143, %c0_144] : memref<1x32xf32, #tpu.memory_space<vmem>>, vector<1x32xf32>
    %254 = vector.broadcast %253 : vector<1x32xf32> to vector<2x32xf32>
    %255 = arith.addf %252, %254 : vector<2x32xf32>
    %cst_145 = arith.constant 0.000000e+00 : f32
    %256 = vector.broadcast %cst_145 : f32 to vector<2x32xf32>
    %257 = arith.maximumf %255, %256 : vector<2x32xf32>
    %258 = arith.truncf %257 : vector<2x32xf32> to vector<2x32xbf16>
    %c0_146 = arith.constant 0 : index
    %c0_147 = arith.constant 0 : index
    %259 = vector.load %arg19[%c0_146, %c0_147] : memref<32x32xbf16, #tpu.memory_space<vmem>>, vector<32x32xbf16>
    %cst_148 = arith.constant dense<0.000000e+00> : vector<2x32xf32>
    %260 = tpu.matmul %258, %259, %cst_148 {dimension_numbers = #tpu.dot_dimension_numbers<[1], [0], [0], [1], [0, 0, 1, 1], [], []>} : vector<2x32xbf16>, vector<32x32xbf16>, vector<2x32xf32> -> vector<2x32xf32>
    %c0_149 = arith.constant 0 : index
    %c0_150 = arith.constant 0 : index
    %261 = vector.load %arg20[%c0_149, %c0_150] : memref<1x32xf32, #tpu.memory_space<vmem>>, vector<1x32xf32>
    %262 = vector.broadcast %261 : vector<1x32xf32> to vector<2x32xf32>
    %263 = arith.addf %260, %262 : vector<2x32xf32>
    %c0_151 = arith.constant 0 : index
    %c0_152 = arith.constant 0 : index
    %264 = vector.load %arg21[%c0_151, %c0_152] : memref<2x32xf32, #tpu.memory_space<vmem>>, vector<2x32xf32>
    tpu.vector_store %arg21[%c0_151, %c0_152], %263 {strides = array<i32>} : memref<2x32xf32, #tpu.memory_space<vmem>>, vector<2x32xf32>,
    %c0_153 = arith.constant 0 : index
    %c0_154 = arith.constant 0 : index
    %265 = vector.load %arg22[%c0_153, %c0_154] : memref<2x8xf32, #tpu.memory_space<vmem>>, vector<2x8xf32>
    tpu.vector_store %arg22[%c0_153, %c0_154], %46 {strides = array<i32>} : memref<2x8xf32, #tpu.memory_space<vmem>>, vector<2x8xf32>,
    %c0_155 = arith.constant 0 : index
    %c0_156 = arith.constant 0 : index
    %266 = vector.load %arg24[%c0_155, %c0_156] : memref<2x32xf32, #tpu.memory_space<vmem>>, vector<2x32xf32>
    tpu.vector_store %arg24[%c0_155, %c0_156], %65 {strides = array<i32>} : memref<2x32xf32, #tpu.memory_space<vmem>>, vector<2x32xf32>,
    %c0_157 = arith.constant 0 : index
    %c0_158 = arith.constant 0 : index
    %267 = vector.load %arg25[%c0_157, %c0_158] : memref<2x32xf32, #tpu.memory_space<vmem>>, vector<2x32xf32>
    tpu.vector_store %arg25[%c0_157, %c0_158], %245 {strides = array<i32>} : memref<2x32xf32, #tpu.memory_space<vmem>>, vector<2x32xf32>,
    return
  }
  func.func @transform_0(%arg0: i32) -> (i32, i32, i32) {
    %c0_i32 = arith.constant 0 : i32
    %c0_i32_0 = arith.constant 0 : i32
    %c0_i32_1 = arith.constant 0 : i32
    return %arg0, %c0_i32, %c0_i32_0 : i32, i32, i32
  }
  func.func @transform_1(%arg0: i32) -> (i32, i32) {
    %c0_i32 = arith.constant 0 : i32
    %c0_i32_0 = arith.constant 0 : i32
    return %arg0, %c0_i32 : i32, i32
  }
  func.func @transform_2(%arg0: i32) -> (i32, i32) {
    %c0_i32 = arith.constant 0 : i32
    %c0_i32_0 = arith.constant 0 : i32
    return %arg0, %c0_i32 : i32, i32
  }
  func.func @transform_3(%arg0: i32) -> (i32, i32) {
    %c0_i32 = arith.constant 0 : i32
    %c0_i32_0 = arith.constant 0 : i32
    %c0_i32_1 = arith.constant 0 : i32
    return %c0_i32, %c0_i32_0 : i32, i32
  }
  func.func @transform_4(%arg0: i32) -> (i32, i32) {
    %c0_i32 = arith.constant 0 : i32
    %c0_i32_0 = arith.constant 0 : i32
    %c0_i32_1 = arith.constant 0 : i32
    return %c0_i32, %c0_i32_0 : i32, i32
  }
  func.func @transform_5(%arg0: i32) -> (i32, i32) {
    %c0_i32 = arith.constant 0 : i32
    %c0_i32_0 = arith.constant 0 : i32
    %c0_i32_1 = arith.constant 0 : i32
    return %c0_i32, %c0_i32_0 : i32, i32
  }
  func.func @transform_6(%arg0: i32) -> (i32, i32) {
    %c0_i32 = arith.constant 0 : i32
    %c0_i32_0 = arith.constant 0 : i32
    %c0_i32_1 = arith.constant 0 : i32
    return %c0_i32, %c0_i32_0 : i32, i32
  }
  func.func @transform_7(%arg0: i32) -> (i32, i32) {
    %c0_i32 = arith.constant 0 : i32
    %c0_i32_0 = arith.constant 0 : i32
    %c0_i32_1 = arith.constant 0 : i32
    return %c0_i32, %c0_i32_0 : i32, i32
  }
  func.func @transform_8(%arg0: i32) -> (i32, i32) {
    %c0_i32 = arith.constant 0 : i32
    %c0_i32_0 = arith.constant 0 : i32
    %c0_i32_1 = arith.constant 0 : i32
    return %c0_i32, %c0_i32_0 : i32, i32
  }
  func.func @transform_9(%arg0: i32) -> (i32, i32) {
    %c0_i32 = arith.constant 0 : i32
    %c0_i32_0 = arith.constant 0 : i32
    %c0_i32_1 = arith.constant 0 : i32
    return %c0_i32, %c0_i32_0 : i32, i32
  }
  func.func @transform_10(%arg0: i32) -> (i32, i32) {
    %c0_i32 = arith.constant 0 : i32
    %c0_i32_0 = arith.constant 0 : i32
    %c0_i32_1 = arith.constant 0 : i32
    return %c0_i32, %c0_i32_0 : i32, i32
  }
  func.func @transform_11(%arg0: i32) -> (i32, i32) {
    %c0_i32 = arith.constant 0 : i32
    %c0_i32_0 = arith.constant 0 : i32
    %c0_i32_1 = arith.constant 0 : i32
    return %c0_i32, %c0_i32_0 : i32, i32
  }
  func.func @transform_12(%arg0: i32) -> (i32, i32) {
    %c0_i32 = arith.constant 0 : i32
    %c0_i32_0 = arith.constant 0 : i32
    %c0_i32_1 = arith.constant 0 : i32
    return %c0_i32, %c0_i32_0 : i32, i32
  }
  func.func @transform_13(%arg0: i32) -> (i32, i32) {
    %c0_i32 = arith.constant 0 : i32
    %c0_i32_0 = arith.constant 0 : i32
    %c0_i32_1 = arith.constant 0 : i32
    return %c0_i32, %c0_i32_0 : i32, i32
  }
  func.func @transform_14(%arg0: i32) -> (i32, i32) {
    %c0_i32 = arith.constant 0 : i32
    %c0_i32_0 = arith.constant 0 : i32
    %c0_i32_1 = arith.constant 0 : i32
    return %c0_i32, %c0_i32_0 : i32, i32
  }
  func.func @transform_15(%arg0: i32) -> (i32, i32) {
    %c0_i32 = arith.constant 0 : i32
    %c0_i32_0 = arith.constant 0 : i32
    %c0_i32_1 = arith.constant 0 : i32
    return %c0_i32, %c0_i32_0 : i32, i32
  }
  func.func @transform_16(%arg0: i32) -> (i32, i32) {
    %c0_i32 = arith.constant 0 : i32
    %c0_i32_0 = arith.constant 0 : i32
    %c0_i32_1 = arith.constant 0 : i32
    return %c0_i32, %c0_i32_0 : i32, i32
  }
  func.func @transform_17(%arg0: i32) -> (i32, i32) {
    %c0_i32 = arith.constant 0 : i32
    %c0_i32_0 = arith.constant 0 : i32
    %c0_i32_1 = arith.constant 0 : i32
    return %c0_i32, %c0_i32_0 : i32, i32
  }
  func.func @transform_18(%arg0: i32) -> (i32, i32) {
    %c0_i32 = arith.constant 0 : i32
    %c0_i32_0 = arith.constant 0 : i32
    %c0_i32_1 = arith.constant 0 : i32
    return %c0_i32, %c0_i32_0 : i32, i32
  }
  func.func @transform_19(%arg0: i32) -> (i32, i32) {
    %c0_i32 = arith.constant 0 : i32
    %c0_i32_0 = arith.constant 0 : i32
    %c0_i32_1 = arith.constant 0 : i32
    return %c0_i32, %c0_i32_0 : i32, i32
  }
  func.func @transform_20(%arg0: i32) -> (i32, i32) {
    %c0_i32 = arith.constant 0 : i32
    %c0_i32_0 = arith.constant 0 : i32
    return %arg0, %c0_i32 : i32, i32
  }
  func.func @transform_21(%arg0: i32) -> (i32, i32) {
    %c0_i32 = arith.constant 0 : i32
    %c0_i32_0 = arith.constant 0 : i32
    return %arg0, %c0_i32 : i32, i32
  }
  func.func @transform_22(%arg0: i32) -> (i32, i32, i32) {
    %c0_i32 = arith.constant 0 : i32
    %c0_i32_0 = arith.constant 0 : i32
    %c0_i32_1 = arith.constant 0 : i32
    return %arg0, %c0_i32, %c0_i32_0 : i32, i32, i32
  }
  func.func @transform_23(%arg0: i32) -> (i32, i32) {
    %c0_i32 = arith.constant 0 : i32
    %c0_i32_0 = arith.constant 0 : i32
    return %arg0, %c0_i32 : i32, i32
  }
  func.func @transform_24(%arg0: i32) -> (i32, i32) {
    %c0_i32 = arith.constant 0 : i32
    %c0_i32_0 = arith.constant 0 : i32
    return %arg0, %c0_i32 : i32, i32
  }
}

</mosaic_0001>

<bundles_post_ra>
// kernel: tpu_custom_call.1
= control target key start
LH: loop header
LB: loop body
LE: loop exit
PB: predicated region body
PF: predicated region fallthrough
CT: control target
= control target key end

     0   :  { %s4009_s0 = inlined_call_operand.hbm [shape: bf16[2,8,32], index: 0, kind: input, shape index: {}]   ;;  %s4010_s1 = inlined_call_operand.hbm [shape: bf16[2,32], index: 1, kind: input, shape index: {}]   ;;  %s4011_s2 = inlined_call_operand.hbm [shape: f32[2,8], index: 2, kind: input, shape index: {}]   ;;  %s4012_s3 = inlined_call_operand.hbm [shape: bf16[32,128], index: 3, kind: input, shape index: {}]   ;;  %s4013_s4 = inlined_call_operand.hbm [shape: bf16[32,32], index: 4, kind: input, shape index: {}]   ;;  %s4014_s5 = inlined_call_operand.hbm [shape: f32[1,32], index: 5, kind: input, shape index: {}]   ;;  %s4015_s6 = inlined_call_operand.hbm [shape: bf16[32,32], index: 6, kind: input, shape index: {}]   ;;  %s4016_s7 = inlined_call_operand.hbm [shape: f32[1,32], index: 7, kind: input, shape index: {}]   ;;  %s4017_s8 = inlined_call_operand.hbm [shape: bf16[32,32], index: 8, kind: input, shape index: {}]   ;;  %s4018_s9 = inlined_call_operand.hbm [shape: bf16[32,32], index: 9, kind: input, shape index: {}]   ;;  %s4019_s10 = inlined_call_operand.hbm [shape: f32[1,32], index: 10, kind: input, shape index: {}]   ;;  %s4020_s11 = inlined_call_operand.hbm [shape: bf16[32,32], index: 11, kind: input, shape index: {}]   ;;  %s4021_s12 = inlined_call_operand.hbm [shape: f32[1,32], index: 12, kind: input, shape index: {}]   ;;  %s4022_s13 = inlined_call_operand.hbm [shape: f32[1,32], index: 13, kind: input, shape index: {}]   ;;  %s4023_s14 = inlined_call_operand.hbm [shape: f32[1,32], index: 14, kind: input, shape index: {}]   ;;  %s4024_s15 = inlined_call_operand.hbm [shape: bf16[32,32], index: 15, kind: input, shape index: {}]   ;;  %s4025_s16 = inlined_call_operand.hbm [shape: bf16[32,32], index: 16, kind: input, shape index: {}]   ;;  %s4026_s17 = inlined_call_operand.hbm [shape: f32[1,32], index: 17, kind: input, shape index: {}]   ;;  %s4027_s18 = inlined_call_operand.hbm [shape: bf16[32,32], index: 18, kind: input, shape index: {}]   ;;  %s4028_s19 = inlined_call_operand.hbm [shape: f32[1,32], index: 19, kind: input, shape index: {}]   ;;  %s4029_s20 = inlined_call_operand.hbm [shape: f32[2,32], index: 20, kind: output, shape index: {0}]   ;;  %s4030_s21 = inlined_call_operand.hbm [shape: f32[2,8], index: 21, kind: output, shape index: {1}]   ;;  %s4031_s22 = inlined_call_operand.hbm [shape: f32[2,8,8], index: 22, kind: output, shape index: {2}]   ;;  %s4032_s23 = inlined_call_operand.hbm [shape: f32[2,32], index: 23, kind: output, shape index: {3}]   ;;  %s4033_s24 = inlined_call_operand.hbm [shape: f32[2,32], index: 24, kind: output, shape index: {4}]  }
   0x1   :  { %4047 = sst [smem:[#allocation57_spill]] %s4009_s0 }
   0x2   :  { %4048 = sst [smem:[#allocation58_spill]] %s4010_s1 }
   0x3   :  { %4049 = sst [smem:[#allocation59_spill]] %s4011_s2 }
   0x4   :  { %4050 = sst [smem:[#allocation60_spill]] %s4012_s3 }
   0x5   :  { %4051 = sst [smem:[#allocation61_spill]] %s4013_s4 }
   0x6   :  { %4052 = sst [smem:[#allocation62_spill]] %s4014_s5 }
   0x7   :  { %4053 = sst [smem:[#allocation63_spill]] %s4015_s6 }
   0x8   :  { %4054 = sst [smem:[#allocation64_spill]] %s4016_s7 }
   0x9   :  { %4055 = sst [smem:[#allocation65_spill]] %s4017_s8 }
   0xa   :  { %4056 = sst [smem:[#allocation66_spill]] %s4029_s20 }
   0xb   :  { %4057 = sst [smem:[#allocation67_spill]] %s4033_s24 }
   0xc   :  { %30 = vsyncpa [#allocation5], 0 }
   0xd   :  { %31 = vsyncpa [#allocation8], 0 }
   0xe   :  { %32 = vsyncpa [#allocation11], 0 }
   0xf   :  { %33 = vsyncpa [#allocation14], 0 }
  0x10   :  { %34 = vsyncpa [#allocation17], 0 }
  0x11   :  { %35 = vsyncpa [#allocation20], 0 }
  0x12   :  { %36 = vsyncpa [#allocation23], 0 }
  0x13   :  { %37 = vsyncpa [#allocation26], 0 }
  0x14   :  { %38 = vsyncpa [#allocation29], 0 }
  0x15   :  { %39 = vsyncpa [#allocation32], 0 }
  0x16   :  { %40 = vsyncpa [#allocation35], 0 }
  0x17   :  { %41 = vsyncpa [#allocation6], 0 }
  0x18   :  { %42 = vsyncpa [#allocation38], 0 }
  0x19   :  { %43 = vsyncpa [#allocation41], 0  ;;  %s3211_s5 = smov [#allocation7]   ;;  %s4058_s6 = sld [smem:[#allocation58_spill]] }
  0x1a   :  { %s62_s26 = sshll.u32 %s3211_s5, 4  ;;  %s63_s26 = int_to_ptr.vmem [resolvable:$true] %s62_s26 }
  0x1f   :  { %s2633_s2 = scalar_lea.hbm %s4058_s6, 16 }
  0x20   :  { %p2634_p0 = scmp.ne.s32.totalorder %s4058_s6, %s2633_s2  ;;  %p2637_p1 = scmp.lt.u32.totalorder %s2633_s2, %s4058_s6 }
  0x22   :  { %p2639_p2 = pnand %p2637_p1, %p2634_p0 }
  0x24   :  { %2642 = shalt.err (!%p2639_p2)
}
  0x25   :  { %s2643_s3 = scalar_lea.vmem %s63_s26, 16  ;;  %s2647_s25 = scalar_lea.vmem %s63_s26, 32 }
  0x26   :  { %p2644_p3 = scmp.ne.s32.totalorder %s63_s26, %s2643_s3  ;;  %p2648_p4 = scmp.lt.s32.totalorder %s63_s26, %s63_s26 }
  0x27   :  { %p2649_p5 = scmp.lt.s32.totalorder %s2647_s25, %s2643_s3 }
  0x29   :  { %p2650_p6 = por %p2649_p5, %p2648_p4 }
  0x2b   :  { %p2651_p7 = pnand %p2650_p6, %p2644_p3 }
  0x2d   :  { %2654 = shalt.err (!%p2651_p7)
}
  0x2e   :  { %65 = dma.hbm_to_vmem [thread:$0]  %s4058_s6, 16, %s63_s26, [#allocation8]  }
  0x2f   :  { %s3212_s1 = smov [#allocation10]   ;;  %s3213_s27 = smov [#allocation13]  }
  0x30   :  { %s81_s5 = sshll.u32 %s3212_s1, 4  ;;  %s106_s28 = sshll.u32 %s3213_s27, 4  ;;  %s82_s5 = int_to_ptr.vmem [resolvable:$true] %s81_s5  ;;  %s107_s28 = int_to_ptr.vmem [resolvable:$true] %s106_s28 }
  0x31   :  { %s4059_s0 = sld [smem:[#allocation60_spill]] }
  0x37   :  { %s2655_s7 = scalar_lea.hbm %s4059_s0, 256 }
  0x38   :  { %p2656_p8 = scmp.ne.s32.totalorder %s4059_s0, %s2655_s7  ;;  %p2659_p9 = scmp.lt.u32.totalorder %s2655_s7, %s4059_s0 }
  0x3a   :  { %p2661_p10 = pnand %p2659_p9, %p2656_p8 }
  0x3c   :  { %2664 = shalt.err (!%p2661_p10)
}
  0x3d   :  { %s2665_s26 = scalar_lea.vmem %s82_s5, 256  ;;  %p2670_p12 = scmp.lt.s32.totalorder %s82_s5, %s82_s5 }
  0x3e   :  { %p2666_p11 = scmp.ne.s32.totalorder %s82_s5, %s2665_s26  ;;  %p2671_p13 = scmp.lt.s32.totalorder %s2665_s26, %s2665_s26 }
  0x40   :  { %p2672_p0 = por %p2671_p13, %p2670_p12 }
  0x42   :  { %p2673_p1 = pnand %p2672_p0, %p2666_p11 }
  0x44   :  { %2676 = shalt.err (!%p2673_p1)
}
  0x45   :  { %s4045_s6 = smov 64   ;;  %s3215_s8 = smov 4  }
  0x46   :  { %87 = dma.hbm_to_vmem [thread:$0]  %s4059_s0, 256, %s82_s5, [#allocation11], %s4045_s6, %s4045_s6, %s3215_s8  }
  0x47   :  { %s4060_s2 = sld [smem:[#allocation62_spill]] }
  0x4d   :  { %s2677_s29 = scalar_lea.hbm %s4060_s2, 16 }
  0x4e   :  { %p2678_p2 = scmp.ne.s32.totalorder %s4060_s2, %s2677_s29  ;;  %p2681_p3 = scmp.lt.u32.totalorder %s2677_s29, %s4060_s2 }
  0x50   :  { %p2683_p4 = pnand %p2681_p3, %p2678_p2 }
  0x52   :  { %2686 = shalt.err (!%p2683_p4)
}
  0x53   :  { %s2687_s26 = scalar_lea.vmem %s107_s28, 16  ;;  %s2691_s24 = scalar_lea.vmem %s107_s28, 32 }
  0x54   :  { %p2688_p5 = scmp.ne.s32.totalorder %s107_s28, %s2687_s26  ;;  %p2692_p6 = scmp.lt.s32.totalorder %s107_s28, %s107_s28 }
  0x55   :  { %p2693_p7 = scmp.lt.s32.totalorder %s2691_s24, %s2687_s26 }
  0x57   :  { %p2694_p8 = por %p2693_p7, %p2692_p6 }
  0x59   :  { %p2695_p9 = pnand %p2694_p8, %p2688_p5 }
  0x5b   :  { %2698 = shalt.err (!%p2695_p9)
}
  0x5c   :  { %109 = dma.hbm_to_vmem [thread:$0]  %s4060_s2, 16, %s107_s28, [#allocation14]  }
  0x5d   :  { %s3216_s20 = smov [#allocation16]   ;;  %s3217_s1 = smov [#allocation19]  }
  0x5e   :  { %s128_s4 = sshll.u32 %s3216_s20, 4  ;;  %s149_s27 = sshll.u32 %s3217_s1, 4  ;;  %s129_s4 = int_to_ptr.vmem [resolvable:$true] %s128_s4  ;;  %s150_s27 = int_to_ptr.vmem [resolvable:$true] %s149_s27 }
  0x5f   :  { %s4061_s30 = sld [smem:[#allocation64_spill]] }
  0x65   :  { %s2699_s3 = scalar_lea.hbm %s4061_s30, 16 }
  0x66   :  { %p2700_p10 = scmp.ne.s32.totalorder %s4061_s30, %s2699_s3  ;;  %p2703_p11 = scmp.lt.u32.totalorder %s2699_s3, %s4061_s30 }
  0x68   :  { %p2705_p12 = pnand %p2703_p11, %p2700_p10 }
  0x6a   :  { %2708 = shalt.err (!%p2705_p12)
}
  0x6b   :  { %s2709_s28 = scalar_lea.vmem %s129_s4, 16  ;;  %s2713_s2 = scalar_lea.vmem %s129_s4, 32 }
  0x6c   :  { %p2710_p13 = scmp.ne.s32.totalorder %s129_s4, %s2709_s28  ;;  %p2714_p0 = scmp.lt.s32.totalorder %s129_s4, %s129_s4 }
  0x6d   :  { %p2715_p1 = scmp.lt.s32.totalorder %s2713_s2, %s2709_s28 }
  0x6f   :  { %p2716_p2 = por %p2715_p1, %p2714_p0 }
  0x71   :  { %p2717_p3 = pnand %p2716_p2, %p2710_p13 }
  0x73   :  { %2720 = shalt.err (!%p2717_p3)
}
  0x74   :  { %131 = dma.hbm_to_vmem [thread:$0]  %s4061_s30, 16, %s129_s4, [#allocation17]  }
  0x75   :  { %s2721_s1 = scalar_lea.hbm %s4018_s9, 256 }
  0x76   :  { %p2722_p4 = scmp.ne.s32.totalorder %s4018_s9, %s2721_s1  ;;  %p2725_p5 = scmp.lt.u32.totalorder %s2721_s1, %s4018_s9 }
  0x78   :  { %p2727_p6 = pnand %p2725_p5, %p2722_p4 }
  0x7a   :  { %2730 = shalt.err (!%p2727_p6)
}
  0x7b   :  { %s2731_s24 = scalar_lea.vmem %s150_s27, 256  ;;  %p2736_p8 = scmp.lt.s32.totalorder %s150_s27, %s150_s27 }
  0x7c   :  { %p2732_p7 = scmp.ne.s32.totalorder %s150_s27, %s2731_s24  ;;  %p2737_p9 = scmp.lt.s32.totalorder %s2731_s24, %s2731_s24 }
  0x7e   :  { %p2738_p10 = por %p2737_p9, %p2736_p8 }
  0x80   :  { %p2739_p11 = pnand %p2738_p10, %p2732_p7 }
  0x82   :  { %2742 = shalt.err (!%p2739_p11)
}
  0x83   :  { %s4062_s4 = smov 64   ;;  %s3218_s28 = smov [#allocation22]  }
  0x84   :  { %155 = dma.hbm_to_vmem [thread:$0]  %s4018_s9, 256, %s150_s27, [#allocation20], %s4062_s4, %s4062_s4, %s3215_s8  }
  0x85   :  { %s171_s2 = sshll.u32 %s3218_s28, 4  ;;  %s3219_s5 = smov [#allocation25]   ;;  %s172_s2 = int_to_ptr.vmem [resolvable:$true] %s171_s2 }
  0x86   :  { %s194_s0 = sshll.u32 %s3219_s5, 4  ;;  %s2743_s1 = scalar_lea.hbm %s4020_s11, 256  ;;  %s195_s0 = int_to_ptr.vmem [resolvable:$true] %s194_s0 }
  0x87   :  { %p2744_p12 = scmp.ne.s32.totalorder %s4020_s11, %s2743_s1  ;;  %p2747_p13 = scmp.lt.u32.totalorder %s2743_s1, %s4020_s11 }
  0x89   :  { %p2749_p0 = pnand %p2747_p13, %p2744_p12 }
  0x8b   :  { %2752 = shalt.err (!%p2749_p0)
}
  0x8c   :  { %s2753_s9 = scalar_lea.vmem %s172_s2, 256  ;;  %p2758_p2 = scmp.lt.s32.totalorder %s172_s2, %s172_s2 }
  0x8d   :  { %p2754_p1 = scmp.ne.s32.totalorder %s172_s2, %s2753_s9  ;;  %p2759_p3 = scmp.lt.s32.totalorder %s2753_s9, %s2753_s9 }
  0x8f   :  { %p2760_p4 = por %p2759_p3, %p2758_p2 }
  0x91   :  { %p2761_p5 = pnand %p2760_p4, %p2754_p1 }
  0x93   :  { %2764 = shalt.err (!%p2761_p5)
}
  0x94   :  { %177 = dma.hbm_to_vmem [thread:$0]  %s4020_s11, 256, %s172_s2, [#allocation23], %s4062_s4, %s4062_s4, %s3215_s8  }
  0x95   :  { %s2765_s28 = scalar_lea.hbm %s4022_s13, 16 }
  0x96   :  { %p2766_p6 = scmp.ne.s32.totalorder %s4022_s13, %s2765_s28  ;;  %p2769_p7 = scmp.lt.u32.totalorder %s2765_s28, %s4022_s13 }
  0x98   :  { %p2771_p8 = pnand %p2769_p7, %p2766_p6 }
  0x9a   :  { %2774 = shalt.err (!%p2771_p8)
}
  0x9b   :  { %s2775_s29 = scalar_lea.vmem %s195_s0, 16  ;;  %s2779_s7 = scalar_lea.vmem %s195_s0, 32 }
  0x9c   :  { %p2776_p9 = scmp.ne.s32.totalorder %s195_s0, %s2775_s29  ;;  %p2780_p10 = scmp.lt.s32.totalorder %s195_s0, %s195_s0 }
  0x9d   :  { %p2781_p11 = scmp.lt.s32.totalorder %s2779_s7, %s2775_s29 }
  0x9f   :  { %p2782_p12 = por %p2781_p11, %p2780_p10 }
  0xa1   :  { %p2783_p13 = pnand %p2782_p12, %p2776_p9 }
  0xa3   :  { %2786 = shalt.err (!%p2783_p13)
}
  0xa4   :  { %197 = dma.hbm_to_vmem [thread:$0]  %s4022_s13, 16, %s195_s0, [#allocation26]  }
  0xa5   :  { %s3220_s3 = smov [#allocation28]   ;;  %s3221_s9 = smov [#allocation31]  }
  0xa6   :  { %s213_s25 = sshll.u32 %s3220_s3, 4  ;;  %s238_s27 = sshll.u32 %s3221_s9, 4  ;;  %s214_s25 = int_to_ptr.vmem [resolvable:$true] %s213_s25  ;;  %s239_s27 = int_to_ptr.vmem [resolvable:$true] %s238_s27 }
  0xa7   :  { %s2787_s26 = scalar_lea.hbm %s4024_s15, 256 }
  0xa8   :  { %p2788_p0 = scmp.ne.s32.totalorder %s4024_s15, %s2787_s26  ;;  %p2791_p1 = scmp.lt.u32.totalorder %s2787_s26, %s4024_s15 }
  0xaa   :  { %p2793_p2 = pnand %p2791_p1, %p2788_p0 }
  0xac   :  { %2796 = shalt.err (!%p2793_p2)
}
  0xad   :  { %s2797_s13 = scalar_lea.vmem %s214_s25, 256  ;;  %p2802_p4 = scmp.lt.s32.totalorder %s214_s25, %s214_s25 }
  0xae   :  { %p2798_p3 = scmp.ne.s32.totalorder %s214_s25, %s2797_s13  ;;  %p2803_p5 = scmp.lt.s32.totalorder %s2797_s13, %s2797_s13 }
  0xb0   :  { %p2804_p6 = por %p2803_p5, %p2802_p4 }
  0xb2   :  { %p2805_p7 = pnand %p2804_p6, %p2798_p3 }
  0xb4   :  { %2808 = shalt.err (!%p2805_p7)
}
  0xb5   :  { %219 = dma.hbm_to_vmem [thread:$0]  %s4024_s15, 256, %s214_s25, [#allocation29], %s4062_s4, %s4062_s4, %s3215_s8  }
  0xb6   :  { %s2809_s11 = scalar_lea.hbm %s4026_s17, 16 }
  0xb7   :  { %p2810_p8 = scmp.ne.s32.totalorder %s4026_s17, %s2809_s11  ;;  %p2813_p9 = scmp.lt.u32.totalorder %s2809_s11, %s4026_s17 }
  0xb9   :  { %p2815_p10 = pnand %p2813_p9, %p2810_p8 }
  0xbb   :  { %2818 = shalt.err (!%p2815_p10)
}
  0xbc   :  { %s2819_s30 = scalar_lea.vmem %s239_s27, 16  ;;  %s2823_s26 = scalar_lea.vmem %s239_s27, 32 }
  0xbd   :  { %p2820_p11 = scmp.ne.s32.totalorder %s239_s27, %s2819_s30  ;;  %p2824_p12 = scmp.lt.s32.totalorder %s239_s27, %s239_s27 }
  0xbe   :  { %p2825_p13 = scmp.lt.s32.totalorder %s2823_s26, %s2819_s30 }
  0xc0   :  { %p2826_p0 = por %p2825_p13, %p2824_p12 }
  0xc2   :  { %p2827_p1 = pnand %p2826_p0, %p2820_p11 }
  0xc4   :  { %2830 = shalt.err (!%p2827_p1)
}
  0xc5   :  { %241 = dma.hbm_to_vmem [thread:$0]  %s4026_s17, 16, %s239_s27, [#allocation32]  }
  0xc6   :  { %s3222_s28 = smov [#allocation4]   ;;  %s3223_s6 = smov [#allocation9]  }
  0xc7   :  { %s49_s5 = sshll.u32 %s3222_s28, 4  ;;  %s72_s20 = sshll.u32 %s3223_s6, 4  ;;  %s50_s5 = int_to_ptr.vmem [resolvable:$true] %s49_s5  ;;  %s73_s20 = int_to_ptr.vmem [resolvable:$true] %s72_s20 }
  0xc8   :  { %s4063_s1 = sld [smem:[#allocation57_spill]] }
  0xce   :  { %s2831_s29 = scalar_lea.hbm %s4063_s1, 128 }
  0xcf   :  { %p2832_p2 = scmp.ne.s32.totalorder %s4063_s1, %s2831_s29  ;;  %p2835_p3 = scmp.lt.u32.totalorder %s2831_s29, %s4063_s1 }
  0xd1   :  { %p2837_p4 = pnand %p2835_p3, %p2832_p2 }
  0xd3   :  { %2840 = shalt.err (!%p2837_p4)
}
  0xd4   :  { %s2841_s17 = scalar_lea.vmem %s50_s5, 128  ;;  %p2846_p6 = scmp.lt.s32.totalorder %s50_s5, %s50_s5 }
  0xd5   :  { %p2842_p5 = scmp.ne.s32.totalorder %s50_s5, %s2841_s17  ;;  %p2847_p7 = scmp.lt.s32.totalorder %s2841_s17, %s2841_s17 }
  0xd7   :  { %p2848_p8 = por %p2847_p7, %p2846_p6 }
  0xd9   :  { %p2849_p9 = pnand %p2848_p8, %p2842_p5 }
  0xdb   :  { %2852 = shalt.err (!%p2849_p9)
}
  0xdc   :  { %55 = dma.hbm_to_vmem [thread:$0]  %s4063_s1, 128, %s50_s5, [#allocation5], %s4062_s4, %s4062_s4, %s3215_s8  }
  0xdd   :  { %s4064_s26 = sld [smem:[#allocation59_spill]] }
  0xe3   :  { %s2853_s15 = scalar_lea.hbm %s4064_s26, 32 }
  0xe4   :  { %p2854_p10 = scmp.ne.s32.totalorder %s4064_s26, %s2853_s15  ;;  %p2857_p11 = scmp.lt.u32.totalorder %s2853_s15, %s4064_s26 }
  0xe6   :  { %p2859_p12 = pnand %p2857_p11, %p2854_p10 }
  0xe8   :  { %2862 = shalt.err (!%p2859_p12)
}
  0xe9   :  { %s2863_s0 = scalar_lea.vmem %s73_s20, 32  ;;  %p2868_p0 = scmp.lt.s32.totalorder %s73_s20, %s73_s20 }
  0xea   :  { %p2864_p13 = scmp.ne.s32.totalorder %s73_s20, %s2863_s0  ;;  %p2869_p1 = scmp.lt.s32.totalorder %s2863_s0, %s2863_s0 }
  0xec   :  { %p2870_p2 = por %p2869_p1, %p2868_p0 }
  0xee   :  { %p2871_p3 = pnand %p2870_p2, %p2864_p13 }
  0xf0   :  { %2874 = shalt.err (!%p2871_p3)
}
  0xf1   :  { %75 = dma.hbm_to_vmem [thread:$0]  %s4064_s26, 32, %s73_s20, [#allocation8]  }
  0xf2   :  { %s3224_s29 = smov [#allocation12]   ;;  %s3225_s11 = smov [#allocation15]  }
  0xf3   :  { %s93_s7 = sshll.u32 %s3224_s29, 4  ;;  %s115_s2 = sshll.u32 %s3225_s11, 4  ;;  %s94_s7 = int_to_ptr.vmem [resolvable:$true] %s93_s7  ;;  %s116_s2 = int_to_ptr.vmem [resolvable:$true] %s115_s2 }
  0xf4   :  { %s4065_s27 = sld [smem:[#allocation61_spill]] }
  0xfa   :  { %s2875_s9 = scalar_lea.hbm %s4065_s27, 256 }
  0xfb   :  { %p2876_p4 = scmp.ne.s32.totalorder %s4065_s27, %s2875_s9  ;;  %p2879_p5 = scmp.lt.u32.totalorder %s2875_s9, %s4065_s27 }
  0xfd   :  { %p2881_p6 = pnand %p2879_p5, %p2876_p4 }
  0xff   :  { %2884 = shalt.err (!%p2881_p6)
}
 0x100   :  { %s2885_s20 = scalar_lea.vmem %s94_s7, 256  ;;  %p2890_p8 = scmp.lt.s32.totalorder %s94_s7, %s94_s7 }
 0x101   :  { %p2886_p7 = scmp.ne.s32.totalorder %s94_s7, %s2885_s20  ;;  %p2891_p9 = scmp.lt.s32.totalorder %s2885_s20, %s2885_s20 }
 0x103   :  { %p2892_p10 = por %p2891_p9, %p2890_p8 }
 0x105   :  { %p2893_p11 = pnand %p2892_p10, %p2886_p7 }
 0x107   :  { %2896 = shalt.err (!%p2893_p11)
}
 0x108   :  { %99 = dma.hbm_to_vmem [thread:$0]  %s4065_s27, 256, %s94_s7, [#allocation11], %s4062_s4, %s4062_s4, %s3215_s8  }
 0x109   :  { %s4066_s0 = sld [smem:[#allocation63_spill]] }
 0x10f   :  { %s2897_s5 = scalar_lea.hbm %s4066_s0, 256 }
 0x110   :  { %p2898_p12 = scmp.ne.s32.totalorder %s4066_s0, %s2897_s5  ;;  %p2901_p13 = scmp.lt.u32.totalorder %s2897_s5, %s4066_s0 }
 0x112   :  { %p2903_p0 = pnand %p2901_p13, %p2898_p12 }
 0x114   :  { %2906 = shalt.err (!%p2903_p0)
}
 0x115   :  { %s2907_s17 = scalar_lea.vmem %s116_s2, 256  ;;  %p2912_p2 = scmp.lt.s32.totalorder %s116_s2, %s116_s2 }
 0x116   :  { %p2908_p1 = scmp.ne.s32.totalorder %s116_s2, %s2907_s17  ;;  %p2913_p3 = scmp.lt.s32.totalorder %s2907_s17, %s2907_s17 }
 0x118   :  { %p2914_p4 = por %p2913_p3, %p2912_p2 }
 0x11a   :  { %p2915_p5 = pnand %p2914_p4, %p2908_p1 }
 0x11c   :  { %2918 = shalt.err (!%p2915_p5)
}
 0x11d   :  { %121 = dma.hbm_to_vmem [thread:$0]  %s4066_s0, 256, %s116_s2, [#allocation14], %s4062_s4, %s4062_s4, %s3215_s8  }
 0x11e   :  { %s3226_s9 = smov [#allocation18]   ;;  %s3227_s30 = smov [#allocation21]  }
 0x11f   :  { %s137_s24 = sshll.u32 %s3226_s9, 4  ;;  %s162_s15 = sshll.u32 %s3227_s30, 4  ;;  %s138_s24 = int_to_ptr.vmem [resolvable:$true] %s137_s24  ;;  %s163_s15 = int_to_ptr.vmem [resolvable:$true] %s162_s15 }
 0x120   :  { %s4067_s26 = sld [smem:[#allocation65_spill]] }
 0x126   :  { %s2919_s28 = scalar_lea.hbm %s4067_s26, 256 }
 0x127   :  { %p2920_p6 = scmp.ne.s32.totalorder %s4067_s26, %s2919_s28  ;;  %p2923_p7 = scmp.lt.u32.totalorder %s2919_s28, %s4067_s26 }
 0x129   :  { %p2925_p8 = pnand %p2923_p7, %p2920_p6 }
 0x12b   :  { %2928 = shalt.err (!%p2925_p8)
}
 0x12c   :  { %s2929_s2 = scalar_lea.vmem %s138_s24, 256  ;;  %p2934_p10 = scmp.lt.s32.totalorder %s138_s24, %s138_s24 }
 0x12d   :  { %p2930_p9 = scmp.ne.s32.totalorder %s138_s24, %s2929_s2  ;;  %p2935_p11 = scmp.lt.s32.totalorder %s2929_s2, %s2929_s2 }
 0x12f   :  { %p2936_p12 = por %p2935_p11, %p2934_p10 }
 0x131   :  { %p2937_p13 = pnand %p2936_p12, %p2930_p9 }
 0x133   :  { %2940 = shalt.err (!%p2937_p13)
}
 0x134   :  { %143 = dma.hbm_to_vmem [thread:$0]  %s4067_s26, 256, %s138_s24, [#allocation17], %s4062_s4, %s4062_s4, %s3215_s8  }
 0x135   :  { %s2941_s17 = scalar_lea.hbm %s4019_s10, 16 }
 0x136   :  { %p2942_p0 = scmp.ne.s32.totalorder %s4019_s10, %s2941_s17  ;;  %p2945_p1 = scmp.lt.u32.totalorder %s2941_s17, %s4019_s10 }
 0x138   :  { %p2947_p2 = pnand %p2945_p1, %p2942_p0 }
 0x13a   :  { %2950 = shalt.err (!%p2947_p2)
}
 0x13b   :  { %s2951_s25 = scalar_lea.vmem %s163_s15, 16  ;;  %s2955_s20 = scalar_lea.vmem %s163_s15, 32 }
 0x13c   :  { %p2952_p3 = scmp.ne.s32.totalorder %s163_s15, %s2951_s25  ;;  %p2956_p4 = scmp.lt.s32.totalorder %s163_s15, %s163_s15 }
 0x13d   :  { %p2957_p5 = scmp.lt.s32.totalorder %s2955_s20, %s2951_s25 }
 0x13f   :  { %p2958_p6 = por %p2957_p5, %p2956_p4 }
 0x141   :  { %p2959_p7 = pnand %p2958_p6, %p2952_p3 }
 0x143   :  { %2962 = shalt.err (!%p2959_p7)
}
 0x144   :  { %165 = dma.hbm_to_vmem [thread:$0]  %s4019_s10, 16, %s163_s15, [#allocation20]  }
 0x145   :  { %s3228_s28 = smov [#allocation24]   ;;  %s3229_s13 = smov [#allocation27]  }
 0x146   :  { %s184_s6 = sshll.u32 %s3228_s28, 4  ;;  %s204_s5 = sshll.u32 %s3229_s13, 4  ;;  %s185_s6 = int_to_ptr.vmem [resolvable:$true] %s184_s6  ;;  %s205_s5 = int_to_ptr.vmem [resolvable:$true] %s204_s5 }
 0x147   :  { %s2963_s0 = scalar_lea.hbm %s4021_s12, 16 }
 0x148   :  { %p2964_p8 = scmp.ne.s32.totalorder %s4021_s12, %s2963_s0  ;;  %p2967_p9 = scmp.lt.u32.totalorder %s2963_s0, %s4021_s12 }
 0x14a   :  { %p2969_p10 = pnand %p2967_p9, %p2964_p8 }
 0x14c   :  { %2972 = shalt.err (!%p2969_p10)
}
 0x14d   :  { %s2973_s10 = scalar_lea.vmem %s185_s6, 16  ;;  %s2977_s15 = scalar_lea.vmem %s185_s6, 32 }
 0x14e   :  { %p2974_p11 = scmp.ne.s32.totalorder %s185_s6, %s2973_s10  ;;  %p2978_p12 = scmp.lt.s32.totalorder %s185_s6, %s185_s6 }
 0x14f   :  { %p2979_p13 = scmp.lt.s32.totalorder %s2977_s15, %s2973_s10 }
 0x151   :  { %p2980_p0 = por %p2979_p13, %p2978_p12 }
 0x153   :  { %p2981_p1 = pnand %p2980_p0, %p2974_p11 }
 0x155   :  { %2984 = shalt.err (!%p2981_p1)
}
 0x156   :  { %187 = dma.hbm_to_vmem [thread:$0]  %s4021_s12, 16, %s185_s6, [#allocation23]  }
 0x157   :  { %s2985_s25 = scalar_lea.hbm %s4023_s14, 16 }
 0x158   :  { %p2986_p2 = scmp.ne.s32.totalorder %s4023_s14, %s2985_s25  ;;  %p2989_p3 = scmp.lt.u32.totalorder %s2985_s25, %s4023_s14 }
 0x15a   :  { %p2991_p4 = pnand %p2989_p3, %p2986_p2 }
 0x15c   :  { %2994 = shalt.err (!%p2991_p4)
}
 0x15d   :  { %s2995_s13 = scalar_lea.vmem %s205_s5, 16  ;;  %s2999_s1 = scalar_lea.vmem %s205_s5, 32 }
 0x15e   :  { %p2996_p5 = scmp.ne.s32.totalorder %s205_s5, %s2995_s13  ;;  %p3000_p6 = scmp.lt.s32.totalorder %s205_s5, %s205_s5 }
 0x15f   :  { %p3001_p7 = scmp.lt.s32.totalorder %s2999_s1, %s2995_s13 }
 0x161   :  { %p3002_p8 = por %p3001_p7, %p3000_p6 }
 0x163   :  { %p3003_p9 = pnand %p3002_p8, %p2996_p5 }
 0x165   :  { %3006 = shalt.err (!%p3003_p9)
}
 0x166   :  { %207 = dma.hbm_to_vmem [thread:$0]  %s4023_s14, 16, %s205_s5, [#allocation26]  }
 0x167   :  { %s3230_s2 = smov [#allocation30]   ;;  %s3231_s29 = smov [#allocation33]  }
 0x168   :  { %s225_s0 = sshll.u32 %s3230_s2, 4  ;;  %s247_s11 = sshll.u32 %s3231_s29, 4  ;;  %s226_s0 = int_to_ptr.vmem [resolvable:$true] %s225_s0  ;;  %s248_s11 = int_to_ptr.vmem [resolvable:$true] %s247_s11 }
 0x169   :  { %s3007_s10 = scalar_lea.hbm %s4025_s16, 256 }
 0x16a   :  { %p3008_p10 = scmp.ne.s32.totalorder %s4025_s16, %s3007_s10  ;;  %p3011_p11 = scmp.lt.u32.totalorder %s3007_s10, %s4025_s16 }
 0x16c   :  { %p3013_p12 = pnand %p3011_p11, %p3008_p10 }
 0x16e   :  { %3016 = shalt.err (!%p3013_p12)
}
 0x16f   :  { %s3017_s14 = scalar_lea.vmem %s226_s0, 256  ;;  %p3022_p0 = scmp.lt.s32.totalorder %s226_s0, %s226_s0 }
 0x170   :  { %p3018_p13 = scmp.ne.s32.totalorder %s226_s0, %s3017_s14  ;;  %p3023_p1 = scmp.lt.s32.totalorder %s3017_s14, %s3017_s14 }
 0x172   :  { %p3024_p2 = por %p3023_p1, %p3022_p0 }
 0x174   :  { %p3025_p3 = pnand %p3024_p2, %p3018_p13 }
 0x176   :  { %3028 = shalt.err (!%p3025_p3)
}
 0x177   :  { %231 = dma.hbm_to_vmem [thread:$0]  %s4025_s16, 256, %s226_s0, [#allocation29], %s4062_s4, %s4062_s4, %s3215_s8  }
 0x178   :  { %s3029_s24 = scalar_lea.hbm %s4027_s18, 256 }
 0x179   :  { %p3030_p4 = scmp.ne.s32.totalorder %s4027_s18, %s3029_s24  ;;  %p3033_p5 = scmp.lt.u32.totalorder %s3029_s24, %s4027_s18 }
 0x17b   :  { %p3035_p6 = pnand %p3033_p5, %p3030_p4 }
 0x17d   :  { %3038 = shalt.err (!%p3035_p6)
}
 0x17e   :  { %s3039_s12 = scalar_lea.vmem %s248_s11, 256  ;;  %p3044_p8 = scmp.lt.s32.totalorder %s248_s11, %s248_s11 }
 0x17f   :  { %p3040_p7 = scmp.ne.s32.totalorder %s248_s11, %s3039_s12  ;;  %p3045_p9 = scmp.lt.s32.totalorder %s3039_s12, %s3039_s12 }
 0x181   :  { %p3046_p10 = por %p3045_p9, %p3044_p8 }
 0x183   :  { %p3047_p11 = pnand %p3046_p10, %p3040_p7 }
 0x185   :  { %3050 = shalt.err (!%p3047_p11)
}
 0x186   :  { %253 = dma.hbm_to_vmem [thread:$0]  %s4027_s18, 256, %s248_s11, [#allocation32], %s4062_s4, %s4062_s4, %s3215_s8  }
 0x187   :  { %s3232_s2 = smov [#allocation34]   ;;  %s3051_s17 = scalar_lea.hbm %s4028_s19, 16 }
 0x188   :  { %s260_s0 = sshll.u32 %s3232_s2, 4  ;;  %p3052_p12 = scmp.ne.s32.totalorder %s4028_s19, %s3051_s17  ;;  %s261_s0 = int_to_ptr.vmem [resolvable:$true] %s260_s0 }
 0x189   :  { %p3055_p13 = scmp.lt.u32.totalorder %s3051_s17, %s4028_s19 }
 0x18b   :  { %p3057_p0 = pnand %p3055_p13, %p3052_p12 }
 0x18d   :  { %3060 = shalt.err (!%p3057_p0)
}
 0x18e   :  { %s3061_s9 = scalar_lea.vmem %s261_s0, 16  ;;  %s3065_s18 = scalar_lea.vmem %s261_s0, 32 }
 0x18f   :  { %p3062_p1 = scmp.ne.s32.totalorder %s261_s0, %s3061_s9  ;;  %p3066_p2 = scmp.lt.s32.totalorder %s261_s0, %s261_s0 }
 0x190   :  { %p3067_p3 = scmp.lt.s32.totalorder %s3065_s18, %s3061_s9 }
 0x192   :  { %p3068_p4 = por %p3067_p3, %p3066_p2 }
 0x194   :  { %p3069_p5 = pnand %p3068_p4, %p3062_p1 }
 0x196   :  { %3072 = shalt.err (!%p3069_p5)
}
 0x197   :  { %263 = dma.hbm_to_vmem [thread:$0]  %s4028_s19, 16, %s261_s0, [#allocation35]  }
 0x198   :  { %3183 = dma.done.wait [#allocation5], 128  }
 0x199   :  { %3184 = vsyncadd [#allocation5], 4294967168 }
 0x19a   :  { %3185 = dma.done.wait [#allocation8], 48  }
 0x19b   :  { %3186 = vsyncadd [#allocation8], 4294967248 }
 0x19c   :  { %3187 = dma.done.wait [#allocation11], 512  }
 0x19d   :  { %3188 = vsyncadd [#allocation11], 4294966784 }
 0x19e   :  { %3189 = dma.done.wait [#allocation14], 272  }
 0x19f   :  { %3190 = vsyncadd [#allocation14], 4294967024 }
 0x1a0   :  { %3191 = dma.done.wait [#allocation17], 272  }
 0x1a1   :  { %3192 = vsyncadd [#allocation17], 4294967024 }
 0x1a2   :  { %3193 = dma.done.wait [#allocation20], 272  }
 0x1a3   :  { %3194 = vsyncadd [#allocation20], 4294967024 }
 0x1a4   :  { %3195 = dma.done.wait [#allocation23], 272  }
 0x1a5   :  { %3196 = vsyncadd [#allocation23], 4294967024 }
 0x1a6   :  { %3197 = dma.done.wait [#allocation26], 32  }
 0x1a7   :  { %3198 = vsyncadd [#allocation26], 4294967264 }
 0x1a8   :  { %3199 = dma.done.wait [#allocation29], 512  }
 0x1a9   :  { %3200 = vsyncadd [#allocation29], 4294966784 }
 0x1aa   :  { %3201 = dma.done.wait [#allocation32], 272  }
 0x1ab   :  { %3202 = vsyncadd [#allocation32], 4294967024 }
 0x1ac   :  { %3203 = dma.done.wait [#allocation35], 16  }
 0x1ad   :  { %3204 = vsyncadd [#allocation35], 4294967280  ;;  %v3233_v0 = vmov 0.0   ;;  %vm3234_vm0 = vmmov 0   ;;  %v2560_v1 = vld [vmem:[#allocation12] sm:$0xff]   ;;  %v2561_v2 = vld [vmem:[#allocation10] sm:$0xff]   ;;  %v467_v11 = vlaneseq }
 0x1ae   :  { %2355 = vmatprep.subr.bf16.mxu1 %v3233_v0  ;;  %2347 = vmatprep.subr.bf16.mxu0 %v3233_v0  ;;  %v2562_v3 = vld [vmem:[#allocation12 + $0x8] sm:$0xff]   ;;  %v2563_v4 = vld [vmem:[#allocation10 + $0x8] sm:$0xff]   ;;  %vm352_vm1 = vcmask 261120   ;;  %v3235_v9 = vmov 1966171168   ;;  %s3236_s19 = smov 96  }
 0x1af   :  { %2359 = vmatprep.mubr.msk.bf16.mxu1 %vm3234_vm0, %v3233_v0  ;;  %2351 = vmatprep.mubr.msk.bf16.mxu0 %vm3234_vm0, %v3233_v0  ;;  %v3659_v5 = vld [vmem:[#allocation7] sm:$0x1]  ;;  %v3661_v6 = vld [vmem:[#allocation4] sm:$0xff]   ;;  %v2565_v7 = vld [vmem:[#allocation15] sm:$0xff]   ;;  %v465_v10 = vunpack.c.l.s4 %v3235_v9  ;;  %v3675_v13 = vshrl.u32 %v467_v11, 7  ;;  %vm788_vm2 = vcmask 64512  }
 0x1b0   :  { %2356 = vmatpush3.bf16.msra.mxu1 %v2560_v1  ;;  %2348 = vmatpush3.bf16.msra.mxu0 %v2561_v2  ;;  %v2566_v8 = vld [vmem:[#allocation15 + $0x8] sm:$0xff]   ;;  %v2234_v36 = vld [vmem:[#allocation16] ss:$0 sm:$0xff]  ;;  %v2238_v45 = vld [vmem:[#allocation13] ss:$0 sm:$0xff]  ;;  %789 = vst.msk [vmem:[#allocation39] sm:$0xff] %vm788_vm2, %v3233_v0 }
 0x1b1   :  { %2357 = vmatprep.subr.bf16.mxu1 %v3233_v0  ;;  %2349 = vmatprep.subr.bf16.mxu0 %v3233_v0  ;;  %v466_v12 = vunpack.c.0.s8 %v465_v10  ;;  %v3682_v19 = vsub.s32 0, %v3675_v13  ;;  %790 = vst.msk [vmem:[#allocation39 + $0x8] sm:$0xff] %vm788_vm2, %v3233_v0  ;;  %v591_v52 = vand.u32 127, %v467_v11  ;;  %v3699_v55 = vld [vmem:[#allocation9] sm:$0x3]  ;;  %vm600_vm3 = vcmask 1041409  }
 0x1b2   :  { %vm587_vm4 = vcmp.eq.f32.partialorder %v3699_v55, 0.0  ;;  %vm402_vm5 = vcmask 785408   ;;  %vm604_vm6 = vcmask 58368   ;;  %v2568_v9 = vld [vmem:[#allocation19] sm:$0xff]   ;;  %v2569_v11 = vld [vmem:[#allocation19 + $0x8] sm:$0xff]   ;;  %s3238_s14 = smov 88  }
 0x1b3   :  { %v3678_v14 = vsub.s32 %v466_v12, %v3675_v13  ;;  %v594_v54 = vsub.s32 %v591_v52, %v3675_v13  ;;  %s3239_s5 = smov 120   ;;  %vm2137_vm11 = vcmask 254976   ;;  %vm973_vm12 = vcmask 1043456   ;;  %s3241_s30 = smov 80  }
 0x1b4   :  { %2358 = vmatpush3.bf16.msra.mxu1 %v2562_v3  ;;  %2350 = vmatpush3.bf16.msra.mxu0 %v2563_v4  ;;  %s3242_s25 = smov 112   ;;  %s3243_s20 = smov 48   ;;  %vm1310_vm13 = vcmask 130112   ;;  %vm1555_vm14 = vcmask 195712   ;;  %vm1800_vm15 = vcmask 261312  }
 0x1b5   :  { %2371 = vmatprep.subr.bf16.mxu1 %v3233_v0  ;;  %2363 = vmatprep.subr.bf16.mxu0 %v3233_v0  ;;  %s3244_s24 = smov 72   ;;  %s3245_s26 = smov 104  }
 0x1b6   :  { %s3246_s28 = smov 40   ;;  %s3247_s13 = smov 8  }
 0x1b7   :  { %2360 = vmatmul.mubr.msk.bf16.vlgmr.msra.gmra.mrb[0].mxu1 %vm352_vm1, %v3659_v5  ;;  %2352 = vmatmul.mubr.msk.bf16.vlgmr.msra.gmra.mrb[0].mxu0 %vm352_vm1, %v3661_v6  ;;  %s3248_s1 = smov 16   ;;  %s3249_s12 = smov 24  }
 0x1b8   :  { %2375 = vmatprep.mubr.msk.bf16.mxu1 %vm3234_vm0, %v3233_v0  ;;  %2367 = vmatprep.mubr.msk.bf16.mxu0 %vm3234_vm0, %v3233_v0  ;;  %s3250_s16 = smov [#allocation37]   ;;  %s3251_s2 = smov [#allocation40]  }
 0x1b9   :  { %2364 = vmatpush3.bf16.msra.mxu0 %v2565_v7  ;;  %2372 = vmatpush3.bf16.msra.mxu1 %v2568_v9  ;;  %s2162_s6 = sshll.u32 %s3250_s16, 4  ;;  %s2184_s0 = sshll.u32 %s3251_s2, 4  ;;  %s2163_s6 = int_to_ptr.vmem [resolvable:$true] %s2162_s6  ;;  %s2185_s0 = int_to_ptr.vmem [resolvable:$true] %s2184_s0 }
 0x1ba   :  { %2365 = vmatprep.subr.bf16.mxu0 %v3233_v0  ;;  %2373 = vmatprep.subr.bf16.mxu1 %v3233_v0  ;;  %s3073_s29 = scalar_lea.vmem %s2163_s6, 32  ;;  %p3078_p7 = scmp.lt.s32.totalorder %s2163_s6, %s2163_s6 }
 0x1bb   :  { %p3074_p6 = scmp.ne.s32.totalorder %s2163_s6, %s3073_s29  ;;  %p3079_p8 = scmp.lt.s32.totalorder %s3073_s29, %s3073_s29 }
 0x1bd   :  { %2366 = vmatpush3.bf16.msra.mxu0 %v2566_v8  ;;  %2374 = vmatpush3.bf16.msra.mxu1 %v2569_v11  ;;  %p3080_p9 = por %p3079_p8, %p3078_p7 }
 0x1be   :  { %2379 = vmatprep.subr.bf16.mxu0 %v3233_v0  ;;  %2387 = vmatprep.subr.bf16.mxu1 %v3233_v0 }
 0x1bf   :  { %p3081_p10 = pnand %p3080_p9, %p3074_p6 }
 0x1c0   :  { %2376 = vmatmul.mubr.msk.bf16.vlgmr.msra.gmra.mrb[4].mxu1 %vm352_vm1, %v3659_v5 }
 0x1c1   :  { %2389 = vmatprep.mubr.msk.bf16.mxu1 %vm3234_vm0, %v3233_v0 }
 0x28a   :  { %v457_v15 = vpop.f32.mrb[0].mxu1  ;;  %v390_v18 = vpop.f32.mrb[0].mxu0 }
 0x28b   :  { %v470_v16 = vrot.slane %v457_v15, %v3678_v14  ;;  %v2361_v17 = vpop.f32.mrb[1].mxu1  ;;  %v2353_v21 = vpop.f32.mrb[1].mxu0 }
 0x28c   :  { %v460_v20 = vpop.f32.mrb[2].mxu1  ;;  %v393_v25 = vpop.f32.mrb[2].mxu0  ;;  %v625_v17 = vsub.s32 1, %v3675_v13  ;;  %v2571_v21 = vld [vmem:[#allocation18 + $0x8] sm:$0xff]  }
 0x28d   :  { %v471_v22 = vcombine.high %v470_v16, %v470_v16  ;;  %v478_v23 = vrot.slane %v470_v16, %v3678_v14  ;;  %v2362_v24 = vpop.f32.mrb[3].mxu1  ;;  %v397_v26 = vpack.c.bf16 %v393_v25, %v390_v18  ;;  %v2354_v27 = vpop.f32.mrb[3].mxu0 }
 0x28e   :  { %v328_v24 = vunpack.c.h.bf16 %v3661_v6 }
 0x28f   :  { %v485_v28 = vrot.slane %v471_v22, %v3678_v14  ;;  %v489_v29 = vrot.slane %v478_v23, %v3682_v19  ;;  %v327_v22 = vunpack.c.l.bf16 %v3661_v6 }
 0x291   :  { %v496_v30 = vadd.f32 %v489_v29, %v390_v18  ;;  %v493_v31 = vrot.slane %v485_v28, %v3682_v19  ;;  %v2570_v18 = vld [vmem:[#allocation18] sm:$0xff]  }
 0x293   :  { %v497_v32 = vadd.f32 %v493_v31, %v393_v25  ;;  %2581 = vtanh.f32 %v496_v30  ;;  %v702_v52 = vpop.f32.mrb[4].mxu1 }
 0x295   :  { %2583 = vtanh.f32 %v497_v32 }
 0x29d   :  { %v2582_v33 = vpop.eup %2581 }
 0x29f   :  { %v2584_v34 = vpop.eup %2583 }
 0x2a0   :  { %v500_v35 = vpack.c.bf16 %v2584_v34, %v2582_v33 }
 0x2a2   :  { %2368 = vmatmul.mubr.msk.bf16.vlgmr.msra.gmra.mrb[4].mxu0 %vm352_vm1, %v500_v35 }
 0x2a3   :  { %2383 = vmatprep.mubr.msk.bf16.mxu0 %vm3234_vm0, %v3233_v0  ;;  %2380 = vmatpush3.bf16.msra.mxu0 %v2570_v18 }
 0x2a4   :  { %2381 = vmatprep.subr.bf16.mxu0 %v3233_v0 }
 0x2a7   :  { %2382 = vmatpush3.bf16.msra.mxu0 %v2571_v21 }
 0x2a8   :  { %2393 = vmatprep.subr.bf16.mxu0 %v3233_v0 }
 0x375   :  { %v561_v37 = vpop.f32.mrb[4].mxu0 }
 0x376   :  { %v562_v38 = vadd.f32 %v2234_v36, %v561_v37  ;;  %v2369_v39 = vpop.f32.mrb[5].mxu0 }
 0x377   :  { %v564_v40 = vpop.f32.mrb[6].mxu0 }
 0x378   :  { %v568_v41 = vadd.f32 %v2582_v33, %v562_v38  ;;  %v565_v42 = vadd.f32 %v2234_v36, %v564_v40  ;;  %v2370_v43 = vpop.f32.mrb[7].mxu0 }
 0x37a   :  { %2585 = vtanh.f32 %v568_v41  ;;  %v569_v44 = vadd.f32 %v2584_v34, %v565_v42 }
 0x37c   :  { %2587 = vtanh.f32 %v569_v44 }
 0x384   :  { %v2586_v46 = vpop.eup %2585 }
 0x385   :  { %v579_v47 = vmul.f32 %v2586_v46, %v2238_v45 }
 0x386   :  { %v2588_v48 = vpop.eup %2587 }
 0x387   :  { %v581_v49 = vsel %vm352_vm1, %v579_v47, 0.0  ;;  %v580_v50 = vmul.f32 %v2588_v48, %v2238_v45 }
 0x388   :  { %582 = vadd.xlane.f32.xlu0 %v581_v49 }
 0x389   :  { %v584_v51 = vsel %vm352_vm1, %v580_v50, 0.0 }
 0x38c   :  { %585 = vadd.xlane.f32.xlu0 %v584_v51 }
 0x3a2   :  { %399 = vrot.lane.b32.xlu0 %v397_v26, %s3236_s19 }
 0x415   :  { %v583_v53 = vpop.xlane.xlu0 %582 }
 0x416   :  { %v595_v57 = vrot.slane %v583_v53, %v594_v54  ;;  %v2377_v53 = vpop.f32.mrb[5].mxu1 }
 0x419   :  { %v586_v56 = vpop.xlane.xlu0 %585 }
 0x41a   :  { %v599_v58 = vrot.slane %v586_v56, %v594_v54  ;;  %v705_v54 = vpop.f32.mrb[6].mxu1 }
 0x41b   :  { %v2378_v56 = vpop.f32.mrb[7].mxu1 }
 0x41c   :  { %v601_v59 = vsel %vm600_vm3, %v599_v58, %v595_v57  ;;  %v902_v57 = vrot.slane %v3699_v55, %v3678_v14 }
 0x41d   :  { %v400_v60 = vpop.permute.xlu0 %399  ;;  %v603_v61 = vsel %vm587_vm4, -1e+09, %v601_v59  ;;  %v3237_v59 = vmov 0  }
 0x41e   :  { %403 = vst.msk [vmem:[#allocation2] sm:$0xff] %vm402_vm5, %v400_v60  ;;  %v605_v62 = vsel %vm604_vm6, %v603_v61, -inf  ;;  %v910_v58 = vrot.slane %v902_v57, %v3678_v14 }
 0x41f   :  { %606 = vmax.xlane.f32.xlu1 %v605_v62  ;;  %v903_v62 = vcombine.high %v902_v57, %v902_v57 }
 0x420   :  { %vm920_vm7 = vcmp.eq.f32.partialorder %v910_v58, 0.0 }
 0x421   :  { %v922_v60 = vsel %vm920_vm7, 1, %v3237_v59  ;;  %v917_v9 = vrot.slane %v903_v62, %v3678_v14 }
 0x423   :  { %vm921_vm9 = vcmp.eq.f32.partialorder %v917_v9, 0.0 }
 0x425   :  { %v791_v63 = vld [vmem:[#allocation2] sm:$0xff] }
 0x426   :  { %v3704_v1 = vcombine.high %v791_v63, %v791_v63  ;;  %v3720_v5 = vcombine.low %v791_v63, %v791_v63 }
 0x428   :  { %845 = vrot.lane.b32.xlu0 %v3704_v1, %s3236_s19 }
 0x49a   :  { %v846_v48 = vpop.permute.xlu0 %845 }
 0x49b   :  { %v851_v51 = vsel %vm788_vm2, %v846_v48, 0 }
 0x4ac   :  { %v607_v2 = vpop.xlane.xlu1 %606 }
 0x4ad   :  { %v608_v3 = vsub.f32 %v603_v61, %v607_v2  ;;  %v927_v61 = vrot.slane %v922_v60, %v3682_v19 }
 0x4af   :  { %v609_v4 = vmul.f32 1.442695, %v608_v3  ;;  %vm3755_vm8 = vcmp.eq.s32.totalorder %v927_v61, 1 }
 0x4b1   :  { %2589 = vpow2.f32 %v609_v4 }
 0x4bb   :  { %v2590_v7 = vpop.eup %2589 }
 0x4bc   :  { %v611_v8 = vsel %vm604_vm6, %v2590_v7, 0.0 }
 0x4bd   :  { %612 = vadd.xlane.f32.xlu1 %v611_v8 }
 0x54a   :  { %v613_v10 = vpop.xlane.xlu1 %612 }
 0x54b   :  { %2591 = vrcp.f32 %v613_v10 }
 0x555   :  { %v2592_v12 = vpop.eup %2591 }
 0x556   :  { %v615_v15 = vmul.f32 %v2592_v12, %v2590_v7  ;;  %v2245_v12 = vld [vmem:[#allocation21] ss:$0 sm:$0xff] }
 0x558   :  { %v619_v16 = vrot.slane %v615_v15, %v3682_v19  ;;  %2139 = vst.msk [vmem:[#allocation37] sm:$0x3] %vm604_vm6, %v615_v15  ;;  %v626_v20 = vrot.slane %v615_v15, %v625_v17  ;;  %v923_v17 = vsel %vm921_vm9, 1, %v3237_v59 }
 0x55a   :  { %621 = vbcast.lane.b32.xlu1 %v619_v16, 256 }
 0x55e   :  { %628 = vbcast.lane.b32.xlu1 %v626_v20, 256 }
 0x562   :  { %797 = vrot.lane.b32.xlu1 %v3720_v5, %s3236_s19 }
 0x5cc   :  { %v622_v23 = vpop.permute.xlu1 %621 }
 0x5cd   :  { %v630_v13 = vmul.f32 %v622_v23, %v327_v22  ;;  %v931_v23 = vrot.slane %v923_v17, %v3682_v19 }
 0x5cf   :  { %v632_v25 = vsel %vm352_vm1, %v630_v13, 0.0  ;;  %vm3764_vm10 = vcmp.eq.s32.totalorder %v931_v23, 1 }
 0x5d0   :  { %v633_v26 = vrot.slane %v632_v25, 4  ;;  %v629_v27 = vpop.permute.xlu1 %628 }
 0x5d1   :  { %v631_v28 = vmul.f32 %v629_v27, %v328_v24 }
 0x5d2   :  { %v634_v29 = vadd.f32 %v633_v26, %v632_v25 }
 0x5d3   :  { %v639_v30 = vsel %vm352_vm1, %v631_v28, 0.0 }
 0x5d4   :  { %v635_v31 = vrot.slane %v634_v29, 2  ;;  %v640_v32 = vrot.slane %v639_v30, 4  ;;  %v798_v33 = vpop.permute.xlu1 %797 }
 0x5d5   :  { %v803_v34 = vsel %vm788_vm2, %v798_v33, 0 }
 0x5d6   :  { %v636_v35 = vadd.f32 %v635_v31, %v634_v29  ;;  %v641_v36 = vadd.f32 %v640_v32, %v639_v30  ;;  %2388 = vmatpush3.bf16.xpose.msra.mxu1 %v803_v34 }
 0x5d7   :  { %2399 = vmatprep.subr.bf16.mxu1 %v3233_v0 }
 0x5d8   :  { %v637_v37 = vrot.slane %v636_v35, 1  ;;  %v642_v38 = vrot.slane %v641_v36, 2 }
 0x5da   :  { %v638_v39 = vadd.f32 %v637_v37, %v636_v35  ;;  %v643_v40 = vadd.f32 %v642_v38, %v641_v36 }
 0x5dc   :  { %v644_v41 = vrot.slane %v643_v40, 1  ;;  %v646_v42 = vpack.c.bf16 %v638_v39, %v638_v39 }
 0x5dd   :  { %2390 = vmatmul.mubr.msk.bf16.vlgmr.msra.gmra.mrb[8].mxu1 %vm788_vm2, %v3720_v5 }
 0x5de   :  { %v645_v43 = vadd.f32 %v644_v41, %v643_v40  ;;  %2401 = vmatprep.mubr.msk.bf16.mxu1 %vm3234_vm0, %v3233_v0  ;;  %v710_v46 = vunpack.c.l.b16 %v646_v42 }
 0x5e0   :  { %v647_v44 = vpack.c.bf16 %v645_v43, %v645_v43  ;;  %v3739_v45 = vsel %vm600_vm3, %v645_v43, %v638_v39 }
 0x5e2   :  { %v711_v47 = vunpack.c.l.b16 %v647_v44 }
 0x5e4   :  { %v712_v49 = vsel %vm600_vm3, %v711_v47, %v710_v46 }
 0x5e5   :  { %v713_v50 = vpack.c.b16 %v712_v49, %v712_v49 }
 0x5e7   :  { %2384 = vmatmul.mubr.msk.bf16.vlgmr.msra.gmra.mrb[8].mxu0 %vm352_vm1, %v713_v50 }
 0x5e8   :  { %2394 = vmatpush3.bf16.xpose.msra.mxu0 %v851_v51  ;;  %2395 = vmatprep.mubr.msk.bf16.mxu0 %vm3234_vm0, %v3233_v0  ;;  %v958_v51 = vld [vmem:[#allocation39] sm:$0xff] }
 0x5e9   :  { %2405 = vmatprep.subr.bf16.mxu0 %v3233_v0 }
 0x5ef   :  { %2396 = vmatmul.mubr.msk.bf16.vlgmr.msra.gmra.mrb[12].mxu0 %vm788_vm2, %v3704_v1 }
 0x5f0   :  { %2407 = vmatprep.mubr.msk.bf16.mxu0 %vm3234_vm0, %v3233_v0 }
 0x6b0   :  { %v839_v63 = vpop.f32.mrb[8].mxu1 }
 0x6b1   :  { %v893_v3 = vmul.f32 0.35355338, %v839_v63  ;;  %v2391_v4 = vpop.f32.mrb[9].mxu1 }
 0x6b2   :  { %v842_v7 = vpop.f32.mrb[10].mxu1 }
 0x6b3   :  { %v2392_v8 = vpop.f32.mrb[11].mxu1  ;;  %v934_v55 = vsel %vm3755_vm8, -1e+09, %v893_v3  ;;  %v959_v3 = vld [vmem:[#allocation39 + $0x8] sm:$0xff] }
 0x6b4   :  { %v936_v10 = vsel %vm788_vm2, %v934_v55, -inf }
 0x6b5   :  { %937 = vmax.xlane.f32.xlu1 %v936_v10 }
 0x6ba   :  { %v763_v11 = vpop.f32.mrb[8].mxu0 }
 0x6bb   :  { %v764_v15 = vadd.f32 %v763_v11, %v702_v52  ;;  %v2385_v16 = vpop.f32.mrb[9].mxu0 }
 0x6bc   :  { %v766_v18 = vpop.f32.mrb[10].mxu0 }
 0x6bd   :  { %v776_v20 = vadd.f32 %v2245_v12, %v764_v15  ;;  %v2386_v21 = vpop.f32.mrb[11].mxu0 }
 0x6bf   :  { %v2246_v13 = vmul.f32 -1.442695, %v776_v20 }
 0x6c1   :  { %2593 = vpow2.f32 %v2246_v13 }
 0x6c2   :  { %v887_v25 = vpop.f32.mrb[12].mxu0 }
 0x6c3   :  { %v894_v14 = vmul.f32 0.35355338, %v887_v25  ;;  %v2397_v27 = vpop.f32.mrb[13].mxu0 }
 0x6c4   :  { %v890_v28 = vpop.f32.mrb[14].mxu0 }
 0x6c5   :  { %v2398_v29 = vpop.f32.mrb[15].mxu0  ;;  %v935_v30 = vsel %vm3764_vm10, -1e+09, %v894_v14 }
 0x6c6   :  { %968 = vrot.lane.b32.xlu1 %v3720_v5, %s4062_s4  ;;  %v939_v31 = vsel %vm788_vm2, %v935_v30, -inf }
 0x6c7   :  { %940 = vmax.xlane.f32.xlu0 %v939_v31 }
 0x6ca   :  { %1074 = vrot.lane.b32.xlu1 %v3720_v5, %s3238_s14 }
 0x6cb   :  { %v2594_v19 = vpop.eup %2593 }
 0x6cc   :  { %v780_v32 = vadd.f32 1.0, %v2594_v19 }
 0x6ce   :  { %2595 = vrcp.f32 %v780_v32  ;;  %1125 = vrot.lane.b32.xlu1 %v3704_v1, %s3238_s14 }
 0x6d2   :  { %1072 = vrot.lane.b32.xlu1 %v3720_v5, %s3239_s5 }
 0x6d8   :  { %v2596_v33 = vpop.eup %2595 }
 0x6d9   :  { %v3777_v34 = vmul.f32 %v2596_v33, %v3739_v45 }
 0x6db   :  { %2140 = vst.msk [vmem:[#allocation40] sm:$0x3] %vm2137_vm11, %v3777_v34 }
 0x742   :  { %v938_v35 = vpop.xlane.xlu1 %937 }
 0x743   :  { %v942_v36 = vsub.f32 %v934_v55, %v938_v35 }
 0x745   :  { %v944_v37 = vmul.f32 1.442695, %v942_v36 }
 0x746   :  { %v969_v38 = vpop.permute.xlu1 %968 }
 0x747   :  { %2597 = vpow2.f32 %v944_v37  ;;  %v975_v39 = vsel %vm973_vm12, %v969_v38, 0 }
 0x748   :  { %2400 = vmatpush3.bf16.msra.mxu1 %v975_v39 }
 0x749   :  { %2411 = vmatprep.subr.bf16.mxu1 %v3233_v0 }
 0x74a   :  { %v1075_v49 = vpop.permute.xlu1 %1074 }
 0x74b   :  { %v1080_v54 = vsel %vm788_vm2, %v1075_v49, 0 }
 0x74e   :  { %v1126_v57 = vpop.permute.xlu1 %1125 }
 0x74f   :  { %v1131_v8 = vsel %vm788_vm2, %v1126_v57, 0 }
 0x751   :  { %v2598_v40 = vpop.eup %2597 }
 0x752   :  { %v948_v41 = vsel %vm788_vm2, %v2598_v40, 0.0  ;;  %v1073_v60 = vpop.permute.xlu1 %1072 }
 0x753   :  { %949 = vadd.xlane.f32.xlu0 %v948_v41 }
 0x754   :  { %v941_v42 = vpop.xlane.xlu0 %940 }
 0x755   :  { %v943_v43 = vsub.f32 %v935_v30, %v941_v42 }
 0x757   :  { %v946_v44 = vmul.f32 1.442695, %v943_v43 }
 0x759   :  { %2599 = vpow2.f32 %v946_v44 }
 0x763   :  { %v2600_v45 = vpop.eup %2599 }
 0x764   :  { %v951_v46 = vsel %vm788_vm2, %v2600_v45, 0.0 }
 0x765   :  { %952 = vadd.xlane.f32.xlu0 %v951_v46 }
 0x77b   :  { %1017 = vrot.lane.b32.xlu0 %v3704_v1, %s4062_s4  ;;  %s3240_s4 = smov 56  }
 0x77f   :  { %1123 = vrot.lane.b32.xlu0 %v3704_v1, %s3239_s5 }
 0x7e0   :  { %v950_v47 = vpop.xlane.xlu0 %949 }
 0x7e1   :  { %2601 = vrcp.f32 %v950_v47 }
 0x7eb   :  { %v2602_v48 = vpop.eup %2601 }
 0x7ec   :  { %v955_v50 = vmul.f32 %v2602_v48, %v2598_v40 }
 0x7ee   :  { %v960_v52 = vmul.f32 0.25, %v955_v50  ;;  %v966_v53 = vpack.c.bf16 %v955_v50, %v955_v50 }
 0x7f0   :  { %v962_v56 = vadd.f32 %v960_v52, %v958_v51  ;;  %2402 = vmatmul.mubr.msk.bf16.vlgmr.msra.gmra.mrb[12].mxu1 %vm788_vm2, %v966_v53 }
 0x7f1   :  { %2412 = vmatpush3.bf16.xpose.msra.mxu1 %v1080_v54  ;;  %2413 = vmatprep.mubr.msk.bf16.mxu1 %vm3234_vm0, %v3233_v0 }
 0x7f2   :  { %964 = vst.msk [vmem:[#allocation39] sm:$0xff] %vm788_vm2, %v962_v56  ;;  %v953_v58 = vpop.xlane.xlu0 %952  ;;  %2423 = vmatprep.subr.bf16.mxu1 %v3233_v0 }
 0x7f3   :  { %2603 = vrcp.f32 %v953_v58 }
 0x7f6   :  { %v1018_v59 = vpop.permute.xlu0 %1017 }
 0x7f7   :  { %v1023_v61 = vsel %vm973_vm12, %v1018_v59, 0 }
 0x7f8   :  { %2406 = vmatpush3.bf16.msra.mxu0 %v1023_v61  ;;  %2414 = vmatmul.mubr.msk.bf16.vlgmr.msra.gmra.mrb[16].mxu1 %vm788_vm2, %v1073_v60 }
 0x7f9   :  { %2417 = vmatprep.subr.bf16.mxu0 %v3233_v0  ;;  %2425 = vmatprep.mubr.msk.bf16.mxu1 %vm3234_vm0, %v3233_v0  ;;  %v1199_v56 = vld [vmem:[#allocation39] sm:$0xff] }
 0x7fa   :  { %v1124_v9 = vpop.permute.xlu0 %1123 }
 0x7fd   :  { %v2604_v62 = vpop.eup %2603 }
 0x7fe   :  { %v957_v63 = vmul.f32 %v2604_v62, %v2600_v45 }
 0x800   :  { %v961_v4 = vmul.f32 0.25, %v957_v63  ;;  %v967_v7 = vpack.c.bf16 %v957_v63, %v957_v63 }
 0x802   :  { %v963_v55 = vadd.f32 %v961_v4, %v959_v3  ;;  %2408 = vmatmul.mubr.msk.bf16.vlgmr.msra.gmra.mrb[16].mxu0 %vm788_vm2, %v967_v7 }
 0x803   :  { %2418 = vmatpush3.bf16.xpose.msra.mxu0 %v1131_v8  ;;  %2419 = vmatprep.mubr.msk.bf16.mxu0 %vm3234_vm0, %v3233_v0 }
 0x804   :  { %965 = vst.msk [vmem:[#allocation39 + $0x8] sm:$0xff] %vm788_vm2, %v963_v55  ;;  %2429 = vmatprep.subr.bf16.mxu0 %v3233_v0 }
 0x80a   :  { %2420 = vmatmul.mubr.msk.bf16.vlgmr.msra.gmra.mrb[20].mxu0 %vm788_vm2, %v1124_v9 }
 0x80b   :  { %2431 = vmatprep.mubr.msk.bf16.mxu0 %vm3234_vm0, %v3233_v0  ;;  %v1200_v55 = vld [vmem:[#allocation39 + $0x8] sm:$0xff] }
 0x8c3   :  { %v1011_v10 = vpop.f32.mrb[12].mxu1 }
 0x8c4   :  { %v2403_v11 = vpop.f32.mrb[13].mxu1 }
 0x8c5   :  { %v1014_v12 = vpop.f32.mrb[14].mxu1 }
 0x8c6   :  { %v2404_v15 = vpop.f32.mrb[15].mxu1 }
 0x8cb   :  { %v1116_v16 = vpop.f32.mrb[16].mxu1 }
 0x8cc   :  { %v1173_v17 = vmul.f32 0.35355338, %v1116_v16  ;;  %v2415_v18 = vpop.f32.mrb[17].mxu1 }
 0x8cd   :  { %v1119_v20 = vpop.f32.mrb[18].mxu1 }
 0x8ce   :  { %v2416_v21 = vpop.f32.mrb[19].mxu1  ;;  %v1175_v23 = vsel %vm3755_vm8, -1e+09, %v1173_v17 }
 0x8cf   :  { %v1177_v13 = vsel %vm788_vm2, %v1175_v23, -inf }
 0x8d0   :  { %1178 = vmax.xlane.f32.xlu1 %v1177_v13 }
 0x8d5   :  { %v1059_v25 = vpop.f32.mrb[16].mxu0 }
 0x8d6   :  { %v1065_v14 = vpack.c.bf16 %v1059_v25, %v1011_v10  ;;  %v2409_v27 = vpop.f32.mrb[17].mxu0 }
 0x8d7   :  { %v1062_v28 = vpop.f32.mrb[18].mxu0 }
 0x8d8   :  { %1066 = vst.msk [vmem:[#allocation3] sm:$0xff] %vm788_vm2, %v1065_v14  ;;  %v2410_v29 = vpop.f32.mrb[19].mxu0 }
 0x8dd   :  { %v1167_v30 = vpop.f32.mrb[20].mxu0 }
 0x8de   :  { %v1174_v31 = vmul.f32 0.35355338, %v1167_v30  ;;  %v2421_v19 = vpop.f32.mrb[21].mxu0 }
 0x8df   :  { %v1170_v32 = vpop.f32.mrb[22].mxu0 }
 0x8e0   :  { %v2422_v33 = vpop.f32.mrb[23].mxu0  ;;  %v1176_v35 = vsel %vm3764_vm10, -1e+09, %v1174_v31 }
 0x8e1   :  { %1209 = vrot.lane.b32.xlu1 %v3720_v5, %s3240_s4  ;;  %v1180_v36 = vsel %vm788_vm2, %v1176_v35, -inf }
 0x8e2   :  { %1181 = vmax.xlane.f32.xlu0 %v1180_v36 }
 0x8e5   :  { %1319 = vrot.lane.b32.xlu1 %v3720_v5, %s3241_s30 }
 0x8e9   :  { %1370 = vrot.lane.b32.xlu1 %v3704_v1, %s3241_s30 }
 0x8ed   :  { %1317 = vrot.lane.b32.xlu1 %v3720_v5, %s3242_s25 }
 0x95d   :  { %v1179_v37 = vpop.xlane.xlu1 %1178 }
 0x95e   :  { %v1183_v38 = vsub.f32 %v1175_v23, %v1179_v37 }
 0x960   :  { %v1185_v39 = vmul.f32 1.442695, %v1183_v38 }
 0x961   :  { %v1210_v40 = vpop.permute.xlu1 %1209 }
 0x962   :  { %2605 = vpow2.f32 %v1185_v39  ;;  %v1215_v41 = vsel %vm973_vm12, %v1210_v40, 0 }
 0x963   :  { %2424 = vmatpush3.bf16.msra.mxu1 %v1215_v41 }
 0x964   :  { %2435 = vmatprep.subr.bf16.mxu1 %v3233_v0 }
 0x965   :  { %v1320_v51 = vpop.permute.xlu1 %1319 }
 0x966   :  { %v1325_v57 = vsel %vm788_vm2, %v1320_v51, 0 }
 0x969   :  { %v1371_v59 = vpop.permute.xlu1 %1370 }
 0x96a   :  { %v1376_v9 = vsel %vm788_vm2, %v1371_v59, 0 }
 0x96c   :  { %v2606_v42 = vpop.eup %2605 }
 0x96d   :  { %v1189_v43 = vsel %vm788_vm2, %v2606_v42, 0.0  ;;  %v1318_v62 = vpop.permute.xlu1 %1317 }
 0x96e   :  { %1190 = vadd.xlane.f32.xlu0 %v1189_v43 }
 0x96f   :  { %v1182_v44 = vpop.xlane.xlu0 %1181 }
 0x970   :  { %v1184_v45 = vsub.f32 %v1176_v35, %v1182_v44 }
 0x972   :  { %v1187_v46 = vmul.f32 1.442695, %v1184_v45 }
 0x974   :  { %2607 = vpow2.f32 %v1187_v46 }
 0x97e   :  { %v2608_v47 = vpop.eup %2607 }
 0x97f   :  { %v1192_v48 = vsel %vm788_vm2, %v2608_v47, 0.0 }
 0x980   :  { %1193 = vadd.xlane.f32.xlu0 %v1192_v48 }
 0x996   :  { %1257 = vrot.lane.b32.xlu0 %v3704_v1, %s3240_s4 }
 0x99a   :  { %1368 = vrot.lane.b32.xlu0 %v3704_v1, %s3242_s25 }
 0x9fb   :  { %v1191_v49 = vpop.xlane.xlu0 %1190 }
 0x9fc   :  { %2609 = vrcp.f32 %v1191_v49 }
 0xa06   :  { %v2610_v50 = vpop.eup %2609 }
 0xa07   :  { %v1196_v52 = vmul.f32 %v2610_v50, %v2606_v42 }
 0xa09   :  { %v1201_v53 = vmul.f32 0.25, %v1196_v52  ;;  %v1207_v54 = vpack.c.bf16 %v1196_v52, %v1196_v52 }
 0xa0b   :  { %v1203_v58 = vadd.f32 %v1201_v53, %v1199_v56  ;;  %2426 = vmatmul.mubr.msk.bf16.vlgmr.msra.gmra.mrb[20].mxu1 %vm788_vm2, %v1207_v54 }
 0xa0c   :  { %2436 = vmatpush3.bf16.xpose.msra.mxu1 %v1325_v57  ;;  %2437 = vmatprep.mubr.msk.bf16.mxu1 %vm3234_vm0, %v3233_v0 }
 0xa0d   :  { %1205 = vst.msk [vmem:[#allocation39] sm:$0xff] %vm788_vm2, %v1203_v58  ;;  %v1194_v60 = vpop.xlane.xlu0 %1193  ;;  %2447 = vmatprep.subr.bf16.mxu1 %v3233_v0 }
 0xa0e   :  { %2611 = vrcp.f32 %v1194_v60 }
 0xa11   :  { %v1258_v61 = vpop.permute.xlu0 %1257 }
 0xa12   :  { %v1263_v63 = vsel %vm973_vm12, %v1258_v61, 0 }
 0xa13   :  { %2430 = vmatpush3.bf16.msra.mxu0 %v1263_v63  ;;  %2438 = vmatmul.mubr.msk.bf16.vlgmr.msra.gmra.mrb[24].mxu1 %vm788_vm2, %v1318_v62 }
 0xa14   :  { %2441 = vmatprep.subr.bf16.mxu0 %v3233_v0  ;;  %2449 = vmatprep.mubr.msk.bf16.mxu1 %vm3234_vm0, %v3233_v0  ;;  %v1444_v58 = vld [vmem:[#allocation39] sm:$0xff] }
 0xa15   :  { %v1369_v11 = vpop.permute.xlu0 %1368 }
 0xa18   :  { %v2612_v3 = vpop.eup %2611 }
 0xa19   :  { %v1198_v4 = vmul.f32 %v2612_v3, %v2608_v47 }
 0xa1b   :  { %v1202_v7 = vmul.f32 0.25, %v1198_v4  ;;  %v1208_v8 = vpack.c.bf16 %v1198_v4, %v1198_v4 }
 0xa1d   :  { %v1204_v10 = vadd.f32 %v1202_v7, %v1200_v55  ;;  %2432 = vmatmul.mubr.msk.bf16.vlgmr.msra.gmra.mrb[24].mxu0 %vm788_vm2, %v1208_v8 }
 0xa1e   :  { %2442 = vmatpush3.bf16.xpose.msra.mxu0 %v1376_v9  ;;  %2443 = vmatprep.mubr.msk.bf16.mxu0 %vm3234_vm0, %v3233_v0 }
 0xa1f   :  { %1206 = vst.msk [vmem:[#allocation39 + $0x8] sm:$0xff] %vm788_vm2, %v1204_v10  ;;  %2453 = vmatprep.subr.bf16.mxu0 %v3233_v0 }
 0xa25   :  { %2444 = vmatmul.mubr.msk.bf16.vlgmr.msra.gmra.mrb[28].mxu0 %vm788_vm2, %v1369_v11 }
 0xa26   :  { %2455 = vmatprep.mubr.msk.bf16.mxu0 %vm3234_vm0, %v3233_v0  ;;  %v1445_v10 = vld [vmem:[#allocation39 + $0x8] sm:$0xff] }
 0xade   :  { %v3845_v12 = vpop.f32.mrb[20].mxu1 }
 0xadf   :  { %v2427_v15 = vpop.f32.mrb[21].mxu1 }
 0xae0   :  { %v1254_v16 = vpop.f32.mrb[22].mxu1 }
 0xae1   :  { %v2428_v17 = vpop.f32.mrb[23].mxu1 }
 0xae6   :  { %v1361_v18 = vpop.f32.mrb[24].mxu1 }
 0xae7   :  { %v1418_v20 = vmul.f32 0.35355338, %v1361_v18  ;;  %v2439_v21 = vpop.f32.mrb[25].mxu1 }
 0xae8   :  { %v1364_v23 = vpop.f32.mrb[26].mxu1 }
 0xae9   :  { %v2440_v13 = vpop.f32.mrb[27].mxu1  ;;  %v1420_v25 = vsel %vm3755_vm8, -1e+09, %v1418_v20 }
 0xaea   :  { %v1422_v14 = vsel %vm788_vm2, %v1420_v25, -inf }
 0xaeb   :  { %1423 = vmax.xlane.f32.xlu1 %v1422_v14 }
 0xaf0   :  { %v3850_v27 = vpop.f32.mrb[24].mxu0 }
 0xaf1   :  { %v1305_v28 = vpack.c.bf16 %v3850_v27, %v3845_v12  ;;  %v2433_v29 = vpop.f32.mrb[25].mxu0 }
 0xaf2   :  { %v1302_v30 = vpop.f32.mrb[26].mxu0 }
 0xaf3   :  { %v2434_v31 = vpop.f32.mrb[27].mxu0 }
 0xaf8   :  { %v1412_v19 = vpop.f32.mrb[28].mxu0 }
 0xaf9   :  { %v1419_v32 = vmul.f32 0.35355338, %v1412_v19  ;;  %v2445_v33 = vpop.f32.mrb[29].mxu0 }
 0xafa   :  { %v1415_v35 = vpop.f32.mrb[30].mxu0 }
 0xafb   :  { %v2446_v36 = vpop.f32.mrb[31].mxu0  ;;  %v1421_v37 = vsel %vm3764_vm10, -1e+09, %v1419_v32 }
 0xafc   :  { %1454 = vrot.lane.b32.xlu1 %v3720_v5, %s3243_s20  ;;  %v1425_v38 = vsel %vm788_vm2, %v1421_v37, -inf }
 0xafd   :  { %1426 = vmax.xlane.f32.xlu0 %v1425_v38 }
 0xb00   :  { %1564 = vrot.lane.b32.xlu1 %v3720_v5, %s3244_s24 }
 0xb04   :  { %1615 = vrot.lane.b32.xlu1 %v3704_v1, %s3244_s24 }
 0xb08   :  { %1562 = vrot.lane.b32.xlu1 %v3720_v5, %s3245_s26 }
 0xb78   :  { %v1424_v39 = vpop.xlane.xlu1 %1423 }
 0xb79   :  { %v1428_v40 = vsub.f32 %v1420_v25, %v1424_v39 }
 0xb7b   :  { %v1430_v41 = vmul.f32 1.442695, %v1428_v40 }
 0xb7c   :  { %v1455_v42 = vpop.permute.xlu1 %1454 }
 0xb7d   :  { %2613 = vpow2.f32 %v1430_v41  ;;  %v1460_v43 = vsel %vm973_vm12, %v1455_v42, 0 }
 0xb7e   :  { %2448 = vmatpush3.bf16.msra.mxu1 %v1460_v43 }
 0xb7f   :  { %2459 = vmatprep.subr.bf16.mxu1 %v3233_v0 }
 0xb80   :  { %v1565_v53 = vpop.permute.xlu1 %1564 }
 0xb81   :  { %v1570_v59 = vsel %vm788_vm2, %v1565_v53, 0 }
 0xb84   :  { %v1616_v61 = vpop.permute.xlu1 %1615 }
 0xb85   :  { %v1621_v11 = vsel %vm788_vm2, %v1616_v61, 0 }
 0xb87   :  { %v2614_v44 = vpop.eup %2613 }
 0xb88   :  { %v1434_v45 = vsel %vm788_vm2, %v2614_v44, 0.0  ;;  %v1563_v3 = vpop.permute.xlu1 %1562 }
 0xb89   :  { %1435 = vadd.xlane.f32.xlu0 %v1434_v45 }
 0xb8a   :  { %v1427_v46 = vpop.xlane.xlu0 %1426 }
 0xb8b   :  { %v1429_v47 = vsub.f32 %v1421_v37, %v1427_v46 }
 0xb8d   :  { %v1432_v48 = vmul.f32 1.442695, %v1429_v47 }
 0xb8f   :  { %2615 = vpow2.f32 %v1432_v48 }
 0xb99   :  { %v2616_v49 = vpop.eup %2615 }
 0xb9a   :  { %v1437_v50 = vsel %vm788_vm2, %v2616_v49, 0.0 }
 0xb9b   :  { %1438 = vadd.xlane.f32.xlu0 %v1437_v50 }
 0xbb1   :  { %1502 = vrot.lane.b32.xlu0 %v3704_v1, %s3243_s20 }
 0xbb5   :  { %1613 = vrot.lane.b32.xlu0 %v3704_v1, %s3245_s26 }
 0xc16   :  { %v1436_v51 = vpop.xlane.xlu0 %1435 }
 0xc17   :  { %2617 = vrcp.f32 %v1436_v51 }
 0xc21   :  { %v2618_v52 = vpop.eup %2617 }
 0xc22   :  { %v1441_v54 = vmul.f32 %v2618_v52, %v2614_v44 }
 0xc24   :  { %v1446_v56 = vmul.f32 0.25, %v1441_v54  ;;  %v1452_v57 = vpack.c.bf16 %v1441_v54, %v1441_v54 }
 0xc26   :  { %v1448_v60 = vadd.f32 %v1446_v56, %v1444_v58  ;;  %2450 = vmatmul.mubr.msk.bf16.vlgmr.msra.gmra.mrb[28].mxu1 %vm788_vm2, %v1452_v57 }
 0xc27   :  { %2460 = vmatpush3.bf16.xpose.msra.mxu1 %v1570_v59  ;;  %2461 = vmatprep.mubr.msk.bf16.mxu1 %vm3234_vm0, %v3233_v0 }
 0xc28   :  { %1450 = vst.msk [vmem:[#allocation39] sm:$0xff] %vm788_vm2, %v1448_v60  ;;  %v1439_v62 = vpop.xlane.xlu0 %1438  ;;  %2471 = vmatprep.subr.bf16.mxu1 %v3233_v0 }
 0xc29   :  { %2619 = vrcp.f32 %v1439_v62 }
 0xc2c   :  { %v1503_v63 = vpop.permute.xlu0 %1502 }
 0xc2d   :  { %v1508_v4 = vsel %vm973_vm12, %v1503_v63, 0 }
 0xc2e   :  { %2454 = vmatpush3.bf16.msra.mxu0 %v1508_v4  ;;  %2462 = vmatmul.mubr.msk.bf16.vlgmr.msra.gmra.mrb[32].mxu1 %vm788_vm2, %v1563_v3 }
 0xc2f   :  { %2465 = vmatprep.subr.bf16.mxu0 %v3233_v0  ;;  %2473 = vmatprep.mubr.msk.bf16.mxu1 %vm3234_vm0, %v3233_v0  ;;  %v1689_v58 = vld [vmem:[#allocation39] sm:$0xff] }
 0xc30   :  { %v1614_v16 = vpop.permute.xlu0 %1613 }
 0xc33   :  { %v2620_v7 = vpop.eup %2619 }
 0xc34   :  { %v1443_v8 = vmul.f32 %v2620_v7, %v2616_v49 }
 0xc36   :  { %v1447_v55 = vmul.f32 0.25, %v1443_v8  ;;  %v1453_v9 = vpack.c.bf16 %v1443_v8, %v1443_v8 }
 0xc38   :  { %v1449_v15 = vadd.f32 %v1447_v55, %v1445_v10  ;;  %2456 = vmatmul.mubr.msk.bf16.vlgmr.msra.gmra.mrb[32].mxu0 %vm788_vm2, %v1453_v9 }
 0xc39   :  { %2466 = vmatpush3.bf16.xpose.msra.mxu0 %v1621_v11  ;;  %2467 = vmatprep.mubr.msk.bf16.mxu0 %vm3234_vm0, %v3233_v0 }
 0xc3a   :  { %1451 = vst.msk [vmem:[#allocation39 + $0x8] sm:$0xff] %vm788_vm2, %v1449_v15  ;;  %2477 = vmatprep.subr.bf16.mxu0 %v3233_v0  ;;  %v2572_v15 = vld [vmem:[#allocation22] sm:$0xff]  }
 0xc40   :  { %2468 = vmatmul.mubr.msk.bf16.vlgmr.msra.gmra.mrb[36].mxu0 %vm788_vm2, %v1614_v16  ;;  %v2573_v16 = vld [vmem:[#allocation22 + $0x8] sm:$0xff]  }
 0xc41   :  { %2479 = vmatprep.mubr.msk.bf16.mxu0 %vm3234_vm0, %v3233_v0  ;;  %v1690_v7 = vld [vmem:[#allocation39 + $0x8] sm:$0xff] }
 0xcf9   :  { %v1496_v17 = vpop.f32.mrb[28].mxu1 }
 0xcfa   :  { %v2451_v18 = vpop.f32.mrb[29].mxu1 }
 0xcfb   :  { %v1499_v20 = vpop.f32.mrb[30].mxu1 }
 0xcfc   :  { %v2452_v21 = vpop.f32.mrb[31].mxu1 }
 0xd01   :  { %v1606_v23 = vpop.f32.mrb[32].mxu1 }
 0xd02   :  { %v1663_v13 = vmul.f32 0.35355338, %v1606_v23  ;;  %v2463_v25 = vpop.f32.mrb[33].mxu1 }
 0xd03   :  { %v1609_v14 = vpop.f32.mrb[34].mxu1  ;;  %v2574_v25 = vld [vmem:[#allocation28] sm:$0xff]  }
 0xd04   :  { %v2464_v29 = vpop.f32.mrb[35].mxu1  ;;  %v1665_v30 = vsel %vm3755_vm8, -1e+09, %v1663_v13 }
 0xd05   :  { %v1667_v31 = vsel %vm788_vm2, %v1665_v30, -inf  ;;  %v2575_v29 = vld [vmem:[#allocation28 + $0x8] sm:$0xff]  }
 0xd06   :  { %1668 = vmax.xlane.f32.xlu1 %v1667_v31  ;;  %v2271_v31 = vld [vmem:[#allocation24] ss:$0 sm:$0xff] }
 0xd0b   :  { %v1544_v19 = vpop.f32.mrb[32].mxu0 }
 0xd0c   :  { %v1550_v32 = vpack.c.bf16 %v1544_v19, %v1496_v17  ;;  %v2457_v33 = vpop.f32.mrb[33].mxu0 }
 0xd0d   :  { %v1547_v35 = vpop.f32.mrb[34].mxu0 }
 0xd0e   :  { %v2458_v36 = vpop.f32.mrb[35].mxu0 }
 0xd13   :  { %v1657_v37 = vpop.f32.mrb[36].mxu0 }
 0xd14   :  { %v1664_v38 = vmul.f32 0.35355338, %v1657_v37  ;;  %v2469_v39 = vpop.f32.mrb[37].mxu0 }
 0xd15   :  { %v1660_v40 = vpop.f32.mrb[38].mxu0 }
 0xd16   :  { %v2470_v41 = vpop.f32.mrb[39].mxu0  ;;  %v1666_v42 = vsel %vm3764_vm10, -1e+09, %v1664_v38 }
 0xd17   :  { %1699 = vrot.lane.b32.xlu1 %v3720_v5, %s3246_s28  ;;  %v1670_v2 = vsel %vm788_vm2, %v1666_v42, -inf }
 0xd18   :  { %1671 = vmax.xlane.f32.xlu0 %v1670_v2 }
 0xd1b   :  { %1307 = vrot.lane.b32.xlu1 %v1305_v28, %s3247_s13 }
 0xd1f   :  { %1552 = vrot.lane.b32.xlu1 %v1550_v32, %s3248_s1 }
 0xd93   :  { %v1669_v43 = vpop.xlane.xlu1 %1668 }
 0xd94   :  { %v1673_v44 = vsub.f32 %v1665_v30, %v1669_v43  ;;  %v1934_v30 = vpack.c.bf16 %v3777_v34, %v3777_v34 }
 0xd96   :  { %v1675_v45 = vmul.f32 1.442695, %v1673_v44 }
 0xd97   :  { %v1700_v26 = vpop.permute.xlu1 %1699 }
 0xd98   :  { %2621 = vpow2.f32 %v1675_v45  ;;  %v1705_v46 = vsel %vm973_vm12, %v1700_v26, 0 }
 0xd99   :  { %2472 = vmatpush3.bf16.msra.mxu1 %v1705_v46 }
 0xd9a   :  { %2483 = vmatprep.subr.bf16.mxu1 %v3233_v0 }
 0xd9b   :  { %v1308_v5 = vpop.permute.xlu1 %1307 }
 0xd9c   :  { %1311 = vst.msk [vmem:[#allocation3] sm:$0xff] %vm1310_vm13, %v1308_v5 }
 0xd9f   :  { %v1553_v47 = vpop.permute.xlu1 %1552 }
 0xda0   :  { %1556 = vst.msk [vmem:[#allocation3] sm:$0xff] %vm1555_vm14, %v1553_v47 }
 0xda2   :  { %v2622_v12 = vpop.eup %2621 }
 0xda3   :  { %v1679_v27 = vsel %vm788_vm2, %v2622_v12, 0.0 }
 0xda4   :  { %1680 = vadd.xlane.f32.xlu0 %v1679_v27  ;;  %v2576_v27 = vld [vmem:[#allocation30] sm:$0xff]  }
 0xda5   :  { %v1672_v28 = vpop.xlane.xlu0 %1671 }
 0xda6   :  { %v1674_v48 = vsub.f32 %v1666_v42, %v1672_v28  ;;  %v2577_v28 = vld [vmem:[#allocation30 + $0x8] sm:$0xff]  }
 0xda8   :  { %v1677_v49 = vmul.f32 1.442695, %v1674_v48 }
 0xdaa   :  { %2623 = vpow2.f32 %v1677_v49 }
 0xdb4   :  { %v2624_v50 = vpop.eup %2623 }
 0xdb5   :  { %v1682_v51 = vsel %vm788_vm2, %v2624_v50, 0.0 }
 0xdb6   :  { %1683 = vadd.xlane.f32.xlu0 %v1682_v51 }
 0xdcc   :  { %1747 = vrot.lane.b32.xlu0 %v3704_v1, %s3246_s28 }
 0xe31   :  { %v1681_v52 = vpop.xlane.xlu0 %1680 }
 0xe32   :  { %2625 = vrcp.f32 %v1681_v52 }
 0xe3c   :  { %v2626_v53 = vpop.eup %2625 }
 0xe3d   :  { %v1686_v54 = vmul.f32 %v2626_v53, %v2622_v12 }
 0xe3f   :  { %v1691_v56 = vmul.f32 0.25, %v1686_v54  ;;  %v1697_v57 = vpack.c.bf16 %v1686_v54, %v1686_v54 }
 0xe41   :  { %v1693_v59 = vadd.f32 %v1691_v56, %v1689_v58  ;;  %2474 = vmatmul.mubr.msk.bf16.vlgmr.msra.gmra.mrb[36].mxu1 %vm788_vm2, %v1697_v57  ;;  %v2275_v56 = vld [vmem:[#allocation25] ss:$0 sm:$0xff]  ;;  %v2276_v58 = vld [vmem:[#allocation27] ss:$0 sm:$0xff] }
 0xe42   :  { %2487 = vmatprep.mubr.msk.bf16.mxu1 %vm3234_vm0, %v3233_v0  ;;  %2484 = vmatpush3.bf16.msra.mxu1 %v2572_v15 }
 0xe43   :  { %1695 = vst.msk [vmem:[#allocation39] sm:$0xff] %vm788_vm2, %v1693_v59  ;;  %v1684_v60 = vpop.xlane.xlu0 %1683  ;;  %2485 = vmatprep.subr.bf16.mxu1 %v3233_v0 }
 0xe44   :  { %2627 = vrcp.f32 %v1684_v60 }
 0xe46   :  { %2486 = vmatpush3.bf16.msra.mxu1 %v2573_v16 }
 0xe47   :  { %v1748_v61 = vpop.permute.xlu0 %1747  ;;  %2499 = vmatprep.subr.bf16.mxu1 %v3233_v0 }
 0xe48   :  { %v1753_v1 = vsel %vm973_vm12, %v1748_v61, 0 }
 0xe49   :  { %2478 = vmatpush3.bf16.msra.mxu0 %v1753_v1 }
 0xe4a   :  { %2491 = vmatprep.subr.bf16.mxu0 %v3233_v0 }
 0xe4e   :  { %v2628_v62 = vpop.eup %2627 }
 0xe4f   :  { %v1688_v63 = vmul.f32 %v2628_v62, %v2624_v50 }
 0xe51   :  { %v1692_v3 = vmul.f32 0.25, %v1688_v63  ;;  %v1698_v4 = vpack.c.bf16 %v1688_v63, %v1688_v63 }
 0xe53   :  { %v1694_v8 = vadd.f32 %v1692_v3, %v1690_v7  ;;  %2480 = vmatmul.mubr.msk.bf16.vlgmr.msra.gmra.mrb[40].mxu0 %vm788_vm2, %v1698_v4 }
 0xe54   :  { %2495 = vmatprep.mubr.msk.bf16.mxu0 %vm3234_vm0, %v3233_v0  ;;  %2492 = vmatpush3.bf16.msra.mxu0 %v2576_v27 }
 0xe55   :  { %1696 = vst.msk [vmem:[#allocation39 + $0x8] sm:$0xff] %vm788_vm2, %v1694_v8  ;;  %2493 = vmatprep.subr.bf16.mxu0 %v3233_v0 }
 0xe58   :  { %2494 = vmatpush3.bf16.msra.mxu0 %v2577_v28 }
 0xe59   :  { %2507 = vmatprep.subr.bf16.mxu0 %v3233_v0 }
 0xf14   :  { %v1741_v55 = vpop.f32.mrb[36].mxu1 }
 0xf15   :  { %v2475_v9 = vpop.f32.mrb[37].mxu1 }
 0xf16   :  { %v1744_v10 = vpop.f32.mrb[38].mxu1 }
 0xf17   :  { %v2476_v11 = vpop.f32.mrb[39].mxu1 }
 0xf26   :  { %v1789_v17 = vpop.f32.mrb[40].mxu0 }
 0xf27   :  { %v1795_v18 = vpack.c.bf16 %v1789_v17, %v1741_v55  ;;  %v2481_v20 = vpop.f32.mrb[41].mxu0 }
 0xf28   :  { %v1792_v21 = vpop.f32.mrb[42].mxu0 }
 0xf29   :  { %1797 = vrot.lane.b32.xlu1 %v1795_v18, %s3249_s12  ;;  %v2482_v23 = vpop.f32.mrb[43].mxu0 }
 0xf9b   :  { %v1798_v13 = vpop.permute.xlu1 %1797 }
 0xf9c   :  { %1801 = vst.msk [vmem:[#allocation3] sm:$0xff] %vm1800_vm15, %v1798_v13 }
 0xfa3   :  { %v1802_v14 = vld [vmem:[#allocation3] sm:$0xff] }
 0xfa4   :  { %2488 = vmatmul.mubr.msk.bf16.vlgmr.msra.gmra.mrb[40].mxu1 %vm352_vm1, %v1802_v14 }
 0xfa5   :  { %2500 = vmatpush3.bf16.msra.mxu1 %v2574_v25  ;;  %2503 = vmatprep.mubr.msk.bf16.mxu1 %vm3234_vm0, %v3233_v0 }
 0xfa6   :  { %2501 = vmatprep.subr.bf16.mxu1 %v3233_v0 }
 0xfa9   :  { %2502 = vmatpush3.bf16.msra.mxu1 %v2575_v29 }
 0xfac   :  { %2504 = vmatmul.mubr.msk.bf16.vlgmr.msra.gmra.mrb[44].mxu1 %vm352_vm1, %v1934_v30 }
0x1077   :  { %v1863_v19 = vpop.f32.mrb[40].mxu1 }
0x1078   :  { %v1864_v32 = vadd.f32 %v2271_v31, %v1863_v19  ;;  %v2489_v33 = vpop.f32.mrb[41].mxu1 }
0x1079   :  { %v1866_v35 = vpop.f32.mrb[42].mxu1  ;;  %v2578_v33 = vld [vmem:[#allocation33] sm:$0xff]  }
0x107a   :  { %v1867_v36 = vadd.f32 %v2271_v31, %v1866_v35  ;;  %v2490_v37 = vpop.f32.mrb[43].mxu1  ;;  %v1870_v38 = vadd.f32 %v1864_v32, %v327_v22  ;;  %v2579_v35 = vld [vmem:[#allocation33 + $0x8] sm:$0xff]  }
0x107b   :  { %v2283_v37 = vld [vmem:[#allocation31] ss:$0 sm:$0xff] }
0x107c   :  { %v1872_v39 = vsel %vm352_vm1, %v1870_v38, 0.0  ;;  %v1871_v40 = vadd.f32 %v1867_v36, %v328_v24 }
0x107d   :  { %1873 = vadd.xlane.f32.xlu0 %v1872_v39 }
0x107e   :  { %v1875_v34 = vsel %vm352_vm1, %v1871_v40, 0.0 }
0x107f   :  { %1876 = vadd.xlane.f32.xlu1 %v1875_v34  ;;  %v3930_v41 = vpop.f32.mrb[44].mxu1 }
0x1080   :  { %v2505_v42 = vpop.f32.mrb[45].mxu1 }
0x1081   :  { %v2058_v2 = vpop.f32.mrb[46].mxu1 }
0x1082   :  { %v2506_v43 = vpop.f32.mrb[47].mxu1 }
0x110a   :  { %v1874_v44 = vpop.xlane.xlu0 %1873 }
0x110b   :  { %v1879_v45 = vmul.f32 0.03125, %v1874_v44 }
0x110c   :  { %v1877_v26 = vpop.xlane.xlu1 %1876 }
0x110d   :  { %v1881_v46 = vsub.f32 %v1870_v38, %v1879_v45  ;;  %v1880_v5 = vmul.f32 0.03125, %v1877_v26 }
0x110f   :  { %v1882_v22 = vsub.f32 %v1871_v40, %v1880_v5  ;;  %v1883_v47 = vmul.f32 %v1881_v46, %v1881_v46 }
0x1111   :  { %v1885_v12 = vsel %vm352_vm1, %v1883_v47, 0.0  ;;  %v1884_v6 = vmul.f32 %v1882_v22, %v1882_v22 }
0x1112   :  { %1886 = vadd.xlane.f32.xlu0 %v1885_v12 }
0x1113   :  { %v1888_v24 = vsel %vm352_vm1, %v1884_v6, 0.0 }
0x1116   :  { %1889 = vadd.xlane.f32.xlu0 %v1888_v24 }
0x119f   :  { %v1887_v48 = vpop.xlane.xlu0 %1886 }
0x11a0   :  { %v1891_v49 = vmul.f32 0.03125, %v1887_v48 }
0x11a2   :  { %v1893_v50 = vadd.f32 1e-05, %v1891_v49 }
0x11a3   :  { %v1890_v51 = vpop.xlane.xlu0 %1889 }
0x11a4   :  { %2629 = vrsqrt.f32 %v1893_v50  ;;  %v1892_v52 = vmul.f32 0.03125, %v1890_v51 }
0x11a6   :  { %v1894_v53 = vadd.f32 1e-05, %v1892_v52 }
0x11a8   :  { %2631 = vrsqrt.f32 %v1894_v53 }
0x11ae   :  { %v2630_v54 = vpop.eup %2629 }
0x11af   :  { %v1897_v57 = vmul.f32 %v2630_v54, %v1881_v46 }
0x11b1   :  { %v1906_v59 = vmul.f32 %v2275_v56, %v1897_v57 }
0x11b2   :  { %v2632_v60 = vpop.eup %2631 }
0x11b3   :  { %v1915_v61 = vadd.f32 %v2276_v58, %v1906_v59  ;;  %v1898_v1 = vmul.f32 %v2632_v60, %v1882_v22 }
0x11b5   :  { %v1917_v62 = vsel %vm352_vm1, %v1915_v61, 0.0  ;;  %v1907_v63 = vmul.f32 %v2275_v56, %v1898_v1 }
0x11b6   :  { %v1918_v3 = vrot.slane %v1917_v62, 4 }
0x11b7   :  { %v1916_v4 = vadd.f32 %v2276_v58, %v1907_v63 }
0x11b8   :  { %v1919_v7 = vadd.f32 %v1918_v3, %v1917_v62 }
0x11b9   :  { %v1924_v8 = vsel %vm352_vm1, %v1916_v4, 0.0 }
0x11ba   :  { %v1920_v55 = vrot.slane %v1919_v7, 2  ;;  %v1925_v9 = vrot.slane %v1924_v8, 4 }
0x11bc   :  { %v1921_v10 = vadd.f32 %v1920_v55, %v1919_v7  ;;  %v1926_v11 = vadd.f32 %v1925_v9, %v1924_v8 }
0x11be   :  { %v1927_v15 = vrot.slane %v1926_v11, 2  ;;  %v1922_v16 = vrot.slane %v1921_v10, 1 }
0x11c0   :  { %v1928_v17 = vadd.f32 %v1927_v15, %v1926_v11  ;;  %v1923_v18 = vadd.f32 %v1922_v16, %v1921_v10 }
0x11c2   :  { %v1929_v20 = vrot.slane %v1928_v17, 1  ;;  %v1932_v21 = vmul.f32 0.125, %v1923_v18 }
0x11c4   :  { %v1930_v23 = vadd.f32 %v1929_v20, %v1928_v17  ;;  %v1939_v25 = vpack.c.bf16 %v1932_v21, %v1932_v21 }
0x11c6   :  { %v1933_v13 = vmul.f32 0.125, %v1930_v23  ;;  %v1947_v30 = vunpack.c.l.b16 %v1939_v25 }
0x11c8   :  { %v1940_v14 = vpack.c.bf16 %v1933_v13, %v1933_v13  ;;  %v2143_v29 = vsel %vm600_vm3, %v1933_v13, %v1932_v21 }
0x11c9   :  { %2145 = vst.msk [vmem:[#allocation42] sm:$0x3] %vm2137_vm11, %v2143_v29 }
0x11ca   :  { %v1948_v31 = vunpack.c.l.b16 %v1940_v14 }
0x11cc   :  { %v1949_v19 = vsel %vm600_vm3, %v1948_v31, %v1947_v30 }
0x11cd   :  { %v1950_v32 = vpack.c.b16 %v1949_v19, %v1949_v19 }
0x11cf   :  { %2496 = vmatmul.mubr.msk.bf16.vlgmr.msra.gmra.mrb[44].mxu0 %vm352_vm1, %v1950_v32 }
0x11d0   :  { %2511 = vmatprep.mubr.msk.bf16.mxu0 %vm3234_vm0, %v3233_v0  ;;  %2508 = vmatpush3.bf16.msra.mxu0 %v2578_v33 }
0x11d1   :  { %2509 = vmatprep.subr.bf16.mxu0 %v3233_v0 }
0x11d4   :  { %2510 = vmatpush3.bf16.msra.mxu0 %v2579_v35 }
0x12a2   :  { %v2000_v36 = vpop.f32.mrb[44].mxu0 }
0x12a3   :  { %v2056_v38 = vadd.f32 %v3930_v41, %v2000_v36  ;;  %v2497_v39 = vpop.f32.mrb[45].mxu0 }
0x12a4   :  { %v2003_v40 = vpop.f32.mrb[46].mxu0 }
0x12a5   :  { %v2068_v34 = vadd.f32 %v2283_v37, %v2056_v38  ;;  %v2498_v42 = vpop.f32.mrb[47].mxu0 }
0x12a7   :  { %v2069_v2 = vmax.f32 %v2068_v34, 0.0 }
0x12a9   :  { %v2070_v43 = vpack.c.bf16 %v2069_v2, %v2069_v2 }
0x12ab   :  { %2512 = vmatmul.mubr.msk.bf16.vlgmr.msra.gmra.mrb[48].mxu0 %vm352_vm1, %v2070_v43 }
0x12ac   :  { %3084 = shalt.err (!%p3081_p10)
}
0x12ad   :  { %s3085_s10 = scalar_lea.hbm %s4030_s21, 32 }
0x12ae   :  { %p3086_p11 = scmp.ne.s32.totalorder %s4030_s21, %s3085_s10  ;;  %p3089_p12 = scmp.lt.u32.totalorder %s3085_s10, %s4030_s21 }
0x12b0   :  { %p3091_p13 = pnand %p3089_p12, %p3086_p11 }
0x12b2   :  { %3094 = shalt.err (!%p3091_p13)
}
0x12b3   :  { %2165 = dma.vmem_to_hbm [thread:$0]  %s2163_s6, 32, %s4030_s21, [#allocation38]  }
0x12b4   :  { %s3095_s11 = scalar_lea.vmem %s2185_s0, 32  ;;  %p3100_p1 = scmp.lt.s32.totalorder %s2185_s0, %s2185_s0 }
0x12b5   :  { %p3096_p0 = scmp.ne.s32.totalorder %s2185_s0, %s3095_s11  ;;  %p3101_p2 = scmp.lt.s32.totalorder %s3095_s11, %s3095_s11 }
0x12b7   :  { %p3102_p3 = por %p3101_p2, %p3100_p1 }
0x12b9   :  { %p3103_p4 = pnand %p3102_p3, %p3096_p0 }
0x12bb   :  { %3106 = shalt.err (!%p3103_p4)
}
0x12bc   :  { %s3107_s5 = scalar_lea.hbm %s4032_s23, 32 }
0x12bd   :  { %p3108_p5 = scmp.ne.s32.totalorder %s4032_s23, %s3107_s5  ;;  %p3111_p6 = scmp.lt.u32.totalorder %s3107_s5, %s4032_s23 }
0x12bf   :  { %p3113_p7 = pnand %p3111_p6, %p3108_p5 }
0x12c1   :  { %3116 = shalt.err (!%p3113_p7)
}
0x12c2   :  { %2187 = dma.vmem_to_hbm [thread:$0]  %s2185_s0, 32, %s4032_s23, [#allocation41]  }
0x12c3   :  { %s3252_s26 = smov [#allocation39]  }
0x12c4   :  { %s2171_s28 = sshll.u32 %s3252_s26, 4  ;;  %s2172_s28 = int_to_ptr.vmem [resolvable:$true] %s2171_s28 }
0x12c5   :  { %s3117_s1 = scalar_lea.vmem %s2172_s28, 256  ;;  %p3122_p9 = scmp.lt.s32.totalorder %s2172_s28, %s2172_s28 }
0x12c6   :  { %p3118_p8 = scmp.ne.s32.totalorder %s2172_s28, %s3117_s1  ;;  %p3123_p10 = scmp.lt.s32.totalorder %s3117_s1, %s3117_s1 }
0x12c8   :  { %p3124_p11 = por %p3123_p10, %p3122_p9 }
0x12ca   :  { %p3125_p12 = pnand %p3124_p11, %p3118_p8 }
0x12cc   :  { %3128 = shalt.err (!%p3125_p12)
}
0x12cd   :  { %s3129_s6 = scalar_lea.hbm %s4031_s22, 256 }
0x12ce   :  { %p3130_p13 = scmp.ne.s32.totalorder %s4031_s22, %s3129_s6  ;;  %p3133_p0 = scmp.lt.u32.totalorder %s3129_s6, %s4031_s22 }
0x12d0   :  { %p3135_p1 = pnand %p3133_p0, %p3130_p13 }
0x12d2   :  { %3138 = shalt.err (!%p3135_p1)
}
0x12d3   :  { %s3253_s0 = smov 128   ;;  %s3254_s15 = smov [#allocation42]  }
0x12d4   :  { %2177 = dma.vmem_to_hbm [thread:$0]  %s2172_s28, 256, %s4031_s22, [#allocation38], %s3253_s0, %s3253_s0, %s3247_s13  }
0x12d5   :  { %s2194_s7 = sshll.u32 %s3254_s15, 4  ;;  %s2195_s7 = int_to_ptr.vmem [resolvable:$true] %s2194_s7 }
0x12d6   :  { %s3139_s27 = scalar_lea.vmem %s2195_s7, 32  ;;  %p3144_p3 = scmp.lt.s32.totalorder %s2195_s7, %s2195_s7 }
0x12d7   :  { %p3140_p2 = scmp.ne.s32.totalorder %s2195_s7, %s3139_s27  ;;  %p3145_p4 = scmp.lt.s32.totalorder %s3139_s27, %s3139_s27 }
0x12d9   :  { %p3146_p5 = por %p3145_p4, %p3144_p3 }
0x12db   :  { %p3147_p6 = pnand %p3146_p5, %p3140_p2 }
0x12dd   :  { %3150 = shalt.err (!%p3147_p6)
}
0x12de   :  { %s4072_s8 = sld [smem:[#allocation67_spill]] }
0x12e4   :  { %s3151_s11 = scalar_lea.hbm %s4072_s8, 32 }
0x12e5   :  { %p3152_p7 = scmp.ne.s32.totalorder %s4072_s8, %s3151_s11  ;;  %p3155_p8 = scmp.lt.u32.totalorder %s3151_s11, %s4072_s8 }
0x12e7   :  { %p3157_p9 = pnand %p3155_p8, %p3152_p7 }
0x12e9   :  { %3160 = shalt.err (!%p3157_p9)
}
0x12ea   :  { %2197 = dma.vmem_to_hbm [thread:$0]  %s2195_s7, 32, %s4072_s8, [#allocation41]   ;;  %v2284_v0 = vld [vmem:[#allocation34] ss:$0 sm:$0xff] }
0x12eb   :  { %s3255_s30 = smov [#allocation36]  }
0x12ec   :  { %s2152_s25 = sshll.u32 %s3255_s30, 4  ;;  %s2153_s25 = int_to_ptr.vmem [resolvable:$true] %s2152_s25 }
0x12ed   :  { %s3161_s20 = scalar_lea.vmem %s2153_s25, 32  ;;  %p3166_p11 = scmp.lt.s32.totalorder %s2153_s25, %s2153_s25 }
0x12ee   :  { %p3162_p10 = scmp.ne.s32.totalorder %s2153_s25, %s3161_s20  ;;  %p3167_p12 = scmp.lt.s32.totalorder %s3161_s20, %s3161_s20 }
0x12f0   :  { %p3168_p13 = por %p3167_p12, %p3166_p11 }
0x12f2   :  { %p3169_p0 = pnand %p3168_p13, %p3162_p10 }
0x137e   :  { %v2131_v41 = vpop.f32.mrb[48].mxu0 }
0x137f   :  { %v2132_v44 = vadd.f32 %v2284_v0, %v2131_v41  ;;  %v2513_v45 = vpop.f32.mrb[49].mxu0 }
0x1380   :  { %v2134_v26 = vpop.f32.mrb[50].mxu0 }
0x1381   :  { %v2514_v46 = vpop.f32.mrb[51].mxu0  ;;  %2138 = vst.msk [vmem:[#allocation36] sm:$0x3] %vm2137_vm11, %v2132_v44 }
0x1382   :  { %3172 = shalt.err (!%p3169_p0)
}
0x1383   :  { %s4073_s26 = sld [smem:[#allocation66_spill]] }
0x1389   :  { %s3173_s28 = scalar_lea.hbm %s4073_s26, 32 }
0x138a   :  { %p3174_p1 = scmp.ne.s32.totalorder %s4073_s26, %s3173_s28  ;;  %p3177_p2 = scmp.lt.u32.totalorder %s3173_s28, %s4073_s26 }
0x138c   :  { %p3179_p3 = pnand %p3177_p2, %p3174_p1 }
0x138e   :  { %3182 = shalt.err (!%p3179_p3)
}
0x138f   :  { %2155 = dma.vmem_to_hbm [thread:$0]  %s2153_s25, 32, %s4073_s26, [#allocation6]  }
0x1390   :  { %3205 = dma.done.wait [#allocation6], 32  }
0x1391   :  { %3206 = vsyncadd [#allocation6], 4294967264 }
0x1392   :  { %3207 = dma.done.wait [#allocation38], 288  }
0x1393   :  { %3208 = vsyncadd [#allocation38], 4294967008 }
0x1394   :  { %3209 = dma.done.wait [#allocation41], 64  }
0x1395   :  { %3210 = vsyncadd [#allocation41], 4294967232 }
0x1396   :  { %2213 = vsyncpa [#allocation5], 1 }
0x1397   :  { %2214 = vsyncpa [#allocation8], 1 }
0x1398   :  { %2215 = vsyncpa [#allocation11], 1 }
0x1399   :  { %2216 = vsyncpa [#allocation14], 1 }
0x139a   :  { %2217 = vsyncpa [#allocation17], 1 }
0x139b   :  { %2218 = vsyncpa [#allocation20], 1 }
0x139c   :  { %2219 = vsyncpa [#allocation23], 1 }
0x139d   :  { %2220 = vsyncpa [#allocation26], 1 }
0x139e   :  { %2221 = vsyncpa [#allocation29], 1 }
0x139f   :  { %2222 = vsyncpa [#allocation32], 1 }
0x13a0   :  { %2223 = vsyncpa [#allocation35], 1 }
0x13a1   :  { %2224 = vsyncpa [#allocation6], 1 }
0x13a2   :  { %2225 = vsyncpa [#allocation38], 1 }
0x13a3   :  { %2226 = vsyncpa [#allocation41], 1 }

// kernel: tpu_custom_call.1
= control target key start
LH: loop header
LB: loop body
LE: loop exit
PB: predicated region body
PF: predicated region fallthrough
CT: control target
= control target key end

     0   :  { %s4009_s0 = inlined_call_operand.hbm [shape: bf16[2,8,32], index: 0, kind: input, shape index: {}]   ;;  %s4010_s1 = inlined_call_operand.hbm [shape: bf16[2,32], index: 1, kind: input, shape index: {}]   ;;  %s4011_s2 = inlined_call_operand.hbm [shape: f32[2,8], index: 2, kind: input, shape index: {}]   ;;  %s4012_s3 = inlined_call_operand.hbm [shape: bf16[32,128], index: 3, kind: input, shape index: {}]   ;;  %s4013_s4 = inlined_call_operand.hbm [shape: bf16[32,32], index: 4, kind: input, shape index: {}]   ;;  %s4014_s5 = inlined_call_operand.hbm [shape: f32[1,32], index: 5, kind: input, shape index: {}]   ;;  %s4015_s6 = inlined_call_operand.hbm [shape: bf16[32,32], index: 6, kind: input, shape index: {}]   ;;  %s4016_s7 = inlined_call_operand.hbm [shape: f32[1,32], index: 7, kind: input, shape index: {}]   ;;  %s4017_s8 = inlined_call_operand.hbm [shape: bf16[32,32], index: 8, kind: input, shape index: {}]   ;;  %s4018_s9 = inlined_call_operand.hbm [shape: bf16[32,32], index: 9, kind: input, shape index: {}]   ;;  %s4019_s10 = inlined_call_operand.hbm [shape: f32[1,32], index: 10, kind: input, shape index: {}]   ;;  %s4020_s11 = inlined_call_operand.hbm [shape: bf16[32,32], index: 11, kind: input, shape index: {}]   ;;  %s4021_s12 = inlined_call_operand.hbm [shape: f32[1,32], index: 12, kind: input, shape index: {}]   ;;  %s4022_s13 = inlined_call_operand.hbm [shape: f32[1,32], index: 13, kind: input, shape index: {}]   ;;  %s4023_s14 = inlined_call_operand.hbm [shape: f32[1,32], index: 14, kind: input, shape index: {}]   ;;  %s4024_s15 = inlined_call_operand.hbm [shape: bf16[32,32], index: 15, kind: input, shape index: {}]   ;;  %s4025_s16 = inlined_call_operand.hbm [shape: bf16[32,32], index: 16, kind: input, shape index: {}]   ;;  %s4026_s17 = inlined_call_operand.hbm [shape: f32[1,32], index: 17, kind: input, shape index: {}]   ;;  %s4027_s18 = inlined_call_operand.hbm [shape: bf16[32,32], index: 18, kind: input, shape index: {}]   ;;  %s4028_s19 = inlined_call_operand.hbm [shape: f32[1,32], index: 19, kind: input, shape index: {}]   ;;  %s4029_s20 = inlined_call_operand.hbm [shape: f32[2,32], index: 20, kind: output, shape index: {0}]   ;;  %s4030_s21 = inlined_call_operand.hbm [shape: f32[2,8], index: 21, kind: output, shape index: {1}]   ;;  %s4031_s22 = inlined_call_operand.hbm [shape: f32[2,8,8], index: 22, kind: output, shape index: {2}]   ;;  %s4032_s23 = inlined_call_operand.hbm [shape: f32[2,32], index: 23, kind: output, shape index: {3}]   ;;  %s4033_s24 = inlined_call_operand.hbm [shape: f32[2,32], index: 24, kind: output, shape index: {4}]  }
   0x1   :  { %4047 = sst [smem:[#allocation57_spill]] %s4009_s0 }
   0x2   :  { %4048 = sst [smem:[#allocation58_spill]] %s4010_s1 }
   0x3   :  { %4049 = sst [smem:[#allocation59_spill]] %s4011_s2 }
   0x4   :  { %4050 = sst [smem:[#allocation60_spill]] %s4012_s3 }
   0x5   :  { %4051 = sst [smem:[#allocation61_spill]] %s4013_s4 }
   0x6   :  { %4052 = sst [smem:[#allocation62_spill]] %s4014_s5 }
   0x7   :  { %4053 = sst [smem:[#allocation63_spill]] %s4015_s6 }
   0x8   :  { %4054 = sst [smem:[#allocation64_spill]] %s4016_s7 }
   0x9   :  { %4055 = sst [smem:[#allocation65_spill]] %s4017_s8 }
   0xa   :  { %4056 = sst [smem:[#allocation66_spill]] %s4029_s20 }
   0xb   :  { %4057 = sst [smem:[#allocation67_spill]] %s4033_s24 }
   0xc   :  { %30 = vsyncpa [#allocation5], 0 }
   0xd   :  { %31 = vsyncpa [#allocation8], 0 }
   0xe   :  { %32 = vsyncpa [#allocation11], 0 }
   0xf   :  { %33 = vsyncpa [#allocation14], 0 }
  0x10   :  { %34 = vsyncpa [#allocation17], 0 }
  0x11   :  { %35 = vsyncpa [#allocation20], 0 }
  0x12   :  { %36 = vsyncpa [#allocation23], 0 }
  0x13   :  { %37 = vsyncpa [#allocation26], 0 }
  0x14   :  { %38 = vsyncpa [#allocation29], 0 }
  0x15   :  { %39 = vsyncpa [#allocation32], 0 }
  0x16   :  { %40 = vsyncpa [#allocation35], 0 }
  0x17   :  { %41 = vsyncpa [#allocation6], 0 }
  0x18   :  { %42 = vsyncpa [#allocation38], 0 }
  0x19   :  { %43 = vsyncpa [#allocation41], 0  ;;  %s3211_s5 = smov [#allocation7]   ;;  %s4058_s6 = sld [smem:[#allocation58_spill]] }
  0x1a   :  { %s62_s26 = sshll.u32 %s3211_s5, 4  ;;  %s63_s26 = int_to_ptr.vmem [resolvable:$true] %s62_s26 }
  0x1f   :  { %s2633_s2 = scalar_lea.hbm %s4058_s6, 16 }
  0x20   :  { %p2634_p0 = scmp.ne.s32.totalorder %s4058_s6, %s2633_s2  ;;  %p2637_p1 = scmp.lt.u32.totalorder %s2633_s2, %s4058_s6 }
  0x22   :  { %p2639_p2 = pnand %p2637_p1, %p2634_p0 }
  0x24   :  { %2642 = shalt.err (!%p2639_p2)
}
  0x25   :  { %s2643_s3 = scalar_lea.vmem %s63_s26, 16  ;;  %s2647_s25 = scalar_lea.vmem %s63_s26, 32 }
  0x26   :  { %p2644_p3 = scmp.ne.s32.totalorder %s63_s26, %s2643_s3  ;;  %p2648_p4 = scmp.lt.s32.totalorder %s63_s26, %s63_s26 }
  0x27   :  { %p2649_p5 = scmp.lt.s32.totalorder %s2647_s25, %s2643_s3 }
  0x29   :  { %p2650_p6 = por %p2649_p5, %p2648_p4 }
  0x2b   :  { %p2651_p7 = pnand %p2650_p6, %p2644_p3 }
  0x2d   :  { %2654 = shalt.err (!%p2651_p7)
}
  0x2e   :  { %65 = dma.hbm_to_vmem [thread:$0]  %s4058_s6, 16, %s63_s26, [#allocation8]  }
  0x2f   :  { %s3212_s1 = smov [#allocation10]   ;;  %s3213_s27 = smov [#allocation13]  }
  0x30   :  { %s81_s5 = sshll.u32 %s3212_s1, 4  ;;  %s106_s28 = sshll.u32 %s3213_s27, 4  ;;  %s82_s5 = int_to_ptr.vmem [resolvable:$true] %s81_s5  ;;  %s107_s28 = int_to_ptr.vmem [resolvable:$true] %s106_s28 }
  0x31   :  { %s4059_s0 = sld [smem:[#allocation60_spill]] }
  0x37   :  { %s2655_s7 = scalar_lea.hbm %s4059_s0, 256 }
  0x38   :  { %p2656_p8 = scmp.ne.s32.totalorder %s4059_s0, %s2655_s7  ;;  %p2659_p9 = scmp.lt.u32.totalorder %s2655_s7, %s4059_s0 }
  0x3a   :  { %p2661_p10 = pnand %p2659_p9, %p2656_p8 }
  0x3c   :  { %2664 = shalt.err (!%p2661_p10)
}
  0x3d   :  { %s2665_s26 = scalar_lea.vmem %s82_s5, 256  ;;  %p2670_p12 = scmp.lt.s32.totalorder %s82_s5, %s82_s5 }
  0x3e   :  { %p2666_p11 = scmp.ne.s32.totalorder %s82_s5, %s2665_s26  ;;  %p2671_p13 = scmp.lt.s32.totalorder %s2665_s26, %s2665_s26 }
  0x40   :  { %p2672_p0 = por %p2671_p13, %p2670_p12 }
  0x42   :  { %p2673_p1 = pnand %p2672_p0, %p2666_p11 }
  0x44   :  { %2676 = shalt.err (!%p2673_p1)
}
  0x45   :  { %s4045_s6 = smov 64   ;;  %s3215_s8 = smov 4  }
  0x46   :  { %87 = dma.hbm_to_vmem [thread:$0]  %s4059_s0, 256, %s82_s5, [#allocation11], %s4045_s6, %s4045_s6, %s3215_s8  }
  0x47   :  { %s4060_s2 = sld [smem:[#allocation62_spill]] }
  0x4d   :  { %s2677_s29 = scalar_lea.hbm %s4060_s2, 16 }
  0x4e   :  { %p2678_p2 = scmp.ne.s32.totalorder %s4060_s2, %s2677_s29  ;;  %p2681_p3 = scmp.lt.u32.totalorder %s2677_s29, %s4060_s2 }
  0x50   :  { %p2683_p4 = pnand %p2681_p3, %p2678_p2 }
  0x52   :  { %2686 = shalt.err (!%p2683_p4)
}
  0x53   :  { %s2687_s26 = scalar_lea.vmem %s107_s28, 16  ;;  %s2691_s24 = scalar_lea.vmem %s107_s28, 32 }
  0x54   :  { %p2688_p5 = scmp.ne.s32.totalorder %s107_s28, %s2687_s26  ;;  %p2692_p6 = scmp.lt.s32.totalorder %s107_s28, %s107_s28 }
  0x55   :  { %p2693_p7 = scmp.lt.s32.totalorder %s2691_s24, %s2687_s26 }
  0x57   :  { %p2694_p8 = por %p2693_p7, %p2692_p6 }
  0x59   :  { %p2695_p9 = pnand %p2694_p8, %p2688_p5 }
  0x5b   :  { %2698 = shalt.err (!%p2695_p9)
}
  0x5c   :  { %109 = dma.hbm_to_vmem [thread:$0]  %s4060_s2, 16, %s107_s28, [#allocation14]  }
  0x5d   :  { %s3216_s20 = smov [#allocation16]   ;;  %s3217_s1 = smov [#allocation19]  }
  0x5e   :  { %s128_s4 = sshll.u32 %s3216_s20, 4  ;;  %s149_s27 = sshll.u32 %s3217_s1, 4  ;;  %s129_s4 = int_to_ptr.vmem [resolvable:$true] %s128_s4  ;;  %s150_s27 = int_to_ptr.vmem [resolvable:$true] %s149_s27 }
  0x5f   :  { %s4061_s30 = sld [smem:[#allocation64_spill]] }
  0x65   :  { %s2699_s3 = scalar_lea.hbm %s4061_s30, 16 }
  0x66   :  { %p2700_p10 = scmp.ne.s32.totalorder %s4061_s30, %s2699_s3  ;;  %p2703_p11 = scmp.lt.u32.totalorder %s2699_s3, %s4061_s30 }
  0x68   :  { %p2705_p12 = pnand %p2703_p11, %p2700_p10 }
  0x6a   :  { %2708 = shalt.err (!%p2705_p12)
}
  0x6b   :  { %s2709_s28 = scalar_lea.vmem %s129_s4, 16  ;;  %s2713_s2 = scalar_lea.vmem %s129_s4, 32 }
  0x6c   :  { %p2710_p13 = scmp.ne.s32.totalorder %s129_s4, %s2709_s28  ;;  %p2714_p0 = scmp.lt.s32.totalorder %s129_s4, %s129_s4 }
  0x6d   :  { %p2715_p1 = scmp.lt.s32.totalorder %s2713_s2, %s2709_s28 }
  0x6f   :  { %p2716_p2 = por %p2715_p1, %p2714_p0 }
  0x71   :  { %p2717_p3 = pnand %p2716_p2, %p2710_p13 }
  0x73   :  { %2720 = shalt.err (!%p2717_p3)
}
  0x74   :  { %131 = dma.hbm_to_vmem [thread:$0]  %s4061_s30, 16, %s129_s4, [#allocation17]  }
  0x75   :  { %s2721_s1 = scalar_lea.hbm %s4018_s9, 256 }
  0x76   :  { %p2722_p4 = scmp.ne.s32.totalorder %s4018_s9, %s2721_s1  ;;  %p2725_p5 = scmp.lt.u32.totalorder %s2721_s1, %s4018_s9 }
  0x78   :  { %p2727_p6 = pnand %p2725_p5, %p2722_p4 }
  0x7a   :  { %2730 = shalt.err (!%p2727_p6)
}
  0x7b   :  { %s2731_s24 = scalar_lea.vmem %s150_s27, 256  ;;  %p2736_p8 = scmp.lt.s32.totalorder %s150_s27, %s150_s27 }
  0x7c   :  { %p2732_p7 = scmp.ne.s32.totalorder %s150_s27, %s2731_s24  ;;  %p2737_p9 = scmp.lt.s32.totalorder %s2731_s24, %s2731_s24 }
  0x7e   :  { %p2738_p10 = por %p2737_p9, %p2736_p8 }
  0x80   :  { %p2739_p11 = pnand %p2738_p10, %p2732_p7 }
  0x82   :  { %2742 = shalt.err (!%p2739_p11)
}
  0x83   :  { %s4062_s4 = smov 64   ;;  %s3218_s28 = smov [#allocation22]  }
  0x84   :  { %155 = dma.hbm_to_vmem [thread:$0]  %s4018_s9, 256, %s150_s27, [#allocation20], %s4062_s4, %s4062_s4, %s3215_s8  }
  0x85   :  { %s171_s2 = sshll.u32 %s3218_s28, 4  ;;  %s3219_s5 = smov [#allocation25]   ;;  %s172_s2 = int_to_ptr.vmem [resolvable:$true] %s171_s2 }
  0x86   :  { %s194_s0 = sshll.u32 %s3219_s5, 4  ;;  %s2743_s1 = scalar_lea.hbm %s4020_s11, 256  ;;  %s195_s0 = int_to_ptr.vmem [resolvable:$true] %s194_s0 }
  0x87   :  { %p2744_p12 = scmp.ne.s32.totalorder %s4020_s11, %s2743_s1  ;;  %p2747_p13 = scmp.lt.u32.totalorder %s2743_s1, %s4020_s11 }
  0x89   :  { %p2749_p0 = pnand %p2747_p13, %p2744_p12 }
  0x8b   :  { %2752 = shalt.err (!%p2749_p0)
}
  0x8c   :  { %s2753_s9 = scalar_lea.vmem %s172_s2, 256  ;;  %p2758_p2 = scmp.lt.s32.totalorder %s172_s2, %s172_s2 }
  0x8d   :  { %p2754_p1 = scmp.ne.s32.totalorder %s172_s2, %s2753_s9  ;;  %p2759_p3 = scmp.lt.s32.totalorder %s2753_s9, %s2753_s9 }
  0x8f   :  { %p2760_p4 = por %p2759_p3, %p2758_p2 }
  0x91   :  { %p2761_p5 = pnand %p2760_p4, %p2754_p1 }
  0x93   :  { %2764 = shalt.err (!%p2761_p5)
}
  0x94   :  { %177 = dma.hbm_to_vmem [thread:$0]  %s4020_s11, 256, %s172_s2, [#allocation23], %s4062_s4, %s4062_s4, %s3215_s8  }
  0x95   :  { %s2765_s28 = scalar_lea.hbm %s4022_s13, 16 }
  0x96   :  { %p2766_p6 = scmp.ne.s32.totalorder %s4022_s13, %s2765_s28  ;;  %p2769_p7 = scmp.lt.u32.totalorder %s2765_s28, %s4022_s13 }
  0x98   :  { %p2771_p8 = pnand %p2769_p7, %p2766_p6 }
  0x9a   :  { %2774 = shalt.err (!%p2771_p8)
}
  0x9b   :  { %s2775_s29 = scalar_lea.vmem %s195_s0, 16  ;;  %s2779_s7 = scalar_lea.vmem %s195_s0, 32 }
  0x9c   :  { %p2776_p9 = scmp.ne.s32.totalorder %s195_s0, %s2775_s29  ;;  %p2780_p10 = scmp.lt.s32.totalorder %s195_s0, %s195_s0 }
  0x9d   :  { %p2781_p11 = scmp.lt.s32.totalorder %s2779_s7, %s2775_s29 }
  0x9f   :  { %p2782_p12 = por %p2781_p11, %p2780_p10 }
  0xa1   :  { %p2783_p13 = pnand %p2782_p12, %p2776_p9 }
  0xa3   :  { %2786 = shalt.err (!%p2783_p13)
}
  0xa4   :  { %197 = dma.hbm_to_vmem [thread:$0]  %s4022_s13, 16, %s195_s0, [#allocation26]  }
  0xa5   :  { %s3220_s3 = smov [#allocation28]   ;;  %s3221_s9 = smov [#allocation31]  }
  0xa6   :  { %s213_s25 = sshll.u32 %s3220_s3, 4  ;;  %s238_s27 = sshll.u32 %s3221_s9, 4  ;;  %s214_s25 = int_to_ptr.vmem [resolvable:$true] %s213_s25  ;;  %s239_s27 = int_to_ptr.vmem [resolvable:$true] %s238_s27 }
  0xa7   :  { %s2787_s26 = scalar_lea.hbm %s4024_s15, 256 }
  0xa8   :  { %p2788_p0 = scmp.ne.s32.totalorder %s4024_s15, %s2787_s26  ;;  %p2791_p1 = scmp.lt.u32.totalorder %s2787_s26, %s4024_s15 }
  0xaa   :  { %p2793_p2 = pnand %p2791_p1, %p2788_p0 }
  0xac   :  { %2796 = shalt.err (!%p2793_p2)
}
  0xad   :  { %s2797_s13 = scalar_lea.vmem %s214_s25, 256  ;;  %p2802_p4 = scmp.lt.s32.totalorder %s214_s25, %s214_s25 }
  0xae   :  { %p2798_p3 = scmp.ne.s32.totalorder %s214_s25, %s2797_s13  ;;  %p2803_p5 = scmp.lt.s32.totalorder %s2797_s13, %s2797_s13 }
  0xb0   :  { %p2804_p6 = por %p2803_p5, %p2802_p4 }
  0xb2   :  { %p2805_p7 = pnand %p2804_p6, %p2798_p3 }
  0xb4   :  { %2808 = shalt.err (!%p2805_p7)
}
  0xb5   :  { %219 = dma.hbm_to_vmem [thread:$0]  %s4024_s15, 256, %s214_s25, [#allocation29], %s4062_s4, %s4062_s4, %s3215_s8  }
  0xb6   :  { %s2809_s11 = scalar_lea.hbm %s4026_s17, 16 }
  0xb7   :  { %p2810_p8 = scmp.ne.s32.totalorder %s4026_s17, %s2809_s11  ;;  %p2813_p9 = scmp.lt.u32.totalorder %s2809_s11, %s4026_s17 }
  0xb9   :  { %p2815_p10 = pnand %p2813_p9, %p2810_p8 }
  0xbb   :  { %2818 = shalt.err (!%p2815_p10)
}
  0xbc   :  { %s2819_s30 = scalar_lea.vmem %s239_s27, 16  ;;  %s2823_s26 = scalar_lea.vmem %s239_s27, 32 }
  0xbd   :  { %p2820_p11 = scmp.ne.s32.totalorder %s239_s27, %s2819_s30  ;;  %p2824_p12 = scmp.lt.s32.totalorder %s239_s27, %s239_s27 }
  0xbe   :  { %p2825_p13 = scmp.lt.s32.totalorder %s2823_s26, %s2819_s30 }
  0xc0   :  { %p2826_p0 = por %p2825_p13, %p2824_p12 }
  0xc2   :  { %p2827_p1 = pnand %p2826_p0, %p2820_p11 }
  0xc4   :  { %2830 = shalt.err (!%p2827_p1)
}
  0xc5   :  { %241 = dma.hbm_to_vmem [thread:$0]  %s4026_s17, 16, %s239_s27, [#allocation32]  }
  0xc6   :  { %s3222_s28 = smov [#allocation4]   ;;  %s3223_s6 = smov [#allocation9]  }
  0xc7   :  { %s49_s5 = sshll.u32 %s3222_s28, 4  ;;  %s72_s20 = sshll.u32 %s3223_s6, 4  ;;  %s50_s5 = int_to_ptr.vmem [resolvable:$true] %s49_s5  ;;  %s73_s20 = int_to_ptr.vmem [resolvable:$true] %s72_s20 }
  0xc8   :  { %s4063_s1 = sld [smem:[#allocation57_spill]] }
  0xce   :  { %s2831_s29 = scalar_lea.hbm %s4063_s1, 128 }
  0xcf   :  { %p2832_p2 = scmp.ne.s32.totalorder %s4063_s1, %s2831_s29  ;;  %p2835_p3 = scmp.lt.u32.totalorder %s2831_s29, %s4063_s1 }
  0xd1   :  { %p2837_p4 = pnand %p2835_p3, %p2832_p2 }
  0xd3   :  { %2840 = shalt.err (!%p2837_p4)
}
  0xd4   :  { %s2841_s17 = scalar_lea.vmem %s50_s5, 128  ;;  %p2846_p6 = scmp.lt.s32.totalorder %s50_s5, %s50_s5 }
  0xd5   :  { %p2842_p5 = scmp.ne.s32.totalorder %s50_s5, %s2841_s17  ;;  %p2847_p7 = scmp.lt.s32.totalorder %s2841_s17, %s2841_s17 }
  0xd7   :  { %p2848_p8 = por %p2847_p7, %p2846_p6 }
  0xd9   :  { %p2849_p9 = pnand %p2848_p8, %p2842_p5 }
  0xdb   :  { %2852 = shalt.err (!%p2849_p9)
}
  0xdc   :  { %55 = dma.hbm_to_vmem [thread:$0]  %s4063_s1, 128, %s50_s5, [#allocation5], %s4062_s4, %s4062_s4, %s3215_s8  }
  0xdd   :  { %s4064_s26 = sld [smem:[#allocation59_spill]] }
  0xe3   :  { %s2853_s15 = scalar_lea.hbm %s4064_s26, 32 }
  0xe4   :  { %p2854_p10 = scmp.ne.s32.totalorder %s4064_s26, %s2853_s15  ;;  %p2857_p11 = scmp.lt.u32.totalorder %s2853_s15, %s4064_s26 }
  0xe6   :  { %p2859_p12 = pnand %p2857_p11, %p2854_p10 }
  0xe8   :  { %2862 = shalt.err (!%p2859_p12)
}
  0xe9   :  { %s2863_s0 = scalar_lea.vmem %s73_s20, 32  ;;  %p2868_p0 = scmp.lt.s32.totalorder %s73_s20, %s73_s20 }
  0xea   :  { %p2864_p13 = scmp.ne.s32.totalorder %s73_s20, %s2863_s0  ;;  %p2869_p1 = scmp.lt.s32.totalorder %s2863_s0, %s2863_s0 }
  0xec   :  { %p2870_p2 = por %p2869_p1, %p2868_p0 }
  0xee   :  { %p2871_p3 = pnand %p2870_p2, %p2864_p13 }
  0xf0   :  { %2874 = shalt.err (!%p2871_p3)
}
  0xf1   :  { %75 = dma.hbm_to_vmem [thread:$0]  %s4064_s26, 32, %s73_s20, [#allocation8]  }
  0xf2   :  { %s3224_s29 = smov [#allocation12]   ;;  %s3225_s11 = smov [#allocation15]  }
  0xf3   :  { %s93_s7 = sshll.u32 %s3224_s29, 4  ;;  %s115_s2 = sshll.u32 %s3225_s11, 4  ;;  %s94_s7 = int_to_ptr.vmem [resolvable:$true] %s93_s7  ;;  %s116_s2 = int_to_ptr.vmem [resolvable:$true] %s115_s2 }
  0xf4   :  { %s4065_s27 = sld [smem:[#allocation61_spill]] }
  0xfa   :  { %s2875_s9 = scalar_lea.hbm %s4065_s27, 256 }
  0xfb   :  { %p2876_p4 = scmp.ne.s32.totalorder %s4065_s27, %s2875_s9  ;;  %p2879_p5 = scmp.lt.u32.totalorder %s2875_s9, %s4065_s27 }
  0xfd   :  { %p2881_p6 = pnand %p2879_p5, %p2876_p4 }
  0xff   :  { %2884 = shalt.err (!%p2881_p6)
}
 0x100   :  { %s2885_s20 = scalar_lea.vmem %s94_s7, 256  ;;  %p2890_p8 = scmp.lt.s32.totalorder %s94_s7, %s94_s7 }
 0x101   :  { %p2886_p7 = scmp.ne.s32.totalorder %s94_s7, %s2885_s20  ;;  %p2891_p9 = scmp.lt.s32.totalorder %s2885_s20, %s2885_s20 }
 0x103   :  { %p2892_p10 = por %p2891_p9, %p2890_p8 }
 0x105   :  { %p2893_p11 = pnand %p2892_p10, %p2886_p7 }
 0x107   :  { %2896 = shalt.err (!%p2893_p11)
}
 0x108   :  { %99 = dma.hbm_to_vmem [thread:$0]  %s4065_s27, 256, %s94_s7, [#allocation11], %s4062_s4, %s4062_s4, %s3215_s8  }
 0x109   :  { %s4066_s0 = sld [smem:[#allocation63_spill]] }
 0x10f   :  { %s2897_s5 = scalar_lea.hbm %s4066_s0, 256 }
 0x110   :  { %p2898_p12 = scmp.ne.s32.totalorder %s4066_s0, %s2897_s5  ;;  %p2901_p13 = scmp.lt.u32.totalorder %s2897_s5, %s4066_s0 }
 0x112   :  { %p2903_p0 = pnand %p2901_p13, %p2898_p12 }
 0x114   :  { %2906 = shalt.err (!%p2903_p0)
}
 0x115   :  { %s2907_s17 = scalar_lea.vmem %s116_s2, 256  ;;  %p2912_p2 = scmp.lt.s32.totalorder %s116_s2, %s116_s2 }
 0x116   :  { %p2908_p1 = scmp.ne.s32.totalorder %s116_s2, %s2907_s17  ;;  %p2913_p3 = scmp.lt.s32.totalorder %s2907_s17, %s2907_s17 }
 0x118   :  { %p2914_p4 = por %p2913_p3, %p2912_p2 }
 0x11a   :  { %p2915_p5 = pnand %p2914_p4, %p2908_p1 }
 0x11c   :  { %2918 = shalt.err (!%p2915_p5)
}
 0x11d   :  { %121 = dma.hbm_to_vmem [thread:$0]  %s4066_s0, 256, %s116_s2, [#allocation14], %s4062_s4, %s4062_s4, %s3215_s8  }
 0x11e   :  { %s3226_s9 = smov [#allocation18]   ;;  %s3227_s30 = smov [#allocation21]  }
 0x11f   :  { %s137_s24 = sshll.u32 %s3226_s9, 4  ;;  %s162_s15 = sshll.u32 %s3227_s30, 4  ;;  %s138_s24 = int_to_ptr.vmem [resolvable:$true] %s137_s24  ;;  %s163_s15 = int_to_ptr.vmem [resolvable:$true] %s162_s15 }
 0x120   :  { %s4067_s26 = sld [smem:[#allocation65_spill]] }
 0x126   :  { %s2919_s28 = scalar_lea.hbm %s4067_s26, 256 }
 0x127   :  { %p2920_p6 = scmp.ne.s32.totalorder %s4067_s26, %s2919_s28  ;;  %p2923_p7 = scmp.lt.u32.totalorder %s2919_s28, %s4067_s26 }
 0x129   :  { %p2925_p8 = pnand %p2923_p7, %p2920_p6 }
 0x12b   :  { %2928 = shalt.err (!%p2925_p8)
}
 0x12c   :  { %s2929_s2 = scalar_lea.vmem %s138_s24, 256  ;;  %p2934_p10 = scmp.lt.s32.totalorder %s138_s24, %s138_s24 }
 0x12d   :  { %p2930_p9 = scmp.ne.s32.totalorder %s138_s24, %s2929_s2  ;;  %p2935_p11 = scmp.lt.s32.totalorder %s2929_s2, %s2929_s2 }
 0x12f   :  { %p2936_p12 = por %p2935_p11, %p2934_p10 }
 0x131   :  { %p2937_p13 = pnand %p2936_p12, %p2930_p9 }
 0x133   :  { %2940 = shalt.err (!%p2937_p13)
}
 0x134   :  { %143 = dma.hbm_to_vmem [thread:$0]  %s4067_s26, 256, %s138_s24, [#allocation17], %s4062_s4, %s4062_s4, %s3215_s8  }
 0x135   :  { %s2941_s17 = scalar_lea.hbm %s4019_s10, 16 }
 0x136   :  { %p2942_p0 = scmp.ne.s32.totalorder %s4019_s10, %s2941_s17  ;;  %p2945_p1 = scmp.lt.u32.totalorder %s2941_s17, %s4019_s10 }
 0x138   :  { %p2947_p2 = pnand %p2945_p1, %p2942_p0 }
 0x13a   :  { %2950 = shalt.err (!%p2947_p2)
}
 0x13b   :  { %s2951_s25 = scalar_lea.vmem %s163_s15, 16  ;;  %s2955_s20 = scalar_lea.vmem %s163_s15, 32 }
 0x13c   :  { %p2952_p3 = scmp.ne.s32.totalorder %s163_s15, %s2951_s25  ;;  %p2956_p4 = scmp.lt.s32.totalorder %s163_s15, %s163_s15 }
 0x13d   :  { %p2957_p5 = scmp.lt.s32.totalorder %s2955_s20, %s2951_s25 }
 0x13f   :  { %p2958_p6 = por %p2957_p5, %p2956_p4 }
 0x141   :  { %p2959_p7 = pnand %p2958_p6, %p2952_p3 }
 0x143   :  { %2962 = shalt.err (!%p2959_p7)
}
 0x144   :  { %165 = dma.hbm_to_vmem [thread:$0]  %s4019_s10, 16, %s163_s15, [#allocation20]  }
 0x145   :  { %s3228_s28 = smov [#allocation24]   ;;  %s3229_s13 = smov [#allocation27]  }
 0x146   :  { %s184_s6 = sshll.u32 %s3228_s28, 4  ;;  %s204_s5 = sshll.u32 %s3229_s13, 4  ;;  %s185_s6 = int_to_ptr.vmem [resolvable:$true] %s184_s6  ;;  %s205_s5 = int_to_ptr.vmem [resolvable:$true] %s204_s5 }
 0x147   :  { %s2963_s0 = scalar_lea.hbm %s4021_s12, 16 }
 0x148   :  { %p2964_p8 = scmp.ne.s32.totalorder %s4021_s12, %s2963_s0  ;;  %p2967_p9 = scmp.lt.u32.totalorder %s2963_s0, %s4021_s12 }
 0x14a   :  { %p2969_p10 = pnand %p2967_p9, %p2964_p8 }
 0x14c   :  { %2972 = shalt.err (!%p2969_p10)
}
 0x14d   :  { %s2973_s10 = scalar_lea.vmem %s185_s6, 16  ;;  %s2977_s15 = scalar_lea.vmem %s185_s6, 32 }
 0x14e   :  { %p2974_p11 = scmp.ne.s32.totalorder %s185_s6, %s2973_s10  ;;  %p2978_p12 = scmp.lt.s32.totalorder %s185_s6, %s185_s6 }
 0x14f   :  { %p2979_p13 = scmp.lt.s32.totalorder %s2977_s15, %s2973_s10 }
 0x151   :  { %p2980_p0 = por %p2979_p13, %p2978_p12 }
 0x153   :  { %p2981_p1 = pnand %p2980_p0, %p2974_p11 }
 0x155   :  { %2984 = shalt.err (!%p2981_p1)
}
 0x156   :  { %187 = dma.hbm_to_vmem [thread:$0]  %s4021_s12, 16, %s185_s6, [#allocation23]  }
 0x157   :  { %s2985_s25 = scalar_lea.hbm %s4023_s14, 16 }
 0x158   :  { %p2986_p2 = scmp.ne.s32.totalorder %s4023_s14, %s2985_s25  ;;  %p2989_p3 = scmp.lt.u32.totalorder %s2985_s25, %s4023_s14 }
 0x15a   :  { %p2991_p4 = pnand %p2989_p3, %p2986_p2 }
 0x15c   :  { %2994 = shalt.err (!%p2991_p4)
}
 0x15d   :  { %s2995_s13 = scalar_lea.vmem %s205_s5, 16  ;;  %s2999_s1 = scalar_lea.vmem %s205_s5, 32 }
 0x15e   :  { %p2996_p5 = scmp.ne.s32.totalorder %s205_s5, %s2995_s13  ;;  %p3000_p6 = scmp.lt.s32.totalorder %s205_s5, %s205_s5 }
 0x15f   :  { %p3001_p7 = scmp.lt.s32.totalorder %s2999_s1, %s2995_s13 }
 0x161   :  { %p3002_p8 = por %p3001_p7, %p3000_p6 }
 0x163   :  { %p3003_p9 = pnand %p3002_p8, %p2996_p5 }
 0x165   :  { %3006 = shalt.err (!%p3003_p9)
}
 0x166   :  { %207 = dma.hbm_to_vmem [thread:$0]  %s4023_s14, 16, %s205_s5, [#allocation26]  }
 0x167   :  { %s3230_s2 = smov [#allocation30]   ;;  %s3231_s29 = smov [#allocation33]  }
 0x168   :  { %s225_s0 = sshll.u32 %s3230_s2, 4  ;;  %s247_s11 = sshll.u32 %s3231_s29, 4  ;;  %s226_s0 = int_to_ptr.vmem [resolvable:$true] %s225_s0  ;;  %s248_s11 = int_to_ptr.vmem [resolvable:$true] %s247_s11 }
 0x169   :  { %s3007_s10 = scalar_lea.hbm %s4025_s16, 256 }
 0x16a   :  { %p3008_p10 = scmp.ne.s32.totalorder %s4025_s16, %s3007_s10  ;;  %p3011_p11 = scmp.lt.u32.totalorder %s3007_s10, %s4025_s16 }
 0x16c   :  { %p3013_p12 = pnand %p3011_p11, %p3008_p10 }
 0x16e   :  { %3016 = shalt.err (!%p3013_p12)
}
 0x16f   :  { %s3017_s14 = scalar_lea.vmem %s226_s0, 256  ;;  %p3022_p0 = scmp.lt.s32.totalorder %s226_s0, %s226_s0 }
 0x170   :  { %p3018_p13 = scmp.ne.s32.totalorder %s226_s0, %s3017_s14  ;;  %p3023_p1 = scmp.lt.s32.totalorder %s3017_s14, %s3017_s14 }
 0x172   :  { %p3024_p2 = por %p3023_p1, %p3022_p0 }
 0x174   :  { %p3025_p3 = pnand %p3024_p2, %p3018_p13 }
 0x176   :  { %3028 = shalt.err (!%p3025_p3)
}
 0x177   :  { %231 = dma.hbm_to_vmem [thread:$0]  %s4025_s16, 256, %s226_s0, [#allocation29], %s4062_s4, %s4062_s4, %s3215_s8  }
 0x178   :  { %s3029_s24 = scalar_lea.hbm %s4027_s18, 256 }
 0x179   :  { %p3030_p4 = scmp.ne.s32.totalorder %s4027_s18, %s3029_s24  ;;  %p3033_p5 = scmp.lt.u32.totalorder %s3029_s24, %s4027_s18 }
 0x17b   :  { %p3035_p6 = pnand %p3033_p5, %p3030_p4 }
 0x17d   :  { %3038 = shalt.err (!%p3035_p6)
}
 0x17e   :  { %s3039_s12 = scalar_lea.vmem %s248_s11, 256  ;;  %p3044_p8 = scmp.lt.s32.totalorder %s248_s11, %s248_s11 }
 0x17f   :  { %p3040_p7 = scmp.ne.s32.totalorder %s248_s11, %s3039_s12  ;;  %p3045_p9 = scmp.lt.s32.totalorder %s3039_s12, %s3039_s12 }
 0x181   :  { %p3046_p10 = por %p3045_p9, %p3044_p8 }
 0x183   :  { %p3047_p11 = pnand %p3046_p10, %p3040_p7 }
 0x185   :  { %3050 = shalt.err (!%p3047_p11)
}
 0x186   :  { %253 = dma.hbm_to_vmem [thread:$0]  %s4027_s18, 256, %s248_s11, [#allocation32], %s4062_s4, %s4062_s4, %s3215_s8  }
 0x187   :  { %s3232_s2 = smov [#allocation34]   ;;  %s3051_s17 = scalar_lea.hbm %s4028_s19, 16 }
 0x188   :  { %s260_s0 = sshll.u32 %s3232_s2, 4  ;;  %p3052_p12 = scmp.ne.s32.totalorder %s4028_s19, %s3051_s17  ;;  %s261_s0 = int_to_ptr.vmem [resolvable:$true] %s260_s0 }
 0x189   :  { %p3055_p13 = scmp.lt.u32.totalorder %s3051_s17, %s4028_s19 }
 0x18b   :  { %p3057_p0 = pnand %p3055_p13, %p3052_p12 }
 0x18d   :  { %3060 = shalt.err (!%p3057_p0)
}
 0x18e   :  { %s3061_s9 = scalar_lea.vmem %s261_s0, 16  ;;  %s3065_s18 = scalar_lea.vmem %s261_s0, 32 }
 0x18f   :  { %p3062_p1 = scmp.ne.s32.totalorder %s261_s0, %s3061_s9  ;;  %p3066_p2 = scmp.lt.s32.totalorder %s261_s0, %s261_s0 }
 0x190   :  { %p3067_p3 = scmp.lt.s32.totalorder %s3065_s18, %s3061_s9 }
 0x192   :  { %p3068_p4 = por %p3067_p3, %p3066_p2 }
 0x194   :  { %p3069_p5 = pnand %p3068_p4, %p3062_p1 }
 0x196   :  { %3072 = shalt.err (!%p3069_p5)
}
 0x197   :  { %263 = dma.hbm_to_vmem [thread:$0]  %s4028_s19, 16, %s261_s0, [#allocation35]  }
 0x198   :  { %3183 = dma.done.wait [#allocation5], 128  }
 0x199   :  { %3184 = vsyncadd [#allocation5], 4294967168 }
 0x19a   :  { %3185 = dma.done.wait [#allocation8], 48  }
 0x19b   :  { %3186 = vsyncadd [#allocation8], 4294967248 }
 0x19c   :  { %3187 = dma.done.wait [#allocation11], 512  }
 0x19d   :  { %3188 = vsyncadd [#allocation11], 4294966784 }
 0x19e   :  { %3189 = dma.done.wait [#allocation14], 272  }
 0x19f   :  { %3190 = vsyncadd [#allocation14], 4294967024 }
 0x1a0   :  { %3191 = dma.done.wait [#allocation17], 272  }
 0x1a1   :  { %3192 = vsyncadd [#allocation17], 4294967024 }
 0x1a2   :  { %3193 = dma.done.wait [#allocation20], 272  }
 0x1a3   :  { %3194 = vsyncadd [#allocation20], 4294967024 }
 0x1a4   :  { %3195 = dma.done.wait [#allocation23], 272  }
 0x1a5   :  { %3196 = vsyncadd [#allocation23], 4294967024 }
 0x1a6   :  { %3197 = dma.done.wait [#allocation26], 32  }
 0x1a7   :  { %3198 = vsyncadd [#allocation26], 4294967264 }
 0x1a8   :  { %3199 = dma.done.wait [#allocation29], 512  }
 0x1a9   :  { %3200 = vsyncadd [#allocation29], 4294966784 }
 0x1aa   :  { %3201 = dma.done.wait [#allocation32], 272  }
 0x1ab   :  { %3202 = vsyncadd [#allocation32], 4294967024 }
 0x1ac   :  { %3203 = dma.done.wait [#allocation35], 16  }
 0x1ad   :  { %3204 = vsyncadd [#allocation35], 4294967280  ;;  %v3233_v0 = vmov 0.0   ;;  %vm3234_vm0 = vmmov 0   ;;  %v2560_v1 = vld [vmem:[#allocation12] sm:$0xff]   ;;  %v2561_v2 = vld [vmem:[#allocation10] sm:$0xff]   ;;  %v467_v11 = vlaneseq }
 0x1ae   :  { %2355 = vmatprep.subr.bf16.mxu1 %v3233_v0  ;;  %2347 = vmatprep.subr.bf16.mxu0 %v3233_v0  ;;  %v2562_v3 = vld [vmem:[#allocation12 + $0x8] sm:$0xff]   ;;  %v2563_v4 = vld [vmem:[#allocation10 + $0x8] sm:$0xff]   ;;  %vm352_vm1 = vcmask 261120   ;;  %v3235_v9 = vmov 1966171168   ;;  %s3236_s19 = smov 96  }
 0x1af   :  { %2359 = vmatprep.mubr.msk.bf16.mxu1 %vm3234_vm0, %v3233_v0  ;;  %2351 = vmatprep.mubr.msk.bf16.mxu0 %vm3234_vm0, %v3233_v0  ;;  %v3659_v5 = vld [vmem:[#allocation7] sm:$0x1]  ;;  %v3661_v6 = vld [vmem:[#allocation4] sm:$0xff]   ;;  %v2565_v7 = vld [vmem:[#allocation15] sm:$0xff]   ;;  %v465_v10 = vunpack.c.l.s4 %v3235_v9  ;;  %v3675_v13 = vshrl.u32 %v467_v11, 7  ;;  %vm788_vm2 = vcmask 64512  }
 0x1b0   :  { %2356 = vmatpush3.bf16.msra.mxu1 %v2560_v1  ;;  %2348 = vmatpush3.bf16.msra.mxu0 %v2561_v2  ;;  %v2566_v8 = vld [vmem:[#allocation15 + $0x8] sm:$0xff]   ;;  %v2234_v36 = vld [vmem:[#allocation16] ss:$0 sm:$0xff]  ;;  %v2238_v45 = vld [vmem:[#allocation13] ss:$0 sm:$0xff]  ;;  %789 = vst.msk [vmem:[#allocation39] sm:$0xff] %vm788_vm2, %v3233_v0 }
 0x1b1   :  { %2357 = vmatprep.subr.bf16.mxu1 %v3233_v0  ;;  %2349 = vmatprep.subr.bf16.mxu0 %v3233_v0  ;;  %v466_v12 = vunpack.c.0.s8 %v465_v10  ;;  %v3682_v19 = vsub.s32 0, %v3675_v13  ;;  %790 = vst.msk [vmem:[#allocation39 + $0x8] sm:$0xff] %vm788_vm2, %v3233_v0  ;;  %v591_v52 = vand.u32 127, %v467_v11  ;;  %v3699_v55 = vld [vmem:[#allocation9] sm:$0x3]  ;;  %vm600_vm3 = vcmask 1041409  }
 0x1b2   :  { %vm587_vm4 = vcmp.eq.f32.partialorder %v3699_v55, 0.0  ;;  %vm402_vm5 = vcmask 785408   ;;  %vm604_vm6 = vcmask 58368   ;;  %v2568_v9 = vld [vmem:[#allocation19] sm:$0xff]   ;;  %v2569_v11 = vld [vmem:[#allocation19 + $0x8] sm:$0xff]   ;;  %s3238_s14 = smov 88  }
 0x1b3   :  { %v3678_v14 = vsub.s32 %v466_v12, %v3675_v13  ;;  %v594_v54 = vsub.s32 %v591_v52, %v3675_v13  ;;  %s3239_s5 = smov 120   ;;  %vm2137_vm11 = vcmask 254976   ;;  %vm973_vm12 = vcmask 1043456   ;;  %s3241_s30 = smov 80  }
 0x1b4   :  { %2358 = vmatpush3.bf16.msra.mxu1 %v2562_v3  ;;  %2350 = vmatpush3.bf16.msra.mxu0 %v2563_v4  ;;  %s3242_s25 = smov 112   ;;  %s3243_s20 = smov 48   ;;  %vm1310_vm13 = vcmask 130112   ;;  %vm1555_vm14 = vcmask 195712   ;;  %vm1800_vm15 = vcmask 261312  }
 0x1b5   :  { %2371 = vmatprep.subr.bf16.mxu1 %v3233_v0  ;;  %2363 = vmatprep.subr.bf16.mxu0 %v3233_v0  ;;  %s3244_s24 = smov 72   ;;  %s3245_s26 = smov 104  }
 0x1b6   :  { %s3246_s28 = smov 40   ;;  %s3247_s13 = smov 8  }
 0x1b7   :  { %2360 = vmatmul.mubr.msk.bf16.vlgmr.msra.gmra.mrb[0].mxu1 %vm352_vm1, %v3659_v5  ;;  %2352 = vmatmul.mubr.msk.bf16.vlgmr.msra.gmra.mrb[0].mxu0 %vm352_vm1, %v3661_v6  ;;  %s3248_s1 = smov 16   ;;  %s3249_s12 = smov 24  }
 0x1b8   :  { %2375 = vmatprep.mubr.msk.bf16.mxu1 %vm3234_vm0, %v3233_v0  ;;  %2367 = vmatprep.mubr.msk.bf16.mxu0 %vm3234_vm0, %v3233_v0  ;;  %s3250_s16 = smov [#allocation37]   ;;  %s3251_s2 = smov [#allocation40]  }
 0x1b9   :  { %2364 = vmatpush3.bf16.msra.mxu0 %v2565_v7  ;;  %2372 = vmatpush3.bf16.msra.mxu1 %v2568_v9  ;;  %s2162_s6 = sshll.u32 %s3250_s16, 4  ;;  %s2184_s0 = sshll.u32 %s3251_s2, 4  ;;  %s2163_s6 = int_to_ptr.vmem [resolvable:$true] %s2162_s6  ;;  %s2185_s0 = int_to_ptr.vmem [resolvable:$true] %s2184_s0 }
 0x1ba   :  { %2365 = vmatprep.subr.bf16.mxu0 %v3233_v0  ;;  %2373 = vmatprep.subr.bf16.mxu1 %v3233_v0  ;;  %s3073_s29 = scalar_lea.vmem %s2163_s6, 32  ;;  %p3078_p7 = scmp.lt.s32.totalorder %s2163_s6, %s2163_s6 }
 0x1bb   :  { %p3074_p6 = scmp.ne.s32.totalorder %s2163_s6, %s3073_s29  ;;  %p3079_p8 = scmp.lt.s32.totalorder %s3073_s29, %s3073_s29 }
 0x1bd   :  { %2366 = vmatpush3.bf16.msra.mxu0 %v2566_v8  ;;  %2374 = vmatpush3.bf16.msra.mxu1 %v2569_v11  ;;  %p3080_p9 = por %p3079_p8, %p3078_p7 }
 0x1be   :  { %2379 = vmatprep.subr.bf16.mxu0 %v3233_v0  ;;  %2387 = vmatprep.subr.bf16.mxu1 %v3233_v0 }
 0x1bf   :  { %p3081_p10 = pnand %p3080_p9, %p3074_p6 }
 0x1c0   :  { %2376 = vmatmul.mubr.msk.bf16.vlgmr.msra.gmra.mrb[4].mxu1 %vm352_vm1, %v3659_v5 }
 0x1c1   :  { %2389 = vmatprep.mubr.msk.bf16.mxu1 %vm3234_vm0, %v3233_v0 }
 0x28a   :  { %v457_v15 = vpop.f32.mrb[0].mxu1  ;;  %v390_v18 = vpop.f32.mrb[0].mxu0 }
 0x28b   :  { %v470_v16 = vrot.slane %v457_v15, %v3678_v14  ;;  %v2361_v17 = vpop.f32.mrb[1].mxu1  ;;  %v2353_v21 = vpop.f32.mrb[1].mxu0 }
 0x28c   :  { %v460_v20 = vpop.f32.mrb[2].mxu1  ;;  %v393_v25 = vpop.f32.mrb[2].mxu0  ;;  %v625_v17 = vsub.s32 1, %v3675_v13  ;;  %v2571_v21 = vld [vmem:[#allocation18 + $0x8] sm:$0xff]  }
 0x28d   :  { %v471_v22 = vcombine.high %v470_v16, %v470_v16  ;;  %v478_v23 = vrot.slane %v470_v16, %v3678_v14  ;;  %v2362_v24 = vpop.f32.mrb[3].mxu1  ;;  %v397_v26 = vpack.c.bf16 %v393_v25, %v390_v18  ;;  %v2354_v27 = vpop.f32.mrb[3].mxu0 }
 0x28e   :  { %v328_v24 = vunpack.c.h.bf16 %v3661_v6 }
 0x28f   :  { %v485_v28 = vrot.slane %v471_v22, %v3678_v14  ;;  %v489_v29 = vrot.slane %v478_v23, %v3682_v19  ;;  %v327_v22 = vunpack.c.l.bf16 %v3661_v6 }
 0x291   :  { %v496_v30 = vadd.f32 %v489_v29, %v390_v18  ;;  %v493_v31 = vrot.slane %v485_v28, %v3682_v19  ;;  %v2570_v18 = vld [vmem:[#allocation18] sm:$0xff]  }
 0x293   :  { %v497_v32 = vadd.f32 %v493_v31, %v393_v25  ;;  %2581 = vtanh.f32 %v496_v30  ;;  %v702_v52 = vpop.f32.mrb[4].mxu1 }
 0x295   :  { %2583 = vtanh.f32 %v497_v32 }
 0x29d   :  { %v2582_v33 = vpop.eup %2581 }
 0x29f   :  { %v2584_v34 = vpop.eup %2583 }
 0x2a0   :  { %v500_v35 = vpack.c.bf16 %v2584_v34, %v2582_v33 }
 0x2a2   :  { %2368 = vmatmul.mubr.msk.bf16.vlgmr.msra.gmra.mrb[4].mxu0 %vm352_vm1, %v500_v35 }
 0x2a3   :  { %2383 = vmatprep.mubr.msk.bf16.mxu0 %vm3234_vm0, %v3233_v0  ;;  %2380 = vmatpush3.bf16.msra.mxu0 %v2570_v18 }
 0x2a4   :  { %2381 = vmatprep.subr.bf16.mxu0 %v3233_v0 }
 0x2a7   :  { %2382 = vmatpush3.bf16.msra.mxu0 %v2571_v21 }
 0x2a8   :  { %2393 = vmatprep.subr.bf16.mxu0 %v3233_v0 }
 0x375   :  { %v561_v37 = vpop.f32.mrb[4].mxu0 }
 0x376   :  { %v562_v38 = vadd.f32 %v2234_v36, %v561_v37  ;;  %v2369_v39 = vpop.f32.mrb[5].mxu0 }
 0x377   :  { %v564_v40 = vpop.f32.mrb[6].mxu0 }
 0x378   :  { %v568_v41 = vadd.f32 %v2582_v33, %v562_v38  ;;  %v565_v42 = vadd.f32 %v2234_v36, %v564_v40  ;;  %v2370_v43 = vpop.f32.mrb[7].mxu0 }
 0x37a   :  { %2585 = vtanh.f32 %v568_v41  ;;  %v569_v44 = vadd.f32 %v2584_v34, %v565_v42 }
 0x37c   :  { %2587 = vtanh.f32 %v569_v44 }
 0x384   :  { %v2586_v46 = vpop.eup %2585 }
 0x385   :  { %v579_v47 = vmul.f32 %v2586_v46, %v2238_v45 }
 0x386   :  { %v2588_v48 = vpop.eup %2587 }
 0x387   :  { %v581_v49 = vsel %vm352_vm1, %v579_v47, 0.0  ;;  %v580_v50 = vmul.f32 %v2588_v48, %v2238_v45 }
 0x388   :  { %582 = vadd.xlane.f32.xlu0 %v581_v49 }
 0x389   :  { %v584_v51 = vsel %vm352_vm1, %v580_v50, 0.0 }
 0x38c   :  { %585 = vadd.xlane.f32.xlu0 %v584_v51 }
 0x3a2   :  { %399 = vrot.lane.b32.xlu0 %v397_v26, %s3236_s19 }
 0x415   :  { %v583_v53 = vpop.xlane.xlu0 %582 }
 0x416   :  { %v595_v57 = vrot.slane %v583_v53, %v594_v54  ;;  %v2377_v53 = vpop.f32.mrb[5].mxu1 }
 0x419   :  { %v586_v56 = vpop.xlane.xlu0 %585 }
 0x41a   :  { %v599_v58 = vrot.slane %v586_v56, %v594_v54  ;;  %v705_v54 = vpop.f32.mrb[6].mxu1 }
 0x41b   :  { %v2378_v56 = vpop.f32.mrb[7].mxu1 }
 0x41c   :  { %v601_v59 = vsel %vm600_vm3, %v599_v58, %v595_v57  ;;  %v902_v57 = vrot.slane %v3699_v55, %v3678_v14 }
 0x41d   :  { %v400_v60 = vpop.permute.xlu0 %399  ;;  %v603_v61 = vsel %vm587_vm4, -1e+09, %v601_v59  ;;  %v3237_v59 = vmov 0  }
 0x41e   :  { %403 = vst.msk [vmem:[#allocation2] sm:$0xff] %vm402_vm5, %v400_v60  ;;  %v605_v62 = vsel %vm604_vm6, %v603_v61, -inf  ;;  %v910_v58 = vrot.slane %v902_v57, %v3678_v14 }
 0x41f   :  { %606 = vmax.xlane.f32.xlu1 %v605_v62  ;;  %v903_v62 = vcombine.high %v902_v57, %v902_v57 }
 0x420   :  { %vm920_vm7 = vcmp.eq.f32.partialorder %v910_v58, 0.0 }
 0x421   :  { %v922_v60 = vsel %vm920_vm7, 1, %v3237_v59  ;;  %v917_v9 = vrot.slane %v903_v62, %v3678_v14 }
 0x423   :  { %vm921_vm9 = vcmp.eq.f32.partialorder %v917_v9, 0.0 }
 0x425   :  { %v791_v63 = vld [vmem:[#allocation2] sm:$0xff] }
 0x426   :  { %v3704_v1 = vcombine.high %v791_v63, %v791_v63  ;;  %v3720_v5 = vcombine.low %v791_v63, %v791_v63 }
 0x428   :  { %845 = vrot.lane.b32.xlu0 %v3704_v1, %s3236_s19 }
 0x49a   :  { %v846_v48 = vpop.permute.xlu0 %845 }
 0x49b   :  { %v851_v51 = vsel %vm788_vm2, %v846_v48, 0 }
 0x4ac   :  { %v607_v2 = vpop.xlane.xlu1 %606 }
 0x4ad   :  { %v608_v3 = vsub.f32 %v603_v61, %v607_v2  ;;  %v927_v61 = vrot.slane %v922_v60, %v3682_v19 }
 0x4af   :  { %v609_v4 = vmul.f32 1.442695, %v608_v3  ;;  %vm3755_vm8 = vcmp.eq.s32.totalorder %v927_v61, 1 }
 0x4b1   :  { %2589 = vpow2.f32 %v609_v4 }
 0x4bb   :  { %v2590_v7 = vpop.eup %2589 }
 0x4bc   :  { %v611_v8 = vsel %vm604_vm6, %v2590_v7, 0.0 }
 0x4bd   :  { %612 = vadd.xlane.f32.xlu1 %v611_v8 }
 0x54a   :  { %v613_v10 = vpop.xlane.xlu1 %612 }
 0x54b   :  { %2591 = vrcp.f32 %v613_v10 }
 0x555   :  { %v2592_v12 = vpop.eup %2591 }
 0x556   :  { %v615_v15 = vmul.f32 %v2592_v12, %v2590_v7  ;;  %v2245_v12 = vld [vmem:[#allocation21] ss:$0 sm:$0xff] }
 0x558   :  { %v619_v16 = vrot.slane %v615_v15, %v3682_v19  ;;  %2139 = vst.msk [vmem:[#allocation37] sm:$0x3] %vm604_vm6, %v615_v15  ;;  %v626_v20 = vrot.slane %v615_v15, %v625_v17  ;;  %v923_v17 = vsel %vm921_vm9, 1, %v3237_v59 }
 0x55a   :  { %621 = vbcast.lane.b32.xlu1 %v619_v16, 256 }
 0x55e   :  { %628 = vbcast.lane.b32.xlu1 %v626_v20, 256 }
 0x562   :  { %797 = vrot.lane.b32.xlu1 %v3720_v5, %s3236_s19 }
 0x5cc   :  { %v622_v23 = vpop.permute.xlu1 %621 }
 0x5cd   :  { %v630_v13 = vmul.f32 %v622_v23, %v327_v22  ;;  %v931_v23 = vrot.slane %v923_v17, %v3682_v19 }
 0x5cf   :  { %v632_v25 = vsel %vm352_vm1, %v630_v13, 0.0  ;;  %vm3764_vm10 = vcmp.eq.s32.totalorder %v931_v23, 1 }
 0x5d0   :  { %v633_v26 = vrot.slane %v632_v25, 4  ;;  %v629_v27 = vpop.permute.xlu1 %628 }
 0x5d1   :  { %v631_v28 = vmul.f32 %v629_v27, %v328_v24 }
 0x5d2   :  { %v634_v29 = vadd.f32 %v633_v26, %v632_v25 }
 0x5d3   :  { %v639_v30 = vsel %vm352_vm1, %v631_v28, 0.0 }
 0x5d4   :  { %v635_v31 = vrot.slane %v634_v29, 2  ;;  %v640_v32 = vrot.slane %v639_v30, 4  ;;  %v798_v33 = vpop.permute.xlu1 %797 }
 0x5d5   :  { %v803_v34 = vsel %vm788_vm2, %v798_v33, 0 }
 0x5d6   :  { %v636_v35 = vadd.f32 %v635_v31, %v634_v29  ;;  %v641_v36 = vadd.f32 %v640_v32, %v639_v30  ;;  %2388 = vmatpush3.bf16.xpose.msra.mxu1 %v803_v34 }
 0x5d7   :  { %2399 = vmatprep.subr.bf16.mxu1 %v3233_v0 }
 0x5d8   :  { %v637_v37 = vrot.slane %v636_v35, 1  ;;  %v642_v38 = vrot.slane %v641_v36, 2 }
 0x5da   :  { %v638_v39 = vadd.f32 %v637_v37, %v636_v35  ;;  %v643_v40 = vadd.f32 %v642_v38, %v641_v36 }
 0x5dc   :  { %v644_v41 = vrot.slane %v643_v40, 1  ;;  %v646_v42 = vpack.c.bf16 %v638_v39, %v638_v39 }
 0x5dd   :  { %2390 = vmatmul.mubr.msk.bf16.vlgmr.msra.gmra.mrb[8].mxu1 %vm788_vm2, %v3720_v5 }
 0x5de   :  { %v645_v43 = vadd.f32 %v644_v41, %v643_v40  ;;  %2401 = vmatprep.mubr.msk.bf16.mxu1 %vm3234_vm0, %v3233_v0  ;;  %v710_v46 = vunpack.c.l.b16 %v646_v42 }
 0x5e0   :  { %v647_v44 = vpack.c.bf16 %v645_v43, %v645_v43  ;;  %v3739_v45 = vsel %vm600_vm3, %v645_v43, %v638_v39 }
 0x5e2   :  { %v711_v47 = vunpack.c.l.b16 %v647_v44 }
 0x5e4   :  { %v712_v49 = vsel %vm600_vm3, %v711_v47, %v710_v46 }
 0x5e5   :  { %v713_v50 = vpack.c.b16 %v712_v49, %v712_v49 }
 0x5e7   :  { %2384 = vmatmul.mubr.msk.bf16.vlgmr.msra.gmra.mrb[8].mxu0 %vm352_vm1, %v713_v50 }
 0x5e8   :  { %2394 = vmatpush3.bf16.xpose.msra.mxu0 %v851_v51  ;;  %2395 = vmatprep.mubr.msk.bf16.mxu0 %vm3234_vm0, %v3233_v0  ;;  %v958_v51 = vld [vmem:[#allocation39] sm:$0xff] }
 0x5e9   :  { %2405 = vmatprep.subr.bf16.mxu0 %v3233_v0 }
 0x5ef   :  { %2396 = vmatmul.mubr.msk.bf16.vlgmr.msra.gmra.mrb[12].mxu0 %vm788_vm2, %v3704_v1 }
 0x5f0   :  { %2407 = vmatprep.mubr.msk.bf16.mxu0 %vm3234_vm0, %v3233_v0 }
 0x6b0   :  { %v839_v63 = vpop.f32.mrb[8].mxu1 }
 0x6b1   :  { %v893_v3 = vmul.f32 0.35355338, %v839_v63  ;;  %v2391_v4 = vpop.f32.mrb[9].mxu1 }
 0x6b2   :  { %v842_v7 = vpop.f32.mrb[10].mxu1 }
 0x6b3   :  { %v2392_v8 = vpop.f32.mrb[11].mxu1  ;;  %v934_v55 = vsel %vm3755_vm8, -1e+09, %v893_v3  ;;  %v959_v3 = vld [vmem:[#allocation39 + $0x8] sm:$0xff] }
 0x6b4   :  { %v936_v10 = vsel %vm788_vm2, %v934_v55, -inf }
 0x6b5   :  { %937 = vmax.xlane.f32.xlu1 %v936_v10 }
 0x6ba   :  { %v763_v11 = vpop.f32.mrb[8].mxu0 }
 0x6bb   :  { %v764_v15 = vadd.f32 %v763_v11, %v702_v52  ;;  %v2385_v16 = vpop.f32.mrb[9].mxu0 }
 0x6bc   :  { %v766_v18 = vpop.f32.mrb[10].mxu0 }
 0x6bd   :  { %v776_v20 = vadd.f32 %v2245_v12, %v764_v15  ;;  %v2386_v21 = vpop.f32.mrb[11].mxu0 }
 0x6bf   :  { %v2246_v13 = vmul.f32 -1.442695, %v776_v20 }
 0x6c1   :  { %2593 = vpow2.f32 %v2246_v13 }
 0x6c2   :  { %v887_v25 = vpop.f32.mrb[12].mxu0 }
 0x6c3   :  { %v894_v14 = vmul.f32 0.35355338, %v887_v25  ;;  %v2397_v27 = vpop.f32.mrb[13].mxu0 }
 0x6c4   :  { %v890_v28 = vpop.f32.mrb[14].mxu0 }
 0x6c5   :  { %v2398_v29 = vpop.f32.mrb[15].mxu0  ;;  %v935_v30 = vsel %vm3764_vm10, -1e+09, %v894_v14 }
 0x6c6   :  { %968 = vrot.lane.b32.xlu1 %v3720_v5, %s4062_s4  ;;  %v939_v31 = vsel %vm788_vm2, %v935_v30, -inf }
 0x6c7   :  { %940 = vmax.xlane.f32.xlu0 %v939_v31 }
 0x6ca   :  { %1074 = vrot.lane.b32.xlu1 %v3720_v5, %s3238_s14 }
 0x6cb   :  { %v2594_v19 = vpop.eup %2593 }
 0x6cc   :  { %v780_v32 = vadd.f32 1.0, %v2594_v19 }
 0x6ce   :  { %2595 = vrcp.f32 %v780_v32  ;;  %1125 = vrot.lane.b32.xlu1 %v3704_v1, %s3238_s14 }
 0x6d2   :  { %1072 = vrot.lane.b32.xlu1 %v3720_v5, %s3239_s5 }
 0x6d8   :  { %v2596_v33 = vpop.eup %2595 }
 0x6d9   :  { %v3777_v34 = vmul.f32 %v2596_v33, %v3739_v45 }
 0x6db   :  { %2140 = vst.msk [vmem:[#allocation40] sm:$0x3] %vm2137_vm11, %v3777_v34 }
 0x742   :  { %v938_v35 = vpop.xlane.xlu1 %937 }
 0x743   :  { %v942_v36 = vsub.f32 %v934_v55, %v938_v35 }
 0x745   :  { %v944_v37 = vmul.f32 1.442695, %v942_v36 }
 0x746   :  { %v969_v38 = vpop.permute.xlu1 %968 }
 0x747   :  { %2597 = vpow2.f32 %v944_v37  ;;  %v975_v39 = vsel %vm973_vm12, %v969_v38, 0 }
 0x748   :  { %2400 = vmatpush3.bf16.msra.mxu1 %v975_v39 }
 0x749   :  { %2411 = vmatprep.subr.bf16.mxu1 %v3233_v0 }
 0x74a   :  { %v1075_v49 = vpop.permute.xlu1 %1074 }
 0x74b   :  { %v1080_v54 = vsel %vm788_vm2, %v1075_v49, 0 }
 0x74e   :  { %v1126_v57 = vpop.permute.xlu1 %1125 }
 0x74f   :  { %v1131_v8 = vsel %vm788_vm2, %v1126_v57, 0 }
 0x751   :  { %v2598_v40 = vpop.eup %2597 }
 0x752   :  { %v948_v41 = vsel %vm788_vm2, %v2598_v40, 0.0  ;;  %v1073_v60 = vpop.permute.xlu1 %1072 }
 0x753   :  { %949 = vadd.xlane.f32.xlu0 %v948_v41 }
 0x754   :  { %v941_v42 = vpop.xlane.xlu0 %940 }
 0x755   :  { %v943_v43 = vsub.f32 %v935_v30, %v941_v42 }
 0x757   :  { %v946_v44 = vmul.f32 1.442695, %v943_v43 }
 0x759   :  { %2599 = vpow2.f32 %v946_v44 }
 0x763   :  { %v2600_v45 = vpop.eup %2599 }
 0x764   :  { %v951_v46 = vsel %vm788_vm2, %v2600_v45, 0.0 }
 0x765   :  { %952 = vadd.xlane.f32.xlu0 %v951_v46 }
 0x77b   :  { %1017 = vrot.lane.b32.xlu0 %v3704_v1, %s4062_s4  ;;  %s3240_s4 = smov 56  }
 0x77f   :  { %1123 = vrot.lane.b32.xlu0 %v3704_v1, %s3239_s5 }
 0x7e0   :  { %v950_v47 = vpop.xlane.xlu0 %949 }
 0x7e1   :  { %2601 = vrcp.f32 %v950_v47 }
 0x7eb   :  { %v2602_v48 = vpop.eup %2601 }
 0x7ec   :  { %v955_v50 = vmul.f32 %v2602_v48, %v2598_v40 }
 0x7ee   :  { %v960_v52 = vmul.f32 0.25, %v955_v50  ;;  %v966_v53 = vpack.c.bf16 %v955_v50, %v955_v50 }
 0x7f0   :  { %v962_v56 = vadd.f32 %v960_v52, %v958_v51  ;;  %2402 = vmatmul.mubr.msk.bf16.vlgmr.msra.gmra.mrb[12].mxu1 %vm788_vm2, %v966_v53 }
 0x7f1   :  { %2412 = vmatpush3.bf16.xpose.msra.mxu1 %v1080_v54  ;;  %2413 = vmatprep.mubr.msk.bf16.mxu1 %vm3234_vm0, %v3233_v0 }
 0x7f2   :  { %964 = vst.msk [vmem:[#allocation39] sm:$0xff] %vm788_vm2, %v962_v56  ;;  %v953_v58 = vpop.xlane.xlu0 %952  ;;  %2423 = vmatprep.subr.bf16.mxu1 %v3233_v0 }
 0x7f3   :  { %2603 = vrcp.f32 %v953_v58 }
 0x7f6   :  { %v1018_v59 = vpop.permute.xlu0 %1017 }
 0x7f7   :  { %v1023_v61 = vsel %vm973_vm12, %v1018_v59, 0 }
 0x7f8   :  { %2406 = vmatpush3.bf16.msra.mxu0 %v1023_v61  ;;  %2414 = vmatmul.mubr.msk.bf16.vlgmr.msra.gmra.mrb[16].mxu1 %vm788_vm2, %v1073_v60 }
 0x7f9   :  { %2417 = vmatprep.subr.bf16.mxu0 %v3233_v0  ;;  %2425 = vmatprep.mubr.msk.bf16.mxu1 %vm3234_vm0, %v3233_v0  ;;  %v1199_v56 = vld [vmem:[#allocation39] sm:$0xff] }
 0x7fa   :  { %v1124_v9 = vpop.permute.xlu0 %1123 }
 0x7fd   :  { %v2604_v62 = vpop.eup %2603 }
 0x7fe   :  { %v957_v63 = vmul.f32 %v2604_v62, %v2600_v45 }
 0x800   :  { %v961_v4 = vmul.f32 0.25, %v957_v63  ;;  %v967_v7 = vpack.c.bf16 %v957_v63, %v957_v63 }
 0x802   :  { %v963_v55 = vadd.f32 %v961_v4, %v959_v3  ;;  %2408 = vmatmul.mubr.msk.bf16.vlgmr.msra.gmra.mrb[16].mxu0 %vm788_vm2, %v967_v7 }
 0x803   :  { %2418 = vmatpush3.bf16.xpose.msra.mxu0 %v1131_v8  ;;  %2419 = vmatprep.mubr.msk.bf16.mxu0 %vm3234_vm0, %v3233_v0 }
 0x804   :  { %965 = vst.msk [vmem:[#allocation39 + $0x8] sm:$0xff] %vm788_vm2, %v963_v55  ;;  %2429 = vmatprep.subr.bf16.mxu0 %v3233_v0 }
 0x80a   :  { %2420 = vmatmul.mubr.msk.bf16.vlgmr.msra.gmra.mrb[20].mxu0 %vm788_vm2, %v1124_v9 }
 0x80b   :  { %2431 = vmatprep.mubr.msk.bf16.mxu0 %vm3234_vm0, %v3233_v0  ;;  %v1200_v55 = vld [vmem:[#allocation39 + $0x8] sm:$0xff] }
 0x8c3   :  { %v1011_v10 = vpop.f32.mrb[12].mxu1 }
 0x8c4   :  { %v2403_v11 = vpop.f32.mrb[13].mxu1 }
 0x8c5   :  { %v1014_v12 = vpop.f32.mrb[14].mxu1 }
 0x8c6   :  { %v2404_v15 = vpop.f32.mrb[15].mxu1 }
 0x8cb   :  { %v1116_v16 = vpop.f32.mrb[16].mxu1 }
 0x8cc   :  { %v1173_v17 = vmul.f32 0.35355338, %v1116_v16  ;;  %v2415_v18 = vpop.f32.mrb[17].mxu1 }
 0x8cd   :  { %v1119_v20 = vpop.f32.mrb[18].mxu1 }
 0x8ce   :  { %v2416_v21 = vpop.f32.mrb[19].mxu1  ;;  %v1175_v23 = vsel %vm3755_vm8, -1e+09, %v1173_v17 }
 0x8cf   :  { %v1177_v13 = vsel %vm788_vm2, %v1175_v23, -inf }
 0x8d0   :  { %1178 = vmax.xlane.f32.xlu1 %v1177_v13 }
 0x8d5   :  { %v1059_v25 = vpop.f32.mrb[16].mxu0 }
 0x8d6   :  { %v1065_v14 = vpack.c.bf16 %v1059_v25, %v1011_v10  ;;  %v2409_v27 = vpop.f32.mrb[17].mxu0 }
 0x8d7   :  { %v1062_v28 = vpop.f32.mrb[18].mxu0 }
 0x8d8   :  { %1066 = vst.msk [vmem:[#allocation3] sm:$0xff] %vm788_vm2, %v1065_v14  ;;  %v2410_v29 = vpop.f32.mrb[19].mxu0 }
 0x8dd   :  { %v1167_v30 = vpop.f32.mrb[20].mxu0 }
 0x8de   :  { %v1174_v31 = vmul.f32 0.35355338, %v1167_v30  ;;  %v2421_v19 = vpop.f32.mrb[21].mxu0 }
 0x8df   :  { %v1170_v32 = vpop.f32.mrb[22].mxu0 }
 0x8e0   :  { %v2422_v33 = vpop.f32.mrb[23].mxu0  ;;  %v1176_v35 = vsel %vm3764_vm10, -1e+09, %v1174_v31 }
 0x8e1   :  { %1209 = vrot.lane.b32.xlu1 %v3720_v5, %s3240_s4  ;;  %v1180_v36 = vsel %vm788_vm2, %v1176_v35, -inf }
 0x8e2   :  { %1181 = vmax.xlane.f32.xlu0 %v1180_v36 }
 0x8e5   :  { %1319 = vrot.lane.b32.xlu1 %v3720_v5, %s3241_s30 }
 0x8e9   :  { %1370 = vrot.lane.b32.xlu1 %v3704_v1, %s3241_s30 }
 0x8ed   :  { %1317 = vrot.lane.b32.xlu1 %v3720_v5, %s3242_s25 }
 0x95d   :  { %v1179_v37 = vpop.xlane.xlu1 %1178 }
 0x95e   :  { %v1183_v38 = vsub.f32 %v1175_v23, %v1179_v37 }
 0x960   :  { %v1185_v39 = vmul.f32 1.442695, %v1183_v38 }
 0x961   :  { %v1210_v40 = vpop.permute.xlu1 %1209 }
 0x962   :  { %2605 = vpow2.f32 %v1185_v39  ;;  %v1215_v41 = vsel %vm973_vm12, %v1210_v40, 0 }
 0x963   :  { %2424 = vmatpush3.bf16.msra.mxu1 %v1215_v41 }
 0x964   :  { %2435 = vmatprep.subr.bf16.mxu1 %v3233_v0 }
 0x965   :  { %v1320_v51 = vpop.permute.xlu1 %1319 }
 0x966   :  { %v1325_v57 = vsel %vm788_vm2, %v1320_v51, 0 }
 0x969   :  { %v1371_v59 = vpop.permute.xlu1 %1370 }
 0x96a   :  { %v1376_v9 = vsel %vm788_vm2, %v1371_v59, 0 }
 0x96c   :  { %v2606_v42 = vpop.eup %2605 }
 0x96d   :  { %v1189_v43 = vsel %vm788_vm2, %v2606_v42, 0.0  ;;  %v1318_v62 = vpop.permute.xlu1 %1317 }
 0x96e   :  { %1190 = vadd.xlane.f32.xlu0 %v1189_v43 }
 0x96f   :  { %v1182_v44 = vpop.xlane.xlu0 %1181 }
 0x970   :  { %v1184_v45 = vsub.f32 %v1176_v35, %v1182_v44 }
 0x972   :  { %v1187_v46 = vmul.f32 1.442695, %v1184_v45 }
 0x974   :  { %2607 = vpow2.f32 %v1187_v46 }
 0x97e   :  { %v2608_v47 = vpop.eup %2607 }
 0x97f   :  { %v1192_v48 = vsel %vm788_vm2, %v2608_v47, 0.0 }
 0x980   :  { %1193 = vadd.xlane.f32.xlu0 %v1192_v48 }
 0x996   :  { %1257 = vrot.lane.b32.xlu0 %v3704_v1, %s3240_s4 }
 0x99a   :  { %1368 = vrot.lane.b32.xlu0 %v3704_v1, %s3242_s25 }
 0x9fb   :  { %v1191_v49 = vpop.xlane.xlu0 %1190 }
 0x9fc   :  { %2609 = vrcp.f32 %v1191_v49 }
 0xa06   :  { %v2610_v50 = vpop.eup %2609 }
 0xa07   :  { %v1196_v52 = vmul.f32 %v2610_v50, %v2606_v42 }
 0xa09   :  { %v1201_v53 = vmul.f32 0.25, %v1196_v52  ;;  %v1207_v54 = vpack.c.bf16 %v1196_v52, %v1196_v52 }
 0xa0b   :  { %v1203_v58 = vadd.f32 %v1201_v53, %v1199_v56  ;;  %2426 = vmatmul.mubr.msk.bf16.vlgmr.msra.gmra.mrb[20].mxu1 %vm788_vm2, %v1207_v54 }
 0xa0c   :  { %2436 = vmatpush3.bf16.xpose.msra.mxu1 %v1325_v57  ;;  %2437 = vmatprep.mubr.msk.bf16.mxu1 %vm3234_vm0, %v3233_v0 }
 0xa0d   :  { %1205 = vst.msk [vmem:[#allocation39] sm:$0xff] %vm788_vm2, %v1203_v58  ;;  %v1194_v60 = vpop.xlane.xlu0 %1193  ;;  %2447 = vmatprep.subr.bf16.mxu1 %v3233_v0 }
 0xa0e   :  { %2611 = vrcp.f32 %v1194_v60 }
 0xa11   :  { %v1258_v61 = vpop.permute.xlu0 %1257 }
 0xa12   :  { %v1263_v63 = vsel %vm973_vm12, %v1258_v61, 0 }
 0xa13   :  { %2430 = vmatpush3.bf16.msra.mxu0 %v1263_v63  ;;  %2438 = vmatmul.mubr.msk.bf16.vlgmr.msra.gmra.mrb[24].mxu1 %vm788_vm2, %v1318_v62 }
 0xa14   :  { %2441 = vmatprep.subr.bf16.mxu0 %v3233_v0  ;;  %2449 = vmatprep.mubr.msk.bf16.mxu1 %vm3234_vm0, %v3233_v0  ;;  %v1444_v58 = vld [vmem:[#allocation39] sm:$0xff] }
 0xa15   :  { %v1369_v11 = vpop.permute.xlu0 %1368 }
 0xa18   :  { %v2612_v3 = vpop.eup %2611 }
 0xa19   :  { %v1198_v4 = vmul.f32 %v2612_v3, %v2608_v47 }
 0xa1b   :  { %v1202_v7 = vmul.f32 0.25, %v1198_v4  ;;  %v1208_v8 = vpack.c.bf16 %v1198_v4, %v1198_v4 }
 0xa1d   :  { %v1204_v10 = vadd.f32 %v1202_v7, %v1200_v55  ;;  %2432 = vmatmul.mubr.msk.bf16.vlgmr.msra.gmra.mrb[24].mxu0 %vm788_vm2, %v1208_v8 }
 0xa1e   :  { %2442 = vmatpush3.bf16.xpose.msra.mxu0 %v1376_v9  ;;  %2443 = vmatprep.mubr.msk.bf16.mxu0 %vm3234_vm0, %v3233_v0 }
 0xa1f   :  { %1206 = vst.msk [vmem:[#allocation39 + $0x8] sm:$0xff] %vm788_vm2, %v1204_v10  ;;  %2453 = vmatprep.subr.bf16.mxu0 %v3233_v0 }
 0xa25   :  { %2444 = vmatmul.mubr.msk.bf16.vlgmr.msra.gmra.mrb[28].mxu0 %vm788_vm2, %v1369_v11 }
 0xa26   :  { %2455 = vmatprep.mubr.msk.bf16.mxu0 %vm3234_vm0, %v3233_v0  ;;  %v1445_v10 = vld [vmem:[#allocation39 + $0x8] sm:$0xff] }
 0xade   :  { %v3845_v12 = vpop.f32.mrb[20].mxu1 }
 0xadf   :  { %v2427_v15 = vpop.f32.mrb[21].mxu1 }
 0xae0   :  { %v1254_v16 = vpop.f32.mrb[22].mxu1 }
 0xae1   :  { %v2428_v17 = vpop.f32.mrb[23].mxu1 }
 0xae6   :  { %v1361_v18 = vpop.f32.mrb[24].mxu1 }
 0xae7   :  { %v1418_v20 = vmul.f32 0.35355338, %v1361_v18  ;;  %v2439_v21 = vpop.f32.mrb[25].mxu1 }
 0xae8   :  { %v1364_v23 = vpop.f32.mrb[26].mxu1 }
 0xae9   :  { %v2440_v13 = vpop.f32.mrb[27].mxu1  ;;  %v1420_v25 = vsel %vm3755_vm8, -1e+09, %v1418_v20 }
 0xaea   :  { %v1422_v14 = vsel %vm788_vm2, %v1420_v25, -inf }
 0xaeb   :  { %1423 = vmax.xlane.f32.xlu1 %v1422_v14 }
 0xaf0   :  { %v3850_v27 = vpop.f32.mrb[24].mxu0 }
 0xaf1   :  { %v1305_v28 = vpack.c.bf16 %v3850_v27, %v3845_v12  ;;  %v2433_v29 = vpop.f32.mrb[25].mxu0 }
 0xaf2   :  { %v1302_v30 = vpop.f32.mrb[26].mxu0 }
 0xaf3   :  { %v2434_v31 = vpop.f32.mrb[27].mxu0 }
 0xaf8   :  { %v1412_v19 = vpop.f32.mrb[28].mxu0 }
 0xaf9   :  { %v1419_v32 = vmul.f32 0.35355338, %v1412_v19  ;;  %v2445_v33 = vpop.f32.mrb[29].mxu0 }
 0xafa   :  { %v1415_v35 = vpop.f32.mrb[30].mxu0 }
 0xafb   :  { %v2446_v36 = vpop.f32.mrb[31].mxu0  ;;  %v1421_v37 = vsel %vm3764_vm10, -1e+09, %v1419_v32 }
 0xafc   :  { %1454 = vrot.lane.b32.xlu1 %v3720_v5, %s3243_s20  ;;  %v1425_v38 = vsel %vm788_vm2, %v1421_v37, -inf }
 0xafd   :  { %1426 = vmax.xlane.f32.xlu0 %v1425_v38 }
 0xb00   :  { %1564 = vrot.lane.b32.xlu1 %v3720_v5, %s3244_s24 }
 0xb04   :  { %1615 = vrot.lane.b32.xlu1 %v3704_v1, %s3244_s24 }
 0xb08   :  { %1562 = vrot.lane.b32.xlu1 %v3720_v5, %s3245_s26 }
 0xb78   :  { %v1424_v39 = vpop.xlane.xlu1 %1423 }
 0xb79   :  { %v1428_v40 = vsub.f32 %v1420_v25, %v1424_v39 }
 0xb7b   :  { %v1430_v41 = vmul.f32 1.442695, %v1428_v40 }
 0xb7c   :  { %v1455_v42 = vpop.permute.xlu1 %1454 }
 0xb7d   :  { %2613 = vpow2.f32 %v1430_v41  ;;  %v1460_v43 = vsel %vm973_vm12, %v1455_v42, 0 }
 0xb7e   :  { %2448 = vmatpush3.bf16.msra.mxu1 %v1460_v43 }
 0xb7f   :  { %2459 = vmatprep.subr.bf16.mxu1 %v3233_v0 }
 0xb80   :  { %v1565_v53 = vpop.permute.xlu1 %1564 }
 0xb81   :  { %v1570_v59 = vsel %vm788_vm2, %v1565_v53, 0 }
 0xb84   :  { %v1616_v61 = vpop.permute.xlu1 %1615 }
 0xb85   :  { %v1621_v11 = vsel %vm788_vm2, %v1616_v61, 0 }
 0xb87   :  { %v2614_v44 = vpop.eup %2613 }
 0xb88   :  { %v1434_v45 = vsel %vm788_vm2, %v2614_v44, 0.0  ;;  %v1563_v3 = vpop.permute.xlu1 %1562 }
 0xb89   :  { %1435 = vadd.xlane.f32.xlu0 %v1434_v45 }
 0xb8a   :  { %v1427_v46 = vpop.xlane.xlu0 %1426 }
 0xb8b   :  { %v1429_v47 = vsub.f32 %v1421_v37, %v1427_v46 }
 0xb8d   :  { %v1432_v48 = vmul.f32 1.442695, %v1429_v47 }
 0xb8f   :  { %2615 = vpow2.f32 %v1432_v48 }
 0xb99   :  { %v2616_v49 = vpop.eup %2615 }
 0xb9a   :  { %v1437_v50 = vsel %vm788_vm2, %v2616_v49, 0.0 }
 0xb9b   :  { %1438 = vadd.xlane.f32.xlu0 %v1437_v50 }
 0xbb1   :  { %1502 = vrot.lane.b32.xlu0 %v3704_v1, %s3243_s20 }
 0xbb5   :  { %1613 = vrot.lane.b32.xlu0 %v3704_v1, %s3245_s26 }
 0xc16   :  { %v1436_v51 = vpop.xlane.xlu0 %1435 }
 0xc17   :  { %2617 = vrcp.f32 %v1436_v51 }
 0xc21   :  { %v2618_v52 = vpop.eup %2617 }
 0xc22   :  { %v1441_v54 = vmul.f32 %v2618_v52, %v2614_v44 }
 0xc24   :  { %v1446_v56 = vmul.f32 0.25, %v1441_v54  ;;  %v1452_v57 = vpack.c.bf16 %v1441_v54, %v1441_v54 }
 0xc26   :  { %v1448_v60 = vadd.f32 %v1446_v56, %v1444_v58  ;;  %2450 = vmatmul.mubr.msk.bf16.vlgmr.msra.gmra.mrb[28].mxu1 %vm788_vm2, %v1452_v57 }
 0xc27   :  { %2460 = vmatpush3.bf16.xpose.msra.mxu1 %v1570_v59  ;;  %2461 = vmatprep.mubr.msk.bf16.mxu1 %vm3234_vm0, %v3233_v0 }
 0xc28   :  { %1450 = vst.msk [vmem:[#allocation39] sm:$0xff] %vm788_vm2, %v1448_v60  ;;  %v1439_v62 = vpop.xlane.xlu0 %1438  ;;  %2471 = vmatprep.subr.bf16.mxu1 %v3233_v0 }
 0xc29   :  { %2619 = vrcp.f32 %v1439_v62 }
 0xc2c   :  { %v1503_v63 = vpop.permute.xlu0 %1502 }
 0xc2d   :  { %v1508_v4 = vsel %vm973_vm12, %v1503_v63, 0 }
 0xc2e   :  { %2454 = vmatpush3.bf16.msra.mxu0 %v1508_v4  ;;  %2462 = vmatmul.mubr.msk.bf16.vlgmr.msra.gmra.mrb[32].mxu1 %vm788_vm2, %v1563_v3 }
 0xc2f   :  { %2465 = vmatprep.subr.bf16.mxu0 %v3233_v0  ;;  %2473 = vmatprep.mubr.msk.bf16.mxu1 %vm3234_vm0, %v3233_v0  ;;  %v1689_v58 = vld [vmem:[#allocation39] sm:$0xff] }
 0xc30   :  { %v1614_v16 = vpop.permute.xlu0 %1613 }
 0xc33   :  { %v2620_v7 = vpop.eup %2619 }
 0xc34   :  { %v1443_v8 = vmul.f32 %v2620_v7, %v2616_v49 }
 0xc36   :  { %v1447_v55 = vmul.f32 0.25, %v1443_v8  ;;  %v1453_v9 = vpack.c.bf16 %v1443_v8, %v1443_v8 }
 0xc38   :  { %v1449_v15 = vadd.f32 %v1447_v55, %v1445_v10  ;;  %2456 = vmatmul.mubr.msk.bf16.vlgmr.msra.gmra.mrb[32].mxu0 %vm788_vm2, %v1453_v9 }
 0xc39   :  { %2466 = vmatpush3.bf16.xpose.msra.mxu0 %v1621_v11  ;;  %2467 = vmatprep.mubr.msk.bf16.mxu0 %vm3234_vm0, %v3233_v0 }
 0xc3a   :  { %1451 = vst.msk [vmem:[#allocation39 + $0x8] sm:$0xff] %vm788_vm2, %v1449_v15  ;;  %2477 = vmatprep.subr.bf16.mxu0 %v3233_v0  ;;  %v2572_v15 = vld [vmem:[#allocation22] sm:$0xff]  }
 0xc40   :  { %2468 = vmatmul.mubr.msk.bf16.vlgmr.msra.gmra.mrb[36].mxu0 %vm788_vm2, %v1614_v16  ;;  %v2573_v16 = vld [vmem:[#allocation22 + $0x8] sm:$0xff]  }
 0xc41   :  { %2479 = vmatprep.mubr.msk.bf16.mxu0 %vm3234_vm0, %v3233_v0  ;;  %v1690_v7 = vld [vmem:[#allocation39 + $0x8] sm:$0xff] }
 0xcf9   :  { %v1496_v17 = vpop.f32.mrb[28].mxu1 }
 0xcfa   :  { %v2451_v18 = vpop.f32.mrb[29].mxu1 }
 0xcfb   :  { %v1499_v20 = vpop.f32.mrb[30].mxu1 }
 0xcfc   :  { %v2452_v21 = vpop.f32.mrb[31].mxu1 }
 0xd01   :  { %v1606_v23 = vpop.f32.mrb[32].mxu1 }
 0xd02   :  { %v1663_v13 = vmul.f32 0.35355338, %v1606_v23  ;;  %v2463_v25 = vpop.f32.mrb[33].mxu1 }
 0xd03   :  { %v1609_v14 = vpop.f32.mrb[34].mxu1  ;;  %v2574_v25 = vld [vmem:[#allocation28] sm:$0xff]  }
 0xd04   :  { %v2464_v29 = vpop.f32.mrb[35].mxu1  ;;  %v1665_v30 = vsel %vm3755_vm8, -1e+09, %v1663_v13 }
 0xd05   :  { %v1667_v31 = vsel %vm788_vm2, %v1665_v30, -inf  ;;  %v2575_v29 = vld [vmem:[#allocation28 + $0x8] sm:$0xff]  }
 0xd06   :  { %1668 = vmax.xlane.f32.xlu1 %v1667_v31  ;;  %v2271_v31 = vld [vmem:[#allocation24] ss:$0 sm:$0xff] }
 0xd0b   :  { %v1544_v19 = vpop.f32.mrb[32].mxu0 }
 0xd0c   :  { %v1550_v32 = vpack.c.bf16 %v1544_v19, %v1496_v17  ;;  %v2457_v33 = vpop.f32.mrb[33].mxu0 }
 0xd0d   :  { %v1547_v35 = vpop.f32.mrb[34].mxu0 }
 0xd0e   :  { %v2458_v36 = vpop.f32.mrb[35].mxu0 }
 0xd13   :  { %v1657_v37 = vpop.f32.mrb[36].mxu0 }
 0xd14   :  { %v1664_v38 = vmul.f32 0.35355338, %v1657_v37  ;;  %v2469_v39 = vpop.f32.mrb[37].mxu0 }
 0xd15   :  { %v1660_v40 = vpop.f32.mrb[38].mxu0 }
 0xd16   :  { %v2470_v41 = vpop.f32.mrb[39].mxu0  ;;  %v1666_v42 = vsel %vm3764_vm10, -1e+09, %v1664_v38 }
 0xd17   :  { %1699 = vrot.lane.b32.xlu1 %v3720_v5, %s3246_s28  ;;  %v1670_v2 = vsel %vm788_vm2, %v1666_v42, -inf }
 0xd18   :  { %1671 = vmax.xlane.f32.xlu0 %v1670_v2 }
 0xd1b   :  { %1307 = vrot.lane.b32.xlu1 %v1305_v28, %s3247_s13 }
 0xd1f   :  { %1552 = vrot.lane.b32.xlu1 %v1550_v32, %s3248_s1 }
 0xd93   :  { %v1669_v43 = vpop.xlane.xlu1 %1668 }
 0xd94   :  { %v1673_v44 = vsub.f32 %v1665_v30, %v1669_v43  ;;  %v1934_v30 = vpack.c.bf16 %v3777_v34, %v3777_v34 }
 0xd96   :  { %v1675_v45 = vmul.f32 1.442695, %v1673_v44 }
 0xd97   :  { %v1700_v26 = vpop.permute.xlu1 %1699 }
 0xd98   :  { %2621 = vpow2.f32 %v1675_v45  ;;  %v1705_v46 = vsel %vm973_vm12, %v1700_v26, 0 }
 0xd99   :  { %2472 = vmatpush3.bf16.msra.mxu1 %v1705_v46 }
 0xd9a   :  { %2483 = vmatprep.subr.bf16.mxu1 %v3233_v0 }
 0xd9b   :  { %v1308_v5 = vpop.permute.xlu1 %1307 }
 0xd9c   :  { %1311 = vst.msk [vmem:[#allocation3] sm:$0xff] %vm1310_vm13, %v1308_v5 }
 0xd9f   :  { %v1553_v47 = vpop.permute.xlu1 %1552 }
 0xda0   :  { %1556 = vst.msk [vmem:[#allocation3] sm:$0xff] %vm1555_vm14, %v1553_v47 }
 0xda2   :  { %v2622_v12 = vpop.eup %2621 }
 0xda3   :  { %v1679_v27 = vsel %vm788_vm2, %v2622_v12, 0.0 }
 0xda4   :  { %1680 = vadd.xlane.f32.xlu0 %v1679_v27  ;;  %v2576_v27 = vld [vmem:[#allocation30] sm:$0xff]  }
 0xda5   :  { %v1672_v28 = vpop.xlane.xlu0 %1671 }
 0xda6   :  { %v1674_v48 = vsub.f32 %v1666_v42, %v1672_v28  ;;  %v2577_v28 = vld [vmem:[#allocation30 + $0x8] sm:$0xff]  }
 0xda8   :  { %v1677_v49 = vmul.f32 1.442695, %v1674_v48 }
 0xdaa   :  { %2623 = vpow2.f32 %v1677_v49 }
 0xdb4   :  { %v2624_v50 = vpop.eup %2623 }
 0xdb5   :  { %v1682_v51 = vsel %vm788_vm2, %v2624_v50, 0.0 }
 0xdb6   :  { %1683 = vadd.xlane.f32.xlu0 %v1682_v51 }
 0xdcc   :  { %1747 = vrot.lane.b32.xlu0 %v3704_v1, %s3246_s28 }
 0xe31   :  { %v1681_v52 = vpop.xlane.xlu0 %1680 }
 0xe32   :  { %2625 = vrcp.f32 %v1681_v52 }
 0xe3c   :  { %v2626_v53 = vpop.eup %2625 }
 0xe3d   :  { %v1686_v54 = vmul.f32 %v2626_v53, %v2622_v12 }
 0xe3f   :  { %v1691_v56 = vmul.f32 0.25, %v1686_v54  ;;  %v1697_v57 = vpack.c.bf16 %v1686_v54, %v1686_v54 }
 0xe41   :  { %v1693_v59 = vadd.f32 %v1691_v56, %v1689_v58  ;;  %2474 = vmatmul.mubr.msk.bf16.vlgmr.msra.gmra.mrb[36].mxu1 %vm788_vm2, %v1697_v57  ;;  %v2275_v56 = vld [vmem:[#allocation25] ss:$0 sm:$0xff]  ;;  %v2276_v58 = vld [vmem:[#allocation27] ss:$0 sm:$0xff] }
 0xe42   :  { %2487 = vmatprep.mubr.msk.bf16.mxu1 %vm3234_vm0, %v3233_v0  ;;  %2484 = vmatpush3.bf16.msra.mxu1 %v2572_v15 }
 0xe43   :  { %1695 = vst.msk [vmem:[#allocation39] sm:$0xff] %vm788_vm2, %v1693_v59  ;;  %v1684_v60 = vpop.xlane.xlu0 %1683  ;;  %2485 = vmatprep.subr.bf16.mxu1 %v3233_v0 }
 0xe44   :  { %2627 = vrcp.f32 %v1684_v60 }
 0xe46   :  { %2486 = vmatpush3.bf16.msra.mxu1 %v2573_v16 }
 0xe47   :  { %v1748_v61 = vpop.permute.xlu0 %1747  ;;  %2499 = vmatprep.subr.bf16.mxu1 %v3233_v0 }
 0xe48   :  { %v1753_v1 = vsel %vm973_vm12, %v1748_v61, 0 }
 0xe49   :  { %2478 = vmatpush3.bf16.msra.mxu0 %v1753_v1 }
 0xe4a   :  { %2491 = vmatprep.subr.bf16.mxu0 %v3233_v0 }
 0xe4e   :  { %v2628_v62 = vpop.eup %2627 }
 0xe4f   :  { %v1688_v63 = vmul.f32 %v2628_v62, %v2624_v50 }
 0xe51   :  { %v1692_v3 = vmul.f32 0.25, %v1688_v63  ;;  %v1698_v4 = vpack.c.bf16 %v1688_v63, %v1688_v63 }
 0xe53   :  { %v1694_v8 = vadd.f32 %v1692_v3, %v1690_v7  ;;  %2480 = vmatmul.mubr.msk.bf16.vlgmr.msra.gmra.mrb[40].mxu0 %vm788_vm2, %v1698_v4 }
 0xe54   :  { %2495 = vmatprep.mubr.msk.bf16.mxu0 %vm3234_vm0, %v3233_v0  ;;  %2492 = vmatpush3.bf16.msra.mxu0 %v2576_v27 }
 0xe55   :  { %1696 = vst.msk [vmem:[#allocation39 + $0x8] sm:$0xff] %vm788_vm2, %v1694_v8  ;;  %2493 = vmatprep.subr.bf16.mxu0 %v3233_v0 }
 0xe58   :  { %2494 = vmatpush3.bf16.msra.mxu0 %v2577_v28 }
 0xe59   :  { %2507 = vmatprep.subr.bf16.mxu0 %v3233_v0 }
 0xf14   :  { %v1741_v55 = vpop.f32.mrb[36].mxu1 }
 0xf15   :  { %v2475_v9 = vpop.f32.mrb[37].mxu1 }
 0xf16   :  { %v1744_v10 = vpop.f32.mrb[38].mxu1 }
 0xf17   :  { %v2476_v11 = vpop.f32.mrb[39].mxu1 }
 0xf26   :  { %v1789_v17 = vpop.f32.mrb[40].mxu0 }
 0xf27   :  { %v1795_v18 = vpack.c.bf16 %v1789_v17, %v1741_v55  ;;  %v2481_v20 = vpop.f32.mrb[41].mxu0 }
 0xf28   :  { %v1792_v21 = vpop.f32.mrb[42].mxu0 }
 0xf29   :  { %1797 = vrot.lane.b32.xlu1 %v1795_v18, %s3249_s12  ;;  %v2482_v23 = vpop.f32.mrb[43].mxu0 }
 0xf9b   :  { %v1798_v13 = vpop.permute.xlu1 %1797 }
 0xf9c   :  { %1801 = vst.msk [vmem:[#allocation3] sm:$0xff] %vm1800_vm15, %v1798_v13 }
 0xfa3   :  { %v1802_v14 = vld [vmem:[#allocation3] sm:$0xff] }
 0xfa4   :  { %2488 = vmatmul.mubr.msk.bf16.vlgmr.msra.gmra.mrb[40].mxu1 %vm352_vm1, %v1802_v14 }
 0xfa5   :  { %2500 = vmatpush3.bf16.msra.mxu1 %v2574_v25  ;;  %2503 = vmatprep.mubr.msk.bf16.mxu1 %vm3234_vm0, %v3233_v0 }
 0xfa6   :  { %2501 = vmatprep.subr.bf16.mxu1 %v3233_v0 }
 0xfa9   :  { %2502 = vmatpush3.bf16.msra.mxu1 %v2575_v29 }
 0xfac   :  { %2504 = vmatmul.mubr.msk.bf16.vlgmr.msra.gmra.mrb[44].mxu1 %vm352_vm1, %v1934_v30 }
0x1077   :  { %v1863_v19 = vpop.f32.mrb[40].mxu1 }
0x1078   :  { %v1864_v32 = vadd.f32 %v2271_v31, %v1863_v19  ;;  %v2489_v33 = vpop.f32.mrb[41].mxu1 }
0x1079   :  { %v1866_v35 = vpop.f32.mrb[42].mxu1  ;;  %v2578_v33 = vld [vmem:[#allocation33] sm:$0xff]  }
0x107a   :  { %v1867_v36 = vadd.f32 %v2271_v31, %v1866_v35  ;;  %v2490_v37 = vpop.f32.mrb[43].mxu1  ;;  %v1870_v38 = vadd.f32 %v1864_v32, %v327_v22  ;;  %v2579_v35 = vld [vmem:[#allocation33 + $0x8] sm:$0xff]  }
0x107b   :  { %v2283_v37 = vld [vmem:[#allocation31] ss:$0 sm:$0xff] }
0x107c   :  { %v1872_v39 = vsel %vm352_vm1, %v1870_v38, 0.0  ;;  %v1871_v40 = vadd.f32 %v1867_v36, %v328_v24 }
0x107d   :  { %1873 = vadd.xlane.f32.xlu0 %v1872_v39 }
0x107e   :  { %v1875_v34 = vsel %vm352_vm1, %v1871_v40, 0.0 }
0x107f   :  { %1876 = vadd.xlane.f32.xlu1 %v1875_v34  ;;  %v3930_v41 = vpop.f32.mrb[44].mxu1 }
0x1080   :  { %v2505_v42 = vpop.f32.mrb[45].mxu1 }
0x1081   :  { %v2058_v2 = vpop.f32.mrb[46].mxu1 }
0x1082   :  { %v2506_v43 = vpop.f32.mrb[47].mxu1 }
0x110a   :  { %v1874_v44 = vpop.xlane.xlu0 %1873 }
0x110b   :  { %v1879_v45 = vmul.f32 0.03125, %v1874_v44 }
0x110c   :  { %v1877_v26 = vpop.xlane.xlu1 %1876 }
0x110d   :  { %v1881_v46 = vsub.f32 %v1870_v38, %v1879_v45  ;;  %v1880_v5 = vmul.f32 0.03125, %v1877_v26 }
0x110f   :  { %v1882_v22 = vsub.f32 %v1871_v40, %v1880_v5  ;;  %v1883_v47 = vmul.f32 %v1881_v46, %v1881_v46 }
0x1111   :  { %v1885_v12 = vsel %vm352_vm1, %v1883_v47, 0.0  ;;  %v1884_v6 = vmul.f32 %v1882_v22, %v1882_v22 }
0x1112   :  { %1886 = vadd.xlane.f32.xlu0 %v1885_v12 }
0x1113   :  { %v1888_v24 = vsel %vm352_vm1, %v1884_v6, 0.0 }
0x1116   :  { %1889 = vadd.xlane.f32.xlu0 %v1888_v24 }
0x119f   :  { %v1887_v48 = vpop.xlane.xlu0 %1886 }
0x11a0   :  { %v1891_v49 = vmul.f32 0.03125, %v1887_v48 }
0x11a2   :  { %v1893_v50 = vadd.f32 1e-05, %v1891_v49 }
0x11a3   :  { %v1890_v51 = vpop.xlane.xlu0 %1889 }
0x11a4   :  { %2629 = vrsqrt.f32 %v1893_v50  ;;  %v1892_v52 = vmul.f32 0.03125, %v1890_v51 }
0x11a6   :  { %v1894_v53 = vadd.f32 1e-05, %v1892_v52 }
0x11a8   :  { %2631 = vrsqrt.f32 %v1894_v53 }
0x11ae   :  { %v2630_v54 = vpop.eup %2629 }
0x11af   :  { %v1897_v57 = vmul.f32 %v2630_v54, %v1881_v46 }
0x11b1   :  { %v1906_v59 = vmul.f32 %v2275_v56, %v1897_v57 }
0x11b2   :  { %v2632_v60 = vpop.eup %2631 }
0x11b3   :  { %v1915_v61 = vadd.f32 %v2276_v58, %v1906_v59  ;;  %v1898_v1 = vmul.f32 %v2632_v60, %v1882_v22 }
0x11b5   :  { %v1917_v62 = vsel %vm352_vm1, %v1915_v61, 0.0  ;;  %v1907_v63 = vmul.f32 %v2275_v56, %v1898_v1 }
0x11b6   :  { %v1918_v3 = vrot.slane %v1917_v62, 4 }
0x11b7   :  { %v1916_v4 = vadd.f32 %v2276_v58, %v1907_v63 }
0x11b8   :  { %v1919_v7 = vadd.f32 %v1918_v3, %v1917_v62 }
0x11b9   :  { %v1924_v8 = vsel %vm352_vm1, %v1916_v4, 0.0 }
0x11ba   :  { %v1920_v55 = vrot.slane %v1919_v7, 2  ;;  %v1925_v9 = vrot.slane %v1924_v8, 4 }
0x11bc   :  { %v1921_v10 = vadd.f32 %v1920_v55, %v1919_v7  ;;  %v1926_v11 = vadd.f32 %v1925_v9, %v1924_v8 }
0x11be   :  { %v1927_v15 = vrot.slane %v1926_v11, 2  ;;  %v1922_v16 = vrot.slane %v1921_v10, 1 }
0x11c0   :  { %v1928_v17 = vadd.f32 %v1927_v15, %v1926_v11  ;;  %v1923_v18 = vadd.f32 %v1922_v16, %v1921_v10 }
0x11c2   :  { %v1929_v20 = vrot.slane %v1928_v17, 1  ;;  %v1932_v21 = vmul.f32 0.125, %v1923_v18 }
0x11c4   :  { %v1930_v23 = vadd.f32 %v1929_v20, %v1928_v17  ;;  %v1939_v25 = vpack.c.bf16 %v1932_v21, %v1932_v21 }
0x11c6   :  { %v1933_v13 = vmul.f32 0.125, %v1930_v23  ;;  %v1947_v30 = vunpack.c.l.b16 %v1939_v25 }
0x11c8   :  { %v1940_v14 = vpack.c.bf16 %v1933_v13, %v1933_v13  ;;  %v2143_v29 = vsel %vm600_vm3, %v1933_v13, %v1932_v21 }
0x11c9   :  { %2145 = vst.msk [vmem:[#allocation42] sm:$0x3] %vm2137_vm11, %v2143_v29 }
0x11ca   :  { %v1948_v31 = vunpack.c.l.b16 %v1940_v14 }
0x11cc   :  { %v1949_v19 = vsel %vm600_vm3, %v1948_v31, %v1947_v30 }
0x11cd   :  { %v1950_v32 = vpack.c.b16 %v1949_v19, %v1949_v19 }
0x11cf   :  { %2496 = vmatmul.mubr.msk.bf16.vlgmr.msra.gmra.mrb[44].mxu0 %vm352_vm1, %v1950_v32 }
0x11d0   :  { %2511 = vmatprep.mubr.msk.bf16.mxu0 %vm3234_vm0, %v3233_v0  ;;  %2508 = vmatpush3.bf16.msra.mxu0 %v2578_v33 }
0x11d1   :  { %2509 = vmatprep.subr.bf16.mxu0 %v3233_v0 }
0x11d4   :  { %2510 = vmatpush3.bf16.msra.mxu0 %v2579_v35 }
0x12a2   :  { %v2000_v36 = vpop.f32.mrb[44].mxu0 }
0x12a3   :  { %v2056_v38 = vadd.f32 %v3930_v41, %v2000_v36  ;;  %v2497_v39 = vpop.f32.mrb[45].mxu0 }
0x12a4   :  { %v2003_v40 = vpop.f32.mrb[46].mxu0 }
0x12a5   :  { %v2068_v34 = vadd.f32 %v2283_v37, %v2056_v38  ;;  %v2498_v42 = vpop.f32.mrb[47].mxu0 }
0x12a7   :  { %v2069_v2 = vmax.f32 %v2068_v34, 0.0 }
0x12a9   :  { %v2070_v43 = vpack.c.bf16 %v2069_v2, %v2069_v2 }
0x12ab   :  { %2512 = vmatmul.mubr.msk.bf16.vlgmr.msra.gmra.mrb[48].mxu0 %vm352_vm1, %v2070_v43 }
0x12ac   :  { %3084 = shalt.err (!%p3081_p10)
}
0x12ad   :  { %s3085_s10 = scalar_lea.hbm %s4030_s21, 32 }
0x12ae   :  { %p3086_p11 = scmp.ne.s32.totalorder %s4030_s21, %s3085_s10  ;;  %p3089_p12 = scmp.lt.u32.totalorder %s3085_s10, %s4030_s21 }
0x12b0   :  { %p3091_p13 = pnand %p3089_p12, %p3086_p11 }
0x12b2   :  { %3094 = shalt.err (!%p3091_p13)
}
0x12b3   :  { %2165 = dma.vmem_to_hbm [thread:$0]  %s2163_s6, 32, %s4030_s21, [#allocation38]  }
0x12b4   :  { %s3095_s11 = scalar_lea.vmem %s2185_s0, 32  ;;  %p3100_p1 = scmp.lt.s32.totalorder %s2185_s0, %s2185_s0 }
0x12b5   :  { %p3096_p0 = scmp.ne.s32.totalorder %s2185_s0, %s3095_s11  ;;  %p3101_p2 = scmp.lt.s32.totalorder %s3095_s11, %s3095_s11 }
0x12b7   :  { %p3102_p3 = por %p3101_p2, %p3100_p1 }
0x12b9   :  { %p3103_p4 = pnand %p3102_p3, %p3096_p0 }
0x12bb   :  { %3106 = shalt.err (!%p3103_p4)
}
0x12bc   :  { %s3107_s5 = scalar_lea.hbm %s4032_s23, 32 }
0x12bd   :  { %p3108_p5 = scmp.ne.s32.totalorder %s4032_s23, %s3107_s5  ;;  %p3111_p6 = scmp.lt.u32.totalorder %s3107_s5, %s4032_s23 }
0x12bf   :  { %p3113_p7 = pnand %p3111_p6, %p3108_p5 }
0x12c1   :  { %3116 = shalt.err (!%p3113_p7)
}
0x12c2   :  { %2187 = dma.vmem_to_hbm [thread:$0]  %s2185_s0, 32, %s4032_s23, [#allocation41]  }
0x12c3   :  { %s3252_s26 = smov [#allocation39]  }
0x12c4   :  { %s2171_s28 = sshll.u32 %s3252_s26, 4  ;;  %s2172_s28 = int_to_ptr.vmem [resolvable:$true] %s2171_s28 }
0x12c5   :  { %s3117_s1 = scalar_lea.vmem %s2172_s28, 256  ;;  %p3122_p9 = scmp.lt.s32.totalorder %s2172_s28, %s2172_s28 }
0x12c6   :  { %p3118_p8 = scmp.ne.s32.totalorder %s2172_s28, %s3117_s1  ;;  %p3123_p10 = scmp.lt.s32.totalorder %s3117_s1, %s3117_s1 }
0x12c8   :  { %p3124_p11 = por %p3123_p10, %p3122_p9 }
0x12ca   :  { %p3125_p12 = pnand %p3124_p11, %p3118_p8 }
0x12cc   :  { %3128 = shalt.err (!%p3125_p12)
}
0x12cd   :  { %s3129_s6 = scalar_lea.hbm %s4031_s22, 256 }
0x12ce   :  { %p3130_p13 = scmp.ne.s32.totalorder %s4031_s22, %s3129_s6  ;;  %p3133_p0 = scmp.lt.u32.totalorder %s3129_s6, %s4031_s22 }
0x12d0   :  { %p3135_p1 = pnand %p3133_p0, %p3130_p13 }
0x12d2   :  { %3138 = shalt.err (!%p3135_p1)
}
0x12d3   :  { %s3253_s0 = smov 128   ;;  %s3254_s15 = smov [#allocation42]  }
0x12d4   :  { %2177 = dma.vmem_to_hbm [thread:$0]  %s2172_s28, 256, %s4031_s22, [#allocation38], %s3253_s0, %s3253_s0, %s3247_s13  }
0x12d5   :  { %s2194_s7 = sshll.u32 %s3254_s15, 4  ;;  %s2195_s7 = int_to_ptr.vmem [resolvable:$true] %s2194_s7 }
0x12d6   :  { %s3139_s27 = scalar_lea.vmem %s2195_s7, 32  ;;  %p3144_p3 = scmp.lt.s32.totalorder %s2195_s7, %s2195_s7 }
0x12d7   :  { %p3140_p2 = scmp.ne.s32.totalorder %s2195_s7, %s3139_s27  ;;  %p3145_p4 = scmp.lt.s32.totalorder %s3139_s27, %s3139_s27 }
0x12d9   :  { %p3146_p5 = por %p3145_p4, %p3144_p3 }
0x12db   :  { %p3147_p6 = pnand %p3146_p5, %p3140_p2 }
0x12dd   :  { %3150 = shalt.err (!%p3147_p6)
}
0x12de   :  { %s4072_s8 = sld [smem:[#allocation67_spill]] }
0x12e4   :  { %s3151_s11 = scalar_lea.hbm %s4072_s8, 32 }
0x12e5   :  { %p3152_p7 = scmp.ne.s32.totalorder %s4072_s8, %s3151_s11  ;;  %p3155_p8 = scmp.lt.u32.totalorder %s3151_s11, %s4072_s8 }
0x12e7   :  { %p3157_p9 = pnand %p3155_p8, %p3152_p7 }
0x12e9   :  { %3160 = shalt.err (!%p3157_p9)
}
0x12ea   :  { %2197 = dma.vmem_to_hbm [thread:$0]  %s2195_s7, 32, %s4072_s8, [#allocation41]   ;;  %v2284_v0 = vld [vmem:[#allocation34] ss:$0 sm:$0xff] }
0x12eb   :  { %s3255_s30 = smov [#allocation36]  }
0x12ec   :  { %s2152_s25 = sshll.u32 %s3255_s30, 4  ;;  %s2153_s25 = int_to_ptr.vmem [resolvable:$true] %s2152_s25 }
0x12ed   :  { %s3161_s20 = scalar_lea.vmem %s2153_s25, 32  ;;  %p3166_p11 = scmp.lt.s32.totalorder %s2153_s25, %s2153_s25 }
0x12ee   :  { %p3162_p10 = scmp.ne.s32.totalorder %s2153_s25, %s3161_s20  ;;  %p3167_p12 = scmp.lt.s32.totalorder %s3161_s20, %s3161_s20 }
0x12f0   :  { %p3168_p13 = por %p3167_p12, %p3166_p11 }
0x12f2   :  { %p3169_p0 = pnand %p3168_p13, %p3162_p10 }
0x137e   :  { %v2131_v41 = vpop.f32.mrb[48].mxu0 }
0x137f   :  { %v2132_v44 = vadd.f32 %v2284_v0, %v2131_v41  ;;  %v2513_v45 = vpop.f32.mrb[49].mxu0 }
0x1380   :  { %v2134_v26 = vpop.f32.mrb[50].mxu0 }
0x1381   :  { %v2514_v46 = vpop.f32.mrb[51].mxu0  ;;  %2138 = vst.msk [vmem:[#allocation36] sm:$0x3] %vm2137_vm11, %v2132_v44 }
0x1382   :  { %3172 = shalt.err (!%p3169_p0)
}
0x1383   :  { %s4073_s26 = sld [smem:[#allocation66_spill]] }
0x1389   :  { %s3173_s28 = scalar_lea.hbm %s4073_s26, 32 }
0x138a   :  { %p3174_p1 = scmp.ne.s32.totalorder %s4073_s26, %s3173_s28  ;;  %p3177_p2 = scmp.lt.u32.totalorder %s3173_s28, %s4073_s26 }
0x138c   :  { %p3179_p3 = pnand %p3177_p2, %p3174_p1 }
0x138e   :  { %3182 = shalt.err (!%p3179_p3)
}
0x138f   :  { %2155 = dma.vmem_to_hbm [thread:$0]  %s2153_s25, 32, %s4073_s26, [#allocation6]  }
0x1390   :  { %3205 = dma.done.wait [#allocation6], 32  }
0x1391   :  { %3206 = vsyncadd [#allocation6], 4294967264 }
0x1392   :  { %3207 = dma.done.wait [#allocation38], 288  }
0x1393   :  { %3208 = vsyncadd [#allocation38], 4294967008 }
0x1394   :  { %3209 = dma.done.wait [#allocation41], 64  }
0x1395   :  { %3210 = vsyncadd [#allocation41], 4294967232 }
0x1396   :  { %2213 = vsyncpa [#allocation5], 1 }
0x1397   :  { %2214 = vsyncpa [#allocation8], 1 }
0x1398   :  { %2215 = vsyncpa [#allocation11], 1 }
0x1399   :  { %2216 = vsyncpa [#allocation14], 1 }
0x139a   :  { %2217 = vsyncpa [#allocation17], 1 }
0x139b   :  { %2218 = vsyncpa [#allocation20], 1 }
0x139c   :  { %2219 = vsyncpa [#allocation23], 1 }
0x139d   :  { %2220 = vsyncpa [#allocation26], 1 }
0x139e   :  { %2221 = vsyncpa [#allocation29], 1 }
0x139f   :  { %2222 = vsyncpa [#allocation32], 1 }
0x13a0   :  { %2223 = vsyncpa [#allocation35], 1 }
0x13a1   :  { %2224 = vsyncpa [#allocation6], 1 }
0x13a2   :  { %2225 = vsyncpa [#allocation38], 1 }
0x13a3   :  { %2226 = vsyncpa [#allocation41], 1 }

</bundles_post_ra>
